<compile_context>
chip_gen: v6e
topology: v6e:2x2x1
jax: 0.10.0
libtpu: 0.0.40
codegen_flags: <defaults>
</compile_context>

<pallas_src>
import functools

import jax
import jax.numpy as jnp
from jax.experimental import pallas as pl
from jax.experimental.pallas import tpu as pltpu

PAD = 4  # max dilation/padding across the four grouped convs


# -----------------------------------------------------------------------------
# Fused kernel: one batch element per grid step.
#   out(2C, H*W) = bias_fused + sum over 72 taps of Wf_tap(2C,C) @ window_tap(C, H*Wp)
# where every window_tap is a contiguous slice of the flattened padded plane.
# -----------------------------------------------------------------------------
def _pcf_kernel(C, H, W, Wp, x0_ref, x1_ref, wf_ref, bf_ref, o_ref):
    # x0_ref, x1_ref : (C, F)      row-major flattened zero-padded planes
    # wf_ref         : (72, 2C, C) folded weights, row = ((d-1)*9 + ky*3 + kx)*2 + stream
    # bf_ref         : (2C, 1)     fused bias (1x1 bias + folded grouped biases)
    # o_ref          : (2C, H, W)  NCHW output block for this batch element
    L = H * Wp                   # output-aligned flat columns (incl. per-row junk gaps)
    q0 = PAD * Wp + PAD          # flat offset of output pixel (0, 0)

    acc = jnp.zeros((2 * C, L), jnp.float32)
    r = 0
    for di in range(4):          # dilation d = di + 1
        d = di + 1
        for ky in range(3):
            for kx in range(3):
                start = q0 + (ky - 1) * d * Wp + (kx - 1) * d
                w0 = x0_ref[:, start:start + L]              # (C, L) lane-dense slice
                w1 = x1_ref[:, start:start + L]
                acc = acc + jnp.dot(wf_ref[2 * r], w0,
                                    preferred_element_type=jnp.float32)
                acc = acc + jnp.dot(wf_ref[2 * r + 1], w1,
                                    preferred_element_type=jnp.float32)
                r += 1

    acc = acc + bf_ref[...]      # fused bias, broadcast along lanes

    # Crop the per-row junk (padding gap) columns and store NCHW directly.
    for h in range(H):
        o_ref[:, h, :] = acc[:, h * Wp:h * Wp + W]


# -----------------------------------------------------------------------------
# Parameter construction (deterministic, matches the nn.Module's shapes)
# -----------------------------------------------------------------------------
def init_params(key, channel):
    C = channel
    keys = jax.random.split(key, 10)
    params = {}
    for i, d in enumerate((1, 2, 3, 4)):
        params[f"g{d}_w"] = 0.1 * jax.random.normal(
            keys[2 * i], (C, 2, 3, 3), jnp.float32)          # Conv2d(2C,C,3,groups=C)
        params[f"g{d}_b"] = 0.1 * jax.random.normal(
            keys[2 * i + 1], (C,), jnp.float32)
    params["p_w"] = 0.1 * jax.random.normal(
        keys[8], (2 * C, 4 * C, 1, 1), jnp.float32)          # Conv2d(4C,2C,1)
    params["p_b"] = 0.1 * jax.random.normal(keys[9], (2 * C,), jnp.float32)
    return params


def _flatten_padded(x, H, W):
    # (N, C, H, W) -> (N, C, (Hp+1)*Wp): zero-pad PAD on every spatial side plus
    # one extra bottom row of slack so every shifted tap slice stays in-bounds,
    # then flatten row-major (the reshape is a free bitcast in XLA).
    Hp, Wp = H + 2 * PAD, W + 2 * PAD
    xp = jnp.pad(x, ((0, 0), (0, 0), (PAD, PAD + 1), (PAD, PAD)))
    N, C = x.shape[:2]
    return xp.reshape(N, C, (Hp + 1) * Wp)


# -----------------------------------------------------------------------------
# Forward pass (single fused Pallas kernel, NCHW in / NCHW out, no transposes)
# -----------------------------------------------------------------------------
@functools.partial(jax.jit, static_argnames=("three_head",))
def pcf_forward(params, f_t0, f_t1, f=None, three_head=True):
    N, C, H, W = f_t0.shape
    Hp, Wp = H + 2 * PAD, W + 2 * PAD
    F = (Hp + 1) * Wp

    x0 = _flatten_padded(f_t0, H, W)
    x1 = _flatten_padded(f_t1, H, W)

    # --- host-side weight folding (tiny) ------------------------------------
    # f_s[2c] = f_t0[c], f_s[2c+1] = f_t1[c]; grouped conv group c uses weight
    # g_w[c, j] on stream j.  Fold the per-channel tap weight into the 1x1 mix:
    #   Wf[tap][o, c] = wp[o, d*C + c] * g_w_d[c, j, ky, kx]
    wp2 = params["p_w"].reshape(2 * C, 4 * C)                 # [o, d*C + c]
    wf_rows = []
    for di, d in enumerate((1, 2, 3, 4)):
        wpd = wp2[:, di * C:(di + 1) * C]                     # (2C, C)
        gw = params[f"g{d}_w"]                                # (C, 2, 3, 3)
        for ky in range(3):
            for kx in range(3):
                for j in range(2):                            # 0 -> f_t0, 1 -> f_t1
                    wf_rows.append(wpd * gw[:, j, ky, kx][None, :])
    wf = jnp.stack(wf_rows)                                   # (72, 2C, C)

    # Fold grouped biases into the 1x1 bias: bf = p_b + wp2 @ [bg1;bg2;bg3;bg4]
    bg = jnp.concatenate([params[f"g{d}_b"] for d in (1, 2, 3, 4)])   # (4C,)
    bf = (params["p_b"] + wp2 @ bg).reshape(2 * C, 1)                 # (2C, 1)

    # --- VMEM budget (explicit; v5e scoped default is only 16 MiB) ----------
    est_bytes = 4 * (2 * (2 * C * F)              # double-buffered input blocks
                     + (2 * C) * H * W            # output block
                     + 72 * (2 * C) * C + 2 * C   # folded weights + bias
                     + (2 * C) * H * Wp)          # accumulator
    vmem_limit = int(min(max(4 * est_bytes, 32 * 2 ** 20), 64 * 2 ** 20))

    kernel = functools.partial(_pcf_kernel, C, H, W, Wp)
    f_t = pl.pallas_call(
        kernel,
        out_shape=jax.ShapeDtypeStruct((N, 2 * C, H, W), jnp.float32),
        grid=(N,),
        in_specs=[
            pl.BlockSpec((None, C, F), lambda n: (n, 0, 0)),
            pl.BlockSpec((None, C, F), lambda n: (n, 0, 0)),
            pl.BlockSpec((72, 2 * C, C), lambda n: (0, 0, 0)),   # resident weights
            pl.BlockSpec((2 * C, 1), lambda n: (0, 0)),          # resident bias
        ],
        out_specs=pl.BlockSpec((None, 2 * C, H, W), lambda n: (n, 0, 0, 0)),
        compiler_params=pltpu.CompilerParams(
            dimension_semantics=("parallel",),
            vmem_limit_bytes=vmem_limit),
    )(x0, x1, wf, bf)

    if three_head:
        # F.pad(f, (0, W - f.W, 0, H - f.H)) then channel-concat (layout glue).
        fp = jnp.pad(
            f, ((0, 0), (0, 0), (0, H - f.shape[2]), (0, W - f.shape[3])))
        return jnp.concatenate([f_t, fp], axis=1)
    return f_t


# -----------------------------------------------------------------------------
# Pure-JAX reference (mirrors the PyTorch forward) for verification
# -----------------------------------------------------------------------------
def pcf_reference(params, f_t0, f_t1, f, three_head=True):
    N, C, H, W = f_t0.shape
    x = jnp.concatenate([f_t0, f_t1], axis=1)
    idx = jnp.array([(i % 2) * C + i // 2 for i in range(2 * C)])
    f_s = x[:, idx]
    outs = []
    for d in (1, 2, 3, 4):
        w = params[f"g{d}_w"]
        b = params[f"g{d}_b"]
        o = jax.lax.conv_general_dilated(
            f_s, w, window_strides=(1, 1), padding=[(d, d), (d, d)],
            rhs_dilation=(d, d), feature_group_count=C,
            dimension_numbers=("NCHW", "OIHW", "NCHW"))
        outs.append(o + b[None, :, None, None])
    f_s_cat = jnp.concatenate(outs, axis=1)
    f_t = jax.lax.conv_general_dilated(
        f_s_cat, params["p_w"], (1, 1), [(0, 0), (0, 0)],
        dimension_numbers=("NCHW", "OIHW", "NCHW"))
    f_t = f_t + params["p_b"][None, :, None, None]
    if three_head:
        fp = jnp.pad(
            f, ((0, 0), (0, 0), (0, H - f.shape[2]), (0, W - f.shape[3])))
        return jnp.concatenate([f_t, fp], axis=1)
    return f_t


if __name__ == "__main__":
    key = jax.random.PRNGKey(0)
    k0, k1, k2, kp = jax.random.split(key, 4)

    N, C, H, W = 2, 4, 16, 16
    f_t0 = jax.random.normal(k0, (N, C, H, W), jnp.float32)
    f_t1 = jax.random.normal(k1, (N, C, H, W), jnp.float32)
    # extra "third head" feature map with smaller spatial size (gets zero-padded)
    f_extra = jax.random.normal(k2, (N, 3, 12, 10), jnp.float32)

    params = init_params(kp, C)

    out = pcf_forward(params, f_t0, f_t1, f_extra, three_head=True)
    out = jax.block_until_ready(out)

    ref = pcf_reference(params, f_t0, f_t1, f_extra, three_head=True)
    ref = jax.block_until_ready(ref)

    assert out.shape == (N, 2 * C + 3, H, W), out.shape
    max_err = float(jnp.max(jnp.abs(out - ref)))
    assert jnp.allclose(out, ref, atol=2e-4, rtol=2e-4), max_err

    print("KERNEL_OK")
</pallas_src>

<mosaic_0001>
module attributes {stable_mosaic.version = 11 : i64} {
  func.func @_pcf_kernel(%arg0: i32, %arg1: memref<1x4x600xf32, #tpu.memory_space<vmem>>, %arg2: memref<1x4x600xf32, #tpu.memory_space<vmem>>, %arg3: memref<72x8x4xf32, #tpu.memory_space<vmem>>, %arg4: memref<8x1xf32, #tpu.memory_space<vmem>>, %arg5: memref<1x8x16x16xf32, #tpu.memory_space<vmem>>) attributes {dimension_semantics = [#tpu.dimension_semantics<parallel>], iteration_bounds = array<i64: 2>, scalar_prefetch = 0 : i64, scratch_operands = 0 : i64, tpu.core_type = #tpu.core_type<tc>, window_params = [{transform_indices = @transform_0, window_bounds = array<i64: 1, 4, 600>}, {transform_indices = @transform_1, window_bounds = array<i64: 1, 4, 600>}, {pipeline_mode = #tpu.pipeline_mode<synchronous>, transform_indices = @transform_2, window_bounds = array<i64: 72, 8, 4>}, {pipeline_mode = #tpu.pipeline_mode<synchronous>, transform_indices = @transform_3, window_bounds = array<i64: 8, 1>}, {transform_indices = @transform_4, window_bounds = array<i64: 1, 8, 16, 16>}]} {
    %cst = arith.constant 0.000000e+00 : f32
    %0 = vector.broadcast %cst : f32 to vector<8x384xf32>
    %c0 = arith.constant 0 : index
    %c0_0 = arith.constant 0 : index
    %c75 = arith.constant 75 : index
    %1 = vector.load %arg1[%c0, %c0_0, %c75] : memref<1x4x600xf32, #tpu.memory_space<vmem>>, vector<1x4x384xf32>
    %2 = vector.shape_cast %1 : vector<1x4x384xf32> to vector<4x384xf32>
    %c0_1 = arith.constant 0 : index
    %c0_2 = arith.constant 0 : index
    %c75_3 = arith.constant 75 : index
    %3 = vector.load %arg2[%c0_1, %c0_2, %c75_3] : memref<1x4x600xf32, #tpu.memory_space<vmem>>, vector<1x4x384xf32>
    %4 = vector.shape_cast %3 : vector<1x4x384xf32> to vector<4x384xf32>
    %c0_4 = arith.constant 0 : index
    %c0_5 = arith.constant 0 : index
    %c0_6 = arith.constant 0 : index
    %5 = vector.load %arg3[%c0_4, %c0_5, %c0_6] : memref<72x8x4xf32, #tpu.memory_space<vmem>>, vector<1x8x4xf32>
    %6 = vector.shape_cast %5 : vector<1x8x4xf32> to vector<8x4xf32>
    %cst_7 = arith.constant dense<0.000000e+00> : vector<8x384xf32>
    %7 = tpu.matmul %6, %2, %cst_7 {dimension_numbers = #tpu.dot_dimension_numbers<[1], [0], [0], [1], [0, 0, 1, 1], [], []>} : vector<8x4xf32>, vector<4x384xf32>, vector<8x384xf32> -> vector<8x384xf32>
    %8 = arith.addf %0, %7 : vector<8x384xf32>
    %c1 = arith.constant 1 : index
    %c0_8 = arith.constant 0 : index
    %c0_9 = arith.constant 0 : index
    %9 = vector.load %arg3[%c1, %c0_8, %c0_9] : memref<72x8x4xf32, #tpu.memory_space<vmem>>, vector<1x8x4xf32>
    %10 = vector.shape_cast %9 : vector<1x8x4xf32> to vector<8x4xf32>
    %cst_10 = arith.constant dense<0.000000e+00> : vector<8x384xf32>
    %11 = tpu.matmul %10, %4, %cst_10 {dimension_numbers = #tpu.dot_dimension_numbers<[1], [0], [0], [1], [0, 0, 1, 1], [], []>} : vector<8x4xf32>, vector<4x384xf32>, vector<8x384xf32> -> vector<8x384xf32>
    %12 = arith.addf %8, %11 : vector<8x384xf32>
    %c0_11 = arith.constant 0 : index
    %c0_12 = arith.constant 0 : index
    %c76 = arith.constant 76 : index
    %13 = vector.load %arg1[%c0_11, %c0_12, %c76] : memref<1x4x600xf32, #tpu.memory_space<vmem>>, vector<1x4x384xf32>
    %14 = vector.shape_cast %13 : vector<1x4x384xf32> to vector<4x384xf32>
    %c0_13 = arith.constant 0 : index
    %c0_14 = arith.constant 0 : index
    %c76_15 = arith.constant 76 : index
    %15 = vector.load %arg2[%c0_13, %c0_14, %c76_15] : memref<1x4x600xf32, #tpu.memory_space<vmem>>, vector<1x4x384xf32>
    %16 = vector.shape_cast %15 : vector<1x4x384xf32> to vector<4x384xf32>
    %c2 = arith.constant 2 : index
    %c0_16 = arith.constant 0 : index
    %c0_17 = arith.constant 0 : index
    %17 = vector.load %arg3[%c2, %c0_16, %c0_17] : memref<72x8x4xf32, #tpu.memory_space<vmem>>, vector<1x8x4xf32>
    %18 = vector.shape_cast %17 : vector<1x8x4xf32> to vector<8x4xf32>
    %cst_18 = arith.constant dense<0.000000e+00> : vector<8x384xf32>
    %19 = tpu.matmul %18, %14, %cst_18 {dimension_numbers = #tpu.dot_dimension_numbers<[1], [0], [0], [1], [0, 0, 1, 1], [], []>} : vector<8x4xf32>, vector<4x384xf32>, vector<8x384xf32> -> vector<8x384xf32>
    %20 = arith.addf %12, %19 : vector<8x384xf32>
    %c3 = arith.constant 3 : index
    %c0_19 = arith.constant 0 : index
    %c0_20 = arith.constant 0 : index
    %21 = vector.load %arg3[%c3, %c0_19, %c0_20] : memref<72x8x4xf32, #tpu.memory_space<vmem>>, vector<1x8x4xf32>
    %22 = vector.shape_cast %21 : vector<1x8x4xf32> to vector<8x4xf32>
    %cst_21 = arith.constant dense<0.000000e+00> : vector<8x384xf32>
    %23 = tpu.matmul %22, %16, %cst_21 {dimension_numbers = #tpu.dot_dimension_numbers<[1], [0], [0], [1], [0, 0, 1, 1], [], []>} : vector<8x4xf32>, vector<4x384xf32>, vector<8x384xf32> -> vector<8x384xf32>
    %24 = arith.addf %20, %23 : vector<8x384xf32>
    %c0_22 = arith.constant 0 : index
    %c0_23 = arith.constant 0 : index
    %c77 = arith.constant 77 : index
    %25 = vector.load %arg1[%c0_22, %c0_23, %c77] : memref<1x4x600xf32, #tpu.memory_space<vmem>>, vector<1x4x384xf32>
    %26 = vector.shape_cast %25 : vector<1x4x384xf32> to vector<4x384xf32>
    %c0_24 = arith.constant 0 : index
    %c0_25 = arith.constant 0 : index
    %c77_26 = arith.constant 77 : index
    %27 = vector.load %arg2[%c0_24, %c0_25, %c77_26] : memref<1x4x600xf32, #tpu.memory_space<vmem>>, vector<1x4x384xf32>
    %28 = vector.shape_cast %27 : vector<1x4x384xf32> to vector<4x384xf32>
    %c4 = arith.constant 4 : index
    %c0_27 = arith.constant 0 : index
    %c0_28 = arith.constant 0 : index
    %29 = vector.load %arg3[%c4, %c0_27, %c0_28] : memref<72x8x4xf32, #tpu.memory_space<vmem>>, vector<1x8x4xf32>
    %30 = vector.shape_cast %29 : vector<1x8x4xf32> to vector<8x4xf32>
    %cst_29 = arith.constant dense<0.000000e+00> : vector<8x384xf32>
    %31 = tpu.matmul %30, %26, %cst_29 {dimension_numbers = #tpu.dot_dimension_numbers<[1], [0], [0], [1], [0, 0, 1, 1], [], []>} : vector<8x4xf32>, vector<4x384xf32>, vector<8x384xf32> -> vector<8x384xf32>
    %32 = arith.addf %24, %31 : vector<8x384xf32>
    %c5 = arith.constant 5 : index
    %c0_30 = arith.constant 0 : index
    %c0_31 = arith.constant 0 : index
    %33 = vector.load %arg3[%c5, %c0_30, %c0_31] : memref<72x8x4xf32, #tpu.memory_space<vmem>>, vector<1x8x4xf32>
    %34 = vector.shape_cast %33 : vector<1x8x4xf32> to vector<8x4xf32>
    %cst_32 = arith.constant dense<0.000000e+00> : vector<8x384xf32>
    %35 = tpu.matmul %34, %28, %cst_32 {dimension_numbers = #tpu.dot_dimension_numbers<[1], [0], [0], [1], [0, 0, 1, 1], [], []>} : vector<8x4xf32>, vector<4x384xf32>, vector<8x384xf32> -> vector<8x384xf32>
    %36 = arith.addf %32, %35 : vector<8x384xf32>
    %c0_33 = arith.constant 0 : index
    %c0_34 = arith.constant 0 : index
    %c99 = arith.constant 99 : index
    %37 = vector.load %arg1[%c0_33, %c0_34, %c99] : memref<1x4x600xf32, #tpu.memory_space<vmem>>, vector<1x4x384xf32>
    %38 = vector.shape_cast %37 : vector<1x4x384xf32> to vector<4x384xf32>
    %c0_35 = arith.constant 0 : index
    %c0_36 = arith.constant 0 : index
    %c99_37 = arith.constant 99 : index
    %39 = vector.load %arg2[%c0_35, %c0_36, %c99_37] : memref<1x4x600xf32, #tpu.memory_space<vmem>>, vector<1x4x384xf32>
    %40 = vector.shape_cast %39 : vector<1x4x384xf32> to vector<4x384xf32>
    %c6 = arith.constant 6 : index
    %c0_38 = arith.constant 0 : index
    %c0_39 = arith.constant 0 : index
    %41 = vector.load %arg3[%c6, %c0_38, %c0_39] : memref<72x8x4xf32, #tpu.memory_space<vmem>>, vector<1x8x4xf32>
    %42 = vector.shape_cast %41 : vector<1x8x4xf32> to vector<8x4xf32>
    %cst_40 = arith.constant dense<0.000000e+00> : vector<8x384xf32>
    %43 = tpu.matmul %42, %38, %cst_40 {dimension_numbers = #tpu.dot_dimension_numbers<[1], [0], [0], [1], [0, 0, 1, 1], [], []>} : vector<8x4xf32>, vector<4x384xf32>, vector<8x384xf32> -> vector<8x384xf32>
    %44 = arith.addf %36, %43 : vector<8x384xf32>
    %c7 = arith.constant 7 : index
    %c0_41 = arith.constant 0 : index
    %c0_42 = arith.constant 0 : index
    %45 = vector.load %arg3[%c7, %c0_41, %c0_42] : memref<72x8x4xf32, #tpu.memory_space<vmem>>, vector<1x8x4xf32>
    %46 = vector.shape_cast %45 : vector<1x8x4xf32> to vector<8x4xf32>
    %cst_43 = arith.constant dense<0.000000e+00> : vector<8x384xf32>
    %47 = tpu.matmul %46, %40, %cst_43 {dimension_numbers = #tpu.dot_dimension_numbers<[1], [0], [0], [1], [0, 0, 1, 1], [], []>} : vector<8x4xf32>, vector<4x384xf32>, vector<8x384xf32> -> vector<8x384xf32>
    %48 = arith.addf %44, %47 : vector<8x384xf32>
    %c0_44 = arith.constant 0 : index
    %c0_45 = arith.constant 0 : index
    %c100 = arith.constant 100 : index
    %49 = vector.load %arg1[%c0_44, %c0_45, %c100] : memref<1x4x600xf32, #tpu.memory_space<vmem>>, vector<1x4x384xf32>
    %50 = vector.shape_cast %49 : vector<1x4x384xf32> to vector<4x384xf32>
    %c0_46 = arith.constant 0 : index
    %c0_47 = arith.constant 0 : index
    %c100_48 = arith.constant 100 : index
    %51 = vector.load %arg2[%c0_46, %c0_47, %c100_48] : memref<1x4x600xf32, #tpu.memory_space<vmem>>, vector<1x4x384xf32>
    %52 = vector.shape_cast %51 : vector<1x4x384xf32> to vector<4x384xf32>
    %c8 = arith.constant 8 : index
    %c0_49 = arith.constant 0 : index
    %c0_50 = arith.constant 0 : index
    %53 = vector.load %arg3[%c8, %c0_49, %c0_50] : memref<72x8x4xf32, #tpu.memory_space<vmem>>, vector<1x8x4xf32>
    %54 = vector.shape_cast %53 : vector<1x8x4xf32> to vector<8x4xf32>
    %cst_51 = arith.constant dense<0.000000e+00> : vector<8x384xf32>
    %55 = tpu.matmul %54, %50, %cst_51 {dimension_numbers = #tpu.dot_dimension_numbers<[1], [0], [0], [1], [0, 0, 1, 1], [], []>} : vector<8x4xf32>, vector<4x384xf32>, vector<8x384xf32> -> vector<8x384xf32>
    %56 = arith.addf %48, %55 : vector<8x384xf32>
    %c9 = arith.constant 9 : index
    %c0_52 = arith.constant 0 : index
    %c0_53 = arith.constant 0 : index
    %57 = vector.load %arg3[%c9, %c0_52, %c0_53] : memref<72x8x4xf32, #tpu.memory_space<vmem>>, vector<1x8x4xf32>
    %58 = vector.shape_cast %57 : vector<1x8x4xf32> to vector<8x4xf32>
    %cst_54 = arith.constant dense<0.000000e+00> : vector<8x384xf32>
    %59 = tpu.matmul %58, %52, %cst_54 {dimension_numbers = #tpu.dot_dimension_numbers<[1], [0], [0], [1], [0, 0, 1, 1], [], []>} : vector<8x4xf32>, vector<4x384xf32>, vector<8x384xf32> -> vector<8x384xf32>
    %60 = arith.addf %56, %59 : vector<8x384xf32>
    %c0_55 = arith.constant 0 : index
    %c0_56 = arith.constant 0 : index
    %c101 = arith.constant 101 : index
    %61 = vector.load %arg1[%c0_55, %c0_56, %c101] : memref<1x4x600xf32, #tpu.memory_space<vmem>>, vector<1x4x384xf32>
    %62 = vector.shape_cast %61 : vector<1x4x384xf32> to vector<4x384xf32>
    %c0_57 = arith.constant 0 : index
    %c0_58 = arith.constant 0 : index
    %c101_59 = arith.constant 101 : index
    %63 = vector.load %arg2[%c0_57, %c0_58, %c101_59] : memref<1x4x600xf32, #tpu.memory_space<vmem>>, vector<1x4x384xf32>
    %64 = vector.shape_cast %63 : vector<1x4x384xf32> to vector<4x384xf32>
    %c10 = arith.constant 10 : index
    %c0_60 = arith.constant 0 : index
    %c0_61 = arith.constant 0 : index
    %65 = vector.load %arg3[%c10, %c0_60, %c0_61] : memref<72x8x4xf32, #tpu.memory_space<vmem>>, vector<1x8x4xf32>
    %66 = vector.shape_cast %65 : vector<1x8x4xf32> to vector<8x4xf32>
    %cst_62 = arith.constant dense<0.000000e+00> : vector<8x384xf32>
    %67 = tpu.matmul %66, %62, %cst_62 {dimension_numbers = #tpu.dot_dimension_numbers<[1], [0], [0], [1], [0, 0, 1, 1], [], []>} : vector<8x4xf32>, vector<4x384xf32>, vector<8x384xf32> -> vector<8x384xf32>
    %68 = arith.addf %60, %67 : vector<8x384xf32>
    %c11 = arith.constant 11 : index
    %c0_63 = arith.constant 0 : index
    %c0_64 = arith.constant 0 : index
    %69 = vector.load %arg3[%c11, %c0_63, %c0_64] : memref<72x8x4xf32, #tpu.memory_space<vmem>>, vector<1x8x4xf32>
    %70 = vector.shape_cast %69 : vector<1x8x4xf32> to vector<8x4xf32>
    %cst_65 = arith.constant dense<0.000000e+00> : vector<8x384xf32>
    %71 = tpu.matmul %70, %64, %cst_65 {dimension_numbers = #tpu.dot_dimension_numbers<[1], [0], [0], [1], [0, 0, 1, 1], [], []>} : vector<8x4xf32>, vector<4x384xf32>, vector<8x384xf32> -> vector<8x384xf32>
    %72 = arith.addf %68, %71 : vector<8x384xf32>
    %c0_66 = arith.constant 0 : index
    %c0_67 = arith.constant 0 : index
    %c123 = arith.constant 123 : index
    %73 = vector.load %arg1[%c0_66, %c0_67, %c123] : memref<1x4x600xf32, #tpu.memory_space<vmem>>, vector<1x4x384xf32>
    %74 = vector.shape_cast %73 : vector<1x4x384xf32> to vector<4x384xf32>
    %c0_68 = arith.constant 0 : index
    %c0_69 = arith.constant 0 : index
    %c123_70 = arith.constant 123 : index
    %75 = vector.load %arg2[%c0_68, %c0_69, %c123_70] : memref<1x4x600xf32, #tpu.memory_space<vmem>>, vector<1x4x384xf32>
    %76 = vector.shape_cast %75 : vector<1x4x384xf32> to vector<4x384xf32>
    %c12 = arith.constant 12 : index
    %c0_71 = arith.constant 0 : index
    %c0_72 = arith.constant 0 : index
    %77 = vector.load %arg3[%c12, %c0_71, %c0_72] : memref<72x8x4xf32, #tpu.memory_space<vmem>>, vector<1x8x4xf32>
    %78 = vector.shape_cast %77 : vector<1x8x4xf32> to vector<8x4xf32>
    %cst_73 = arith.constant dense<0.000000e+00> : vector<8x384xf32>
    %79 = tpu.matmul %78, %74, %cst_73 {dimension_numbers = #tpu.dot_dimension_numbers<[1], [0], [0], [1], [0, 0, 1, 1], [], []>} : vector<8x4xf32>, vector<4x384xf32>, vector<8x384xf32> -> vector<8x384xf32>
    %80 = arith.addf %72, %79 : vector<8x384xf32>
    %c13 = arith.constant 13 : index
    %c0_74 = arith.constant 0 : index
    %c0_75 = arith.constant 0 : index
    %81 = vector.load %arg3[%c13, %c0_74, %c0_75] : memref<72x8x4xf32, #tpu.memory_space<vmem>>, vector<1x8x4xf32>
    %82 = vector.shape_cast %81 : vector<1x8x4xf32> to vector<8x4xf32>
    %cst_76 = arith.constant dense<0.000000e+00> : vector<8x384xf32>
    %83 = tpu.matmul %82, %76, %cst_76 {dimension_numbers = #tpu.dot_dimension_numbers<[1], [0], [0], [1], [0, 0, 1, 1], [], []>} : vector<8x4xf32>, vector<4x384xf32>, vector<8x384xf32> -> vector<8x384xf32>
    %84 = arith.addf %80, %83 : vector<8x384xf32>
    %c0_77 = arith.constant 0 : index
    %c0_78 = arith.constant 0 : index
    %c124 = arith.constant 124 : index
    %85 = vector.load %arg1[%c0_77, %c0_78, %c124] : memref<1x4x600xf32, #tpu.memory_space<vmem>>, vector<1x4x384xf32>
    %86 = vector.shape_cast %85 : vector<1x4x384xf32> to vector<4x384xf32>
    %c0_79 = arith.constant 0 : index
    %c0_80 = arith.constant 0 : index
    %c124_81 = arith.constant 124 : index
    %87 = vector.load %arg2[%c0_79, %c0_80, %c124_81] : memref<1x4x600xf32, #tpu.memory_space<vmem>>, vector<1x4x384xf32>
    %88 = vector.shape_cast %87 : vector<1x4x384xf32> to vector<4x384xf32>
    %c14 = arith.constant 14 : index
    %c0_82 = arith.constant 0 : index
    %c0_83 = arith.constant 0 : index
    %89 = vector.load %arg3[%c14, %c0_82, %c0_83] : memref<72x8x4xf32, #tpu.memory_space<vmem>>, vector<1x8x4xf32>
    %90 = vector.shape_cast %89 : vector<1x8x4xf32> to vector<8x4xf32>
    %cst_84 = arith.constant dense<0.000000e+00> : vector<8x384xf32>
    %91 = tpu.matmul %90, %86, %cst_84 {dimension_numbers = #tpu.dot_dimension_numbers<[1], [0], [0], [1], [0, 0, 1, 1], [], []>} : vector<8x4xf32>, vector<4x384xf32>, vector<8x384xf32> -> vector<8x384xf32>
    %92 = arith.addf %84, %91 : vector<8x384xf32>
    %c15 = arith.constant 15 : index
    %c0_85 = arith.constant 0 : index
    %c0_86 = arith.constant 0 : index
    %93 = vector.load %arg3[%c15, %c0_85, %c0_86] : memref<72x8x4xf32, #tpu.memory_space<vmem>>, vector<1x8x4xf32>
    %94 = vector.shape_cast %93 : vector<1x8x4xf32> to vector<8x4xf32>
    %cst_87 = arith.constant dense<0.000000e+00> : vector<8x384xf32>
    %95 = tpu.matmul %94, %88, %cst_87 {dimension_numbers = #tpu.dot_dimension_numbers<[1], [0], [0], [1], [0, 0, 1, 1], [], []>} : vector<8x4xf32>, vector<4x384xf32>, vector<8x384xf32> -> vector<8x384xf32>
    %96 = arith.addf %92, %95 : vector<8x384xf32>
    %c0_88 = arith.constant 0 : index
    %c0_89 = arith.constant 0 : index
    %c125 = arith.constant 125 : index
    %97 = vector.load %arg1[%c0_88, %c0_89, %c125] : memref<1x4x600xf32, #tpu.memory_space<vmem>>, vector<1x4x384xf32>
    %98 = vector.shape_cast %97 : vector<1x4x384xf32> to vector<4x384xf32>
    %c0_90 = arith.constant 0 : index
    %c0_91 = arith.constant 0 : index
    %c125_92 = arith.constant 125 : index
    %99 = vector.load %arg2[%c0_90, %c0_91, %c125_92] : memref<1x4x600xf32, #tpu.memory_space<vmem>>, vector<1x4x384xf32>
    %100 = vector.shape_cast %99 : vector<1x4x384xf32> to vector<4x384xf32>
    %c16 = arith.constant 16 : index
    %c0_93 = arith.constant 0 : index
    %c0_94 = arith.constant 0 : index
    %101 = vector.load %arg3[%c16, %c0_93, %c0_94] : memref<72x8x4xf32, #tpu.memory_space<vmem>>, vector<1x8x4xf32>
    %102 = vector.shape_cast %101 : vector<1x8x4xf32> to vector<8x4xf32>
    %cst_95 = arith.constant dense<0.000000e+00> : vector<8x384xf32>
    %103 = tpu.matmul %102, %98, %cst_95 {dimension_numbers = #tpu.dot_dimension_numbers<[1], [0], [0], [1], [0, 0, 1, 1], [], []>} : vector<8x4xf32>, vector<4x384xf32>, vector<8x384xf32> -> vector<8x384xf32>
    %104 = arith.addf %96, %103 : vector<8x384xf32>
    %c17 = arith.constant 17 : index
    %c0_96 = arith.constant 0 : index
    %c0_97 = arith.constant 0 : index
    %105 = vector.load %arg3[%c17, %c0_96, %c0_97] : memref<72x8x4xf32, #tpu.memory_space<vmem>>, vector<1x8x4xf32>
    %106 = vector.shape_cast %105 : vector<1x8x4xf32> to vector<8x4xf32>
    %cst_98 = arith.constant dense<0.000000e+00> : vector<8x384xf32>
    %107 = tpu.matmul %106, %100, %cst_98 {dimension_numbers = #tpu.dot_dimension_numbers<[1], [0], [0], [1], [0, 0, 1, 1], [], []>} : vector<8x4xf32>, vector<4x384xf32>, vector<8x384xf32> -> vector<8x384xf32>
    %108 = arith.addf %104, %107 : vector<8x384xf32>
    %c0_99 = arith.constant 0 : index
    %c0_100 = arith.constant 0 : index
    %c50 = arith.constant 50 : index
    %109 = vector.load %arg1[%c0_99, %c0_100, %c50] : memref<1x4x600xf32, #tpu.memory_space<vmem>>, vector<1x4x384xf32>
    %110 = vector.shape_cast %109 : vector<1x4x384xf32> to vector<4x384xf32>
    %c0_101 = arith.constant 0 : index
    %c0_102 = arith.constant 0 : index
    %c50_103 = arith.constant 50 : index
    %111 = vector.load %arg2[%c0_101, %c0_102, %c50_103] : memref<1x4x600xf32, #tpu.memory_space<vmem>>, vector<1x4x384xf32>
    %112 = vector.shape_cast %111 : vector<1x4x384xf32> to vector<4x384xf32>
    %c18 = arith.constant 18 : index
    %c0_104 = arith.constant 0 : index
    %c0_105 = arith.constant 0 : index
    %113 = vector.load %arg3[%c18, %c0_104, %c0_105] : memref<72x8x4xf32, #tpu.memory_space<vmem>>, vector<1x8x4xf32>
    %114 = vector.shape_cast %113 : vector<1x8x4xf32> to vector<8x4xf32>
    %cst_106 = arith.constant dense<0.000000e+00> : vector<8x384xf32>
    %115 = tpu.matmul %114, %110, %cst_106 {dimension_numbers = #tpu.dot_dimension_numbers<[1], [0], [0], [1], [0, 0, 1, 1], [], []>} : vector<8x4xf32>, vector<4x384xf32>, vector<8x384xf32> -> vector<8x384xf32>
    %116 = arith.addf %108, %115 : vector<8x384xf32>
    %c19 = arith.constant 19 : index
    %c0_107 = arith.constant 0 : index
    %c0_108 = arith.constant 0 : index
    %117 = vector.load %arg3[%c19, %c0_107, %c0_108] : memref<72x8x4xf32, #tpu.memory_space<vmem>>, vector<1x8x4xf32>
    %118 = vector.shape_cast %117 : vector<1x8x4xf32> to vector<8x4xf32>
    %cst_109 = arith.constant dense<0.000000e+00> : vector<8x384xf32>
    %119 = tpu.matmul %118, %112, %cst_109 {dimension_numbers = #tpu.dot_dimension_numbers<[1], [0], [0], [1], [0, 0, 1, 1], [], []>} : vector<8x4xf32>, vector<4x384xf32>, vector<8x384xf32> -> vector<8x384xf32>
    %120 = arith.addf %116, %119 : vector<8x384xf32>
    %c0_110 = arith.constant 0 : index
    %c0_111 = arith.constant 0 : index
    %c52 = arith.constant 52 : index
    %121 = vector.load %arg1[%c0_110, %c0_111, %c52] : memref<1x4x600xf32, #tpu.memory_space<vmem>>, vector<1x4x384xf32>
    %122 = vector.shape_cast %121 : vector<1x4x384xf32> to vector<4x384xf32>
    %c0_112 = arith.constant 0 : index
    %c0_113 = arith.constant 0 : index
    %c52_114 = arith.constant 52 : index
    %123 = vector.load %arg2[%c0_112, %c0_113, %c52_114] : memref<1x4x600xf32, #tpu.memory_space<vmem>>, vector<1x4x384xf32>
    %124 = vector.shape_cast %123 : vector<1x4x384xf32> to vector<4x384xf32>
    %c20 = arith.constant 20 : index
    %c0_115 = arith.constant 0 : index
    %c0_116 = arith.constant 0 : index
    %125 = vector.load %arg3[%c20, %c0_115, %c0_116] : memref<72x8x4xf32, #tpu.memory_space<vmem>>, vector<1x8x4xf32>
    %126 = vector.shape_cast %125 : vector<1x8x4xf32> to vector<8x4xf32>
    %cst_117 = arith.constant dense<0.000000e+00> : vector<8x384xf32>
    %127 = tpu.matmul %126, %122, %cst_117 {dimension_numbers = #tpu.dot_dimension_numbers<[1], [0], [0], [1], [0, 0, 1, 1], [], []>} : vector<8x4xf32>, vector<4x384xf32>, vector<8x384xf32> -> vector<8x384xf32>
    %128 = arith.addf %120, %127 : vector<8x384xf32>
    %c21 = arith.constant 21 : index
    %c0_118 = arith.constant 0 : index
    %c0_119 = arith.constant 0 : index
    %129 = vector.load %arg3[%c21, %c0_118, %c0_119] : memref<72x8x4xf32, #tpu.memory_space<vmem>>, vector<1x8x4xf32>
    %130 = vector.shape_cast %129 : vector<1x8x4xf32> to vector<8x4xf32>
    %cst_120 = arith.constant dense<0.000000e+00> : vector<8x384xf32>
    %131 = tpu.matmul %130, %124, %cst_120 {dimension_numbers = #tpu.dot_dimension_numbers<[1], [0], [0], [1], [0, 0, 1, 1], [], []>} : vector<8x4xf32>, vector<4x384xf32>, vector<8x384xf32> -> vector<8x384xf32>
    %132 = arith.addf %128, %131 : vector<8x384xf32>
    %c0_121 = arith.constant 0 : index
    %c0_122 = arith.constant 0 : index
    %c54 = arith.constant 54 : index
    %133 = vector.load %arg1[%c0_121, %c0_122, %c54] : memref<1x4x600xf32, #tpu.memory_space<vmem>>, vector<1x4x384xf32>
    %134 = vector.shape_cast %133 : vector<1x4x384xf32> to vector<4x384xf32>
    %c0_123 = arith.constant 0 : index
    %c0_124 = arith.constant 0 : index
    %c54_125 = arith.constant 54 : index
    %135 = vector.load %arg2[%c0_123, %c0_124, %c54_125] : memref<1x4x600xf32, #tpu.memory_space<vmem>>, vector<1x4x384xf32>
    %136 = vector.shape_cast %135 : vector<1x4x384xf32> to vector<4x384xf32>
    %c22 = arith.constant 22 : index
    %c0_126 = arith.constant 0 : index
    %c0_127 = arith.constant 0 : index
    %137 = vector.load %arg3[%c22, %c0_126, %c0_127] : memref<72x8x4xf32, #tpu.memory_space<vmem>>, vector<1x8x4xf32>
    %138 = vector.shape_cast %137 : vector<1x8x4xf32> to vector<8x4xf32>
    %cst_128 = arith.constant dense<0.000000e+00> : vector<8x384xf32>
    %139 = tpu.matmul %138, %134, %cst_128 {dimension_numbers = #tpu.dot_dimension_numbers<[1], [0], [0], [1], [0, 0, 1, 1], [], []>} : vector<8x4xf32>, vector<4x384xf32>, vector<8x384xf32> -> vector<8x384xf32>
    %140 = arith.addf %132, %139 : vector<8x384xf32>
    %c23 = arith.constant 23 : index
    %c0_129 = arith.constant 0 : index
    %c0_130 = arith.constant 0 : index
    %141 = vector.load %arg3[%c23, %c0_129, %c0_130] : memref<72x8x4xf32, #tpu.memory_space<vmem>>, vector<1x8x4xf32>
    %142 = vector.shape_cast %141 : vector<1x8x4xf32> to vector<8x4xf32>
    %cst_131 = arith.constant dense<0.000000e+00> : vector<8x384xf32>
    %143 = tpu.matmul %142, %136, %cst_131 {dimension_numbers = #tpu.dot_dimension_numbers<[1], [0], [0], [1], [0, 0, 1, 1], [], []>} : vector<8x4xf32>, vector<4x384xf32>, vector<8x384xf32> -> vector<8x384xf32>
    %144 = arith.addf %140, %143 : vector<8x384xf32>
    %c0_132 = arith.constant 0 : index
    %c0_133 = arith.constant 0 : index
    %c98 = arith.constant 98 : index
    %145 = vector.load %arg1[%c0_132, %c0_133, %c98] : memref<1x4x600xf32, #tpu.memory_space<vmem>>, vector<1x4x384xf32>
    %146 = vector.shape_cast %145 : vector<1x4x384xf32> to vector<4x384xf32>
    %c0_134 = arith.constant 0 : index
    %c0_135 = arith.constant 0 : index
    %c98_136 = arith.constant 98 : index
    %147 = vector.load %arg2[%c0_134, %c0_135, %c98_136] : memref<1x4x600xf32, #tpu.memory_space<vmem>>, vector<1x4x384xf32>
    %148 = vector.shape_cast %147 : vector<1x4x384xf32> to vector<4x384xf32>
    %c24 = arith.constant 24 : index
    %c0_137 = arith.constant 0 : index
    %c0_138 = arith.constant 0 : index
    %149 = vector.load %arg3[%c24, %c0_137, %c0_138] : memref<72x8x4xf32, #tpu.memory_space<vmem>>, vector<1x8x4xf32>
    %150 = vector.shape_cast %149 : vector<1x8x4xf32> to vector<8x4xf32>
    %cst_139 = arith.constant dense<0.000000e+00> : vector<8x384xf32>
    %151 = tpu.matmul %150, %146, %cst_139 {dimension_numbers = #tpu.dot_dimension_numbers<[1], [0], [0], [1], [0, 0, 1, 1], [], []>} : vector<8x4xf32>, vector<4x384xf32>, vector<8x384xf32> -> vector<8x384xf32>
    %152 = arith.addf %144, %151 : vector<8x384xf32>
    %c25 = arith.constant 25 : index
    %c0_140 = arith.constant 0 : index
    %c0_141 = arith.constant 0 : index
    %153 = vector.load %arg3[%c25, %c0_140, %c0_141] : memref<72x8x4xf32, #tpu.memory_space<vmem>>, vector<1x8x4xf32>
    %154 = vector.shape_cast %153 : vector<1x8x4xf32> to vector<8x4xf32>
    %cst_142 = arith.constant dense<0.000000e+00> : vector<8x384xf32>
    %155 = tpu.matmul %154, %148, %cst_142 {dimension_numbers = #tpu.dot_dimension_numbers<[1], [0], [0], [1], [0, 0, 1, 1], [], []>} : vector<8x4xf32>, vector<4x384xf32>, vector<8x384xf32> -> vector<8x384xf32>
    %156 = arith.addf %152, %155 : vector<8x384xf32>
    %c0_143 = arith.constant 0 : index
    %c0_144 = arith.constant 0 : index
    %c100_145 = arith.constant 100 : index
    %157 = vector.load %arg1[%c0_143, %c0_144, %c100_145] : memref<1x4x600xf32, #tpu.memory_space<vmem>>, vector<1x4x384xf32>
    %158 = vector.shape_cast %157 : vector<1x4x384xf32> to vector<4x384xf32>
    %c0_146 = arith.constant 0 : index
    %c0_147 = arith.constant 0 : index
    %c100_148 = arith.constant 100 : index
    %159 = vector.load %arg2[%c0_146, %c0_147, %c100_148] : memref<1x4x600xf32, #tpu.memory_space<vmem>>, vector<1x4x384xf32>
    %160 = vector.shape_cast %159 : vector<1x4x384xf32> to vector<4x384xf32>
    %c26 = arith.constant 26 : index
    %c0_149 = arith.constant 0 : index
    %c0_150 = arith.constant 0 : index
    %161 = vector.load %arg3[%c26, %c0_149, %c0_150] : memref<72x8x4xf32, #tpu.memory_space<vmem>>, vector<1x8x4xf32>
    %162 = vector.shape_cast %161 : vector<1x8x4xf32> to vector<8x4xf32>
    %cst_151 = arith.constant dense<0.000000e+00> : vector<8x384xf32>
    %163 = tpu.matmul %162, %158, %cst_151 {dimension_numbers = #tpu.dot_dimension_numbers<[1], [0], [0], [1], [0, 0, 1, 1], [], []>} : vector<8x4xf32>, vector<4x384xf32>, vector<8x384xf32> -> vector<8x384xf32>
    %164 = arith.addf %156, %163 : vector<8x384xf32>
    %c27 = arith.constant 27 : index
    %c0_152 = arith.constant 0 : index
    %c0_153 = arith.constant 0 : index
    %165 = vector.load %arg3[%c27, %c0_152, %c0_153] : memref<72x8x4xf32, #tpu.memory_space<vmem>>, vector<1x8x4xf32>
    %166 = vector.shape_cast %165 : vector<1x8x4xf32> to vector<8x4xf32>
    %cst_154 = arith.constant dense<0.000000e+00> : vector<8x384xf32>
    %167 = tpu.matmul %166, %160, %cst_154 {dimension_numbers = #tpu.dot_dimension_numbers<[1], [0], [0], [1], [0, 0, 1, 1], [], []>} : vector<8x4xf32>, vector<4x384xf32>, vector<8x384xf32> -> vector<8x384xf32>
    %168 = arith.addf %164, %167 : vector<8x384xf32>
    %c0_155 = arith.constant 0 : index
    %c0_156 = arith.constant 0 : index
    %c102 = arith.constant 102 : index
    %169 = vector.load %arg1[%c0_155, %c0_156, %c102] : memref<1x4x600xf32, #tpu.memory_space<vmem>>, vector<1x4x384xf32>
    %170 = vector.shape_cast %169 : vector<1x4x384xf32> to vector<4x384xf32>
    %c0_157 = arith.constant 0 : index
    %c0_158 = arith.constant 0 : index
    %c102_159 = arith.constant 102 : index
    %171 = vector.load %arg2[%c0_157, %c0_158, %c102_159] : memref<1x4x600xf32, #tpu.memory_space<vmem>>, vector<1x4x384xf32>
    %172 = vector.shape_cast %171 : vector<1x4x384xf32> to vector<4x384xf32>
    %c28 = arith.constant 28 : index
    %c0_160 = arith.constant 0 : index
    %c0_161 = arith.constant 0 : index
    %173 = vector.load %arg3[%c28, %c0_160, %c0_161] : memref<72x8x4xf32, #tpu.memory_space<vmem>>, vector<1x8x4xf32>
    %174 = vector.shape_cast %173 : vector<1x8x4xf32> to vector<8x4xf32>
    %cst_162 = arith.constant dense<0.000000e+00> : vector<8x384xf32>
    %175 = tpu.matmul %174, %170, %cst_162 {dimension_numbers = #tpu.dot_dimension_numbers<[1], [0], [0], [1], [0, 0, 1, 1], [], []>} : vector<8x4xf32>, vector<4x384xf32>, vector<8x384xf32> -> vector<8x384xf32>
    %176 = arith.addf %168, %175 : vector<8x384xf32>
    %c29 = arith.constant 29 : index
    %c0_163 = arith.constant 0 : index
    %c0_164 = arith.constant 0 : index
    %177 = vector.load %arg3[%c29, %c0_163, %c0_164] : memref<72x8x4xf32, #tpu.memory_space<vmem>>, vector<1x8x4xf32>
    %178 = vector.shape_cast %177 : vector<1x8x4xf32> to vector<8x4xf32>
    %cst_165 = arith.constant dense<0.000000e+00> : vector<8x384xf32>
    %179 = tpu.matmul %178, %172, %cst_165 {dimension_numbers = #tpu.dot_dimension_numbers<[1], [0], [0], [1], [0, 0, 1, 1], [], []>} : vector<8x4xf32>, vector<4x384xf32>, vector<8x384xf32> -> vector<8x384xf32>
    %180 = arith.addf %176, %179 : vector<8x384xf32>
    %c0_166 = arith.constant 0 : index
    %c0_167 = arith.constant 0 : index
    %c146 = arith.constant 146 : index
    %181 = vector.load %arg1[%c0_166, %c0_167, %c146] : memref<1x4x600xf32, #tpu.memory_space<vmem>>, vector<1x4x384xf32>
    %182 = vector.shape_cast %181 : vector<1x4x384xf32> to vector<4x384xf32>
    %c0_168 = arith.constant 0 : index
    %c0_169 = arith.constant 0 : index
    %c146_170 = arith.constant 146 : index
    %183 = vector.load %arg2[%c0_168, %c0_169, %c146_170] : memref<1x4x600xf32, #tpu.memory_space<vmem>>, vector<1x4x384xf32>
    %184 = vector.shape_cast %183 : vector<1x4x384xf32> to vector<4x384xf32>
    %c30 = arith.constant 30 : index
    %c0_171 = arith.constant 0 : index
    %c0_172 = arith.constant 0 : index
    %185 = vector.load %arg3[%c30, %c0_171, %c0_172] : memref<72x8x4xf32, #tpu.memory_space<vmem>>, vector<1x8x4xf32>
    %186 = vector.shape_cast %185 : vector<1x8x4xf32> to vector<8x4xf32>
    %cst_173 = arith.constant dense<0.000000e+00> : vector<8x384xf32>
    %187 = tpu.matmul %186, %182, %cst_173 {dimension_numbers = #tpu.dot_dimension_numbers<[1], [0], [0], [1], [0, 0, 1, 1], [], []>} : vector<8x4xf32>, vector<4x384xf32>, vector<8x384xf32> -> vector<8x384xf32>
    %188 = arith.addf %180, %187 : vector<8x384xf32>
    %c31 = arith.constant 31 : index
    %c0_174 = arith.constant 0 : index
    %c0_175 = arith.constant 0 : index
    %189 = vector.load %arg3[%c31, %c0_174, %c0_175] : memref<72x8x4xf32, #tpu.memory_space<vmem>>, vector<1x8x4xf32>
    %190 = vector.shape_cast %189 : vector<1x8x4xf32> to vector<8x4xf32>
    %cst_176 = arith.constant dense<0.000000e+00> : vector<8x384xf32>
    %191 = tpu.matmul %190, %184, %cst_176 {dimension_numbers = #tpu.dot_dimension_numbers<[1], [0], [0], [1], [0, 0, 1, 1], [], []>} : vector<8x4xf32>, vector<4x384xf32>, vector<8x384xf32> -> vector<8x384xf32>
    %192 = arith.addf %188, %191 : vector<8x384xf32>
    %c0_177 = arith.constant 0 : index
    %c0_178 = arith.constant 0 : index
    %c148 = arith.constant 148 : index
    %193 = vector.load %arg1[%c0_177, %c0_178, %c148] : memref<1x4x600xf32, #tpu.memory_space<vmem>>, vector<1x4x384xf32>
    %194 = vector.shape_cast %193 : vector<1x4x384xf32> to vector<4x384xf32>
    %c0_179 = arith.constant 0 : index
    %c0_180 = arith.constant 0 : index
    %c148_181 = arith.constant 148 : index
    %195 = vector.load %arg2[%c0_179, %c0_180, %c148_181] : memref<1x4x600xf32, #tpu.memory_space<vmem>>, vector<1x4x384xf32>
    %196 = vector.shape_cast %195 : vector<1x4x384xf32> to vector<4x384xf32>
    %c32 = arith.constant 32 : index
    %c0_182 = arith.constant 0 : index
    %c0_183 = arith.constant 0 : index
    %197 = vector.load %arg3[%c32, %c0_182, %c0_183] : memref<72x8x4xf32, #tpu.memory_space<vmem>>, vector<1x8x4xf32>
    %198 = vector.shape_cast %197 : vector<1x8x4xf32> to vector<8x4xf32>
    %cst_184 = arith.constant dense<0.000000e+00> : vector<8x384xf32>
    %199 = tpu.matmul %198, %194, %cst_184 {dimension_numbers = #tpu.dot_dimension_numbers<[1], [0], [0], [1], [0, 0, 1, 1], [], []>} : vector<8x4xf32>, vector<4x384xf32>, vector<8x384xf32> -> vector<8x384xf32>
    %200 = arith.addf %192, %199 : vector<8x384xf32>
    %c33 = arith.constant 33 : index
    %c0_185 = arith.constant 0 : index
    %c0_186 = arith.constant 0 : index
    %201 = vector.load %arg3[%c33, %c0_185, %c0_186] : memref<72x8x4xf32, #tpu.memory_space<vmem>>, vector<1x8x4xf32>
    %202 = vector.shape_cast %201 : vector<1x8x4xf32> to vector<8x4xf32>
    %cst_187 = arith.constant dense<0.000000e+00> : vector<8x384xf32>
    %203 = tpu.matmul %202, %196, %cst_187 {dimension_numbers = #tpu.dot_dimension_numbers<[1], [0], [0], [1], [0, 0, 1, 1], [], []>} : vector<8x4xf32>, vector<4x384xf32>, vector<8x384xf32> -> vector<8x384xf32>
    %204 = arith.addf %200, %203 : vector<8x384xf32>
    %c0_188 = arith.constant 0 : index
    %c0_189 = arith.constant 0 : index
    %c150 = arith.constant 150 : index
    %205 = vector.load %arg1[%c0_188, %c0_189, %c150] : memref<1x4x600xf32, #tpu.memory_space<vmem>>, vector<1x4x384xf32>
    %206 = vector.shape_cast %205 : vector<1x4x384xf32> to vector<4x384xf32>
    %c0_190 = arith.constant 0 : index
    %c0_191 = arith.constant 0 : index
    %c150_192 = arith.constant 150 : index
    %207 = vector.load %arg2[%c0_190, %c0_191, %c150_192] : memref<1x4x600xf32, #tpu.memory_space<vmem>>, vector<1x4x384xf32>
    %208 = vector.shape_cast %207 : vector<1x4x384xf32> to vector<4x384xf32>
    %c34 = arith.constant 34 : index
    %c0_193 = arith.constant 0 : index
    %c0_194 = arith.constant 0 : index
    %209 = vector.load %arg3[%c34, %c0_193, %c0_194] : memref<72x8x4xf32, #tpu.memory_space<vmem>>, vector<1x8x4xf32>
    %210 = vector.shape_cast %209 : vector<1x8x4xf32> to vector<8x4xf32>
    %cst_195 = arith.constant dense<0.000000e+00> : vector<8x384xf32>
    %211 = tpu.matmul %210, %206, %cst_195 {dimension_numbers = #tpu.dot_dimension_numbers<[1], [0], [0], [1], [0, 0, 1, 1], [], []>} : vector<8x4xf32>, vector<4x384xf32>, vector<8x384xf32> -> vector<8x384xf32>
    %212 = arith.addf %204, %211 : vector<8x384xf32>
    %c35 = arith.constant 35 : index
    %c0_196 = arith.constant 0 : index
    %c0_197 = arith.constant 0 : index
    %213 = vector.load %arg3[%c35, %c0_196, %c0_197] : memref<72x8x4xf32, #tpu.memory_space<vmem>>, vector<1x8x4xf32>
    %214 = vector.shape_cast %213 : vector<1x8x4xf32> to vector<8x4xf32>
    %cst_198 = arith.constant dense<0.000000e+00> : vector<8x384xf32>
    %215 = tpu.matmul %214, %208, %cst_198 {dimension_numbers = #tpu.dot_dimension_numbers<[1], [0], [0], [1], [0, 0, 1, 1], [], []>} : vector<8x4xf32>, vector<4x384xf32>, vector<8x384xf32> -> vector<8x384xf32>
    %216 = arith.addf %212, %215 : vector<8x384xf32>
    %c0_199 = arith.constant 0 : index
    %c0_200 = arith.constant 0 : index
    %c25_201 = arith.constant 25 : index
    %217 = vector.load %arg1[%c0_199, %c0_200, %c25_201] : memref<1x4x600xf32, #tpu.memory_space<vmem>>, vector<1x4x384xf32>
    %218 = vector.shape_cast %217 : vector<1x4x384xf32> to vector<4x384xf32>
    %c0_202 = arith.constant 0 : index
    %c0_203 = arith.constant 0 : index
    %c25_204 = arith.constant 25 : index
    %219 = vector.load %arg2[%c0_202, %c0_203, %c25_204] : memref<1x4x600xf32, #tpu.memory_space<vmem>>, vector<1x4x384xf32>
    %220 = vector.shape_cast %219 : vector<1x4x384xf32> to vector<4x384xf32>
    %c36 = arith.constant 36 : index
    %c0_205 = arith.constant 0 : index
    %c0_206 = arith.constant 0 : index
    %221 = vector.load %arg3[%c36, %c0_205, %c0_206] : memref<72x8x4xf32, #tpu.memory_space<vmem>>, vector<1x8x4xf32>
    %222 = vector.shape_cast %221 : vector<1x8x4xf32> to vector<8x4xf32>
    %cst_207 = arith.constant dense<0.000000e+00> : vector<8x384xf32>
    %223 = tpu.matmul %222, %218, %cst_207 {dimension_numbers = #tpu.dot_dimension_numbers<[1], [0], [0], [1], [0, 0, 1, 1], [], []>} : vector<8x4xf32>, vector<4x384xf32>, vector<8x384xf32> -> vector<8x384xf32>
    %224 = arith.addf %216, %223 : vector<8x384xf32>
    %c37 = arith.constant 37 : index
    %c0_208 = arith.constant 0 : index
    %c0_209 = arith.constant 0 : index
    %225 = vector.load %arg3[%c37, %c0_208, %c0_209] : memref<72x8x4xf32, #tpu.memory_space<vmem>>, vector<1x8x4xf32>
    %226 = vector.shape_cast %225 : vector<1x8x4xf32> to vector<8x4xf32>
    %cst_210 = arith.constant dense<0.000000e+00> : vector<8x384xf32>
    %227 = tpu.matmul %226, %220, %cst_210 {dimension_numbers = #tpu.dot_dimension_numbers<[1], [0], [0], [1], [0, 0, 1, 1], [], []>} : vector<8x4xf32>, vector<4x384xf32>, vector<8x384xf32> -> vector<8x384xf32>
    %228 = arith.addf %224, %227 : vector<8x384xf32>
    %c0_211 = arith.constant 0 : index
    %c0_212 = arith.constant 0 : index
    %c28_213 = arith.constant 28 : index
    %229 = vector.load %arg1[%c0_211, %c0_212, %c28_213] : memref<1x4x600xf32, #tpu.memory_space<vmem>>, vector<1x4x384xf32>
    %230 = vector.shape_cast %229 : vector<1x4x384xf32> to vector<4x384xf32>
    %c0_214 = arith.constant 0 : index
    %c0_215 = arith.constant 0 : index
    %c28_216 = arith.constant 28 : index
    %231 = vector.load %arg2[%c0_214, %c0_215, %c28_216] : memref<1x4x600xf32, #tpu.memory_space<vmem>>, vector<1x4x384xf32>
    %232 = vector.shape_cast %231 : vector<1x4x384xf32> to vector<4x384xf32>
    %c38 = arith.constant 38 : index
    %c0_217 = arith.constant 0 : index
    %c0_218 = arith.constant 0 : index
    %233 = vector.load %arg3[%c38, %c0_217, %c0_218] : memref<72x8x4xf32, #tpu.memory_space<vmem>>, vector<1x8x4xf32>
    %234 = vector.shape_cast %233 : vector<1x8x4xf32> to vector<8x4xf32>
    %cst_219 = arith.constant dense<0.000000e+00> : vector<8x384xf32>
    %235 = tpu.matmul %234, %230, %cst_219 {dimension_numbers = #tpu.dot_dimension_numbers<[1], [0], [0], [1], [0, 0, 1, 1], [], []>} : vector<8x4xf32>, vector<4x384xf32>, vector<8x384xf32> -> vector<8x384xf32>
    %236 = arith.addf %228, %235 : vector<8x384xf32>
    %c39 = arith.constant 39 : index
    %c0_220 = arith.constant 0 : index
    %c0_221 = arith.constant 0 : index
    %237 = vector.load %arg3[%c39, %c0_220, %c0_221] : memref<72x8x4xf32, #tpu.memory_space<vmem>>, vector<1x8x4xf32>
    %238 = vector.shape_cast %237 : vector<1x8x4xf32> to vector<8x4xf32>
    %cst_222 = arith.constant dense<0.000000e+00> : vector<8x384xf32>
    %239 = tpu.matmul %238, %232, %cst_222 {dimension_numbers = #tpu.dot_dimension_numbers<[1], [0], [0], [1], [0, 0, 1, 1], [], []>} : vector<8x4xf32>, vector<4x384xf32>, vector<8x384xf32> -> vector<8x384xf32>
    %240 = arith.addf %236, %239 : vector<8x384xf32>
    %c0_223 = arith.constant 0 : index
    %c0_224 = arith.constant 0 : index
    %c31_225 = arith.constant 31 : index
    %241 = vector.load %arg1[%c0_223, %c0_224, %c31_225] : memref<1x4x600xf32, #tpu.memory_space<vmem>>, vector<1x4x384xf32>
    %242 = vector.shape_cast %241 : vector<1x4x384xf32> to vector<4x384xf32>
    %c0_226 = arith.constant 0 : index
    %c0_227 = arith.constant 0 : index
    %c31_228 = arith.constant 31 : index
    %243 = vector.load %arg2[%c0_226, %c0_227, %c31_228] : memref<1x4x600xf32, #tpu.memory_space<vmem>>, vector<1x4x384xf32>
    %244 = vector.shape_cast %243 : vector<1x4x384xf32> to vector<4x384xf32>
    %c40 = arith.constant 40 : index
    %c0_229 = arith.constant 0 : index
    %c0_230 = arith.constant 0 : index
    %245 = vector.load %arg3[%c40, %c0_229, %c0_230] : memref<72x8x4xf32, #tpu.memory_space<vmem>>, vector<1x8x4xf32>
    %246 = vector.shape_cast %245 : vector<1x8x4xf32> to vector<8x4xf32>
    %cst_231 = arith.constant dense<0.000000e+00> : vector<8x384xf32>
    %247 = tpu.matmul %246, %242, %cst_231 {dimension_numbers = #tpu.dot_dimension_numbers<[1], [0], [0], [1], [0, 0, 1, 1], [], []>} : vector<8x4xf32>, vector<4x384xf32>, vector<8x384xf32> -> vector<8x384xf32>
    %248 = arith.addf %240, %247 : vector<8x384xf32>
    %c41 = arith.constant 41 : index
    %c0_232 = arith.constant 0 : index
    %c0_233 = arith.constant 0 : index
    %249 = vector.load %arg3[%c41, %c0_232, %c0_233] : memref<72x8x4xf32, #tpu.memory_space<vmem>>, vector<1x8x4xf32>
    %250 = vector.shape_cast %249 : vector<1x8x4xf32> to vector<8x4xf32>
    %cst_234 = arith.constant dense<0.000000e+00> : vector<8x384xf32>
    %251 = tpu.matmul %250, %244, %cst_234 {dimension_numbers = #tpu.dot_dimension_numbers<[1], [0], [0], [1], [0, 0, 1, 1], [], []>} : vector<8x4xf32>, vector<4x384xf32>, vector<8x384xf32> -> vector<8x384xf32>
    %252 = arith.addf %248, %251 : vector<8x384xf32>
    %c0_235 = arith.constant 0 : index
    %c0_236 = arith.constant 0 : index
    %c97 = arith.constant 97 : index
    %253 = vector.load %arg1[%c0_235, %c0_236, %c97] : memref<1x4x600xf32, #tpu.memory_space<vmem>>, vector<1x4x384xf32>
    %254 = vector.shape_cast %253 : vector<1x4x384xf32> to vector<4x384xf32>
    %c0_237 = arith.constant 0 : index
    %c0_238 = arith.constant 0 : index
    %c97_239 = arith.constant 97 : index
    %255 = vector.load %arg2[%c0_237, %c0_238, %c97_239] : memref<1x4x600xf32, #tpu.memory_space<vmem>>, vector<1x4x384xf32>
    %256 = vector.shape_cast %255 : vector<1x4x384xf32> to vector<4x384xf32>
    %c42 = arith.constant 42 : index
    %c0_240 = arith.constant 0 : index
    %c0_241 = arith.constant 0 : index
    %257 = vector.load %arg3[%c42, %c0_240, %c0_241] : memref<72x8x4xf32, #tpu.memory_space<vmem>>, vector<1x8x4xf32>
    %258 = vector.shape_cast %257 : vector<1x8x4xf32> to vector<8x4xf32>
    %cst_242 = arith.constant dense<0.000000e+00> : vector<8x384xf32>
    %259 = tpu.matmul %258, %254, %cst_242 {dimension_numbers = #tpu.dot_dimension_numbers<[1], [0], [0], [1], [0, 0, 1, 1], [], []>} : vector<8x4xf32>, vector<4x384xf32>, vector<8x384xf32> -> vector<8x384xf32>
    %260 = arith.addf %252, %259 : vector<8x384xf32>
    %c43 = arith.constant 43 : index
    %c0_243 = arith.constant 0 : index
    %c0_244 = arith.constant 0 : index
    %261 = vector.load %arg3[%c43, %c0_243, %c0_244] : memref<72x8x4xf32, #tpu.memory_space<vmem>>, vector<1x8x4xf32>
    %262 = vector.shape_cast %261 : vector<1x8x4xf32> to vector<8x4xf32>
    %cst_245 = arith.constant dense<0.000000e+00> : vector<8x384xf32>
    %263 = tpu.matmul %262, %256, %cst_245 {dimension_numbers = #tpu.dot_dimension_numbers<[1], [0], [0], [1], [0, 0, 1, 1], [], []>} : vector<8x4xf32>, vector<4x384xf32>, vector<8x384xf32> -> vector<8x384xf32>
    %264 = arith.addf %260, %263 : vector<8x384xf32>
    %c0_246 = arith.constant 0 : index
    %c0_247 = arith.constant 0 : index
    %c100_248 = arith.constant 100 : index
    %265 = vector.load %arg1[%c0_246, %c0_247, %c100_248] : memref<1x4x600xf32, #tpu.memory_space<vmem>>, vector<1x4x384xf32>
    %266 = vector.shape_cast %265 : vector<1x4x384xf32> to vector<4x384xf32>
    %c0_249 = arith.constant 0 : index
    %c0_250 = arith.constant 0 : index
    %c100_251 = arith.constant 100 : index
    %267 = vector.load %arg2[%c0_249, %c0_250, %c100_251] : memref<1x4x600xf32, #tpu.memory_space<vmem>>, vector<1x4x384xf32>
    %268 = vector.shape_cast %267 : vector<1x4x384xf32> to vector<4x384xf32>
    %c44 = arith.constant 44 : index
    %c0_252 = arith.constant 0 : index
    %c0_253 = arith.constant 0 : index
    %269 = vector.load %arg3[%c44, %c0_252, %c0_253] : memref<72x8x4xf32, #tpu.memory_space<vmem>>, vector<1x8x4xf32>
    %270 = vector.shape_cast %269 : vector<1x8x4xf32> to vector<8x4xf32>
    %cst_254 = arith.constant dense<0.000000e+00> : vector<8x384xf32>
    %271 = tpu.matmul %270, %266, %cst_254 {dimension_numbers = #tpu.dot_dimension_numbers<[1], [0], [0], [1], [0, 0, 1, 1], [], []>} : vector<8x4xf32>, vector<4x384xf32>, vector<8x384xf32> -> vector<8x384xf32>
    %272 = arith.addf %264, %271 : vector<8x384xf32>
    %c45 = arith.constant 45 : index
    %c0_255 = arith.constant 0 : index
    %c0_256 = arith.constant 0 : index
    %273 = vector.load %arg3[%c45, %c0_255, %c0_256] : memref<72x8x4xf32, #tpu.memory_space<vmem>>, vector<1x8x4xf32>
    %274 = vector.shape_cast %273 : vector<1x8x4xf32> to vector<8x4xf32>
    %cst_257 = arith.constant dense<0.000000e+00> : vector<8x384xf32>
    %275 = tpu.matmul %274, %268, %cst_257 {dimension_numbers = #tpu.dot_dimension_numbers<[1], [0], [0], [1], [0, 0, 1, 1], [], []>} : vector<8x4xf32>, vector<4x384xf32>, vector<8x384xf32> -> vector<8x384xf32>
    %276 = arith.addf %272, %275 : vector<8x384xf32>
    %c0_258 = arith.constant 0 : index
    %c0_259 = arith.constant 0 : index
    %c103 = arith.constant 103 : index
    %277 = vector.load %arg1[%c0_258, %c0_259, %c103] : memref<1x4x600xf32, #tpu.memory_space<vmem>>, vector<1x4x384xf32>
    %278 = vector.shape_cast %277 : vector<1x4x384xf32> to vector<4x384xf32>
    %c0_260 = arith.constant 0 : index
    %c0_261 = arith.constant 0 : index
    %c103_262 = arith.constant 103 : index
    %279 = vector.load %arg2[%c0_260, %c0_261, %c103_262] : memref<1x4x600xf32, #tpu.memory_space<vmem>>, vector<1x4x384xf32>
    %280 = vector.shape_cast %279 : vector<1x4x384xf32> to vector<4x384xf32>
    %c46 = arith.constant 46 : index
    %c0_263 = arith.constant 0 : index
    %c0_264 = arith.constant 0 : index
    %281 = vector.load %arg3[%c46, %c0_263, %c0_264] : memref<72x8x4xf32, #tpu.memory_space<vmem>>, vector<1x8x4xf32>
    %282 = vector.shape_cast %281 : vector<1x8x4xf32> to vector<8x4xf32>
    %cst_265 = arith.constant dense<0.000000e+00> : vector<8x384xf32>
    %283 = tpu.matmul %282, %278, %cst_265 {dimension_numbers = #tpu.dot_dimension_numbers<[1], [0], [0], [1], [0, 0, 1, 1], [], []>} : vector<8x4xf32>, vector<4x384xf32>, vector<8x384xf32> -> vector<8x384xf32>
    %284 = arith.addf %276, %283 : vector<8x384xf32>
    %c47 = arith.constant 47 : index
    %c0_266 = arith.constant 0 : index
    %c0_267 = arith.constant 0 : index
    %285 = vector.load %arg3[%c47, %c0_266, %c0_267] : memref<72x8x4xf32, #tpu.memory_space<vmem>>, vector<1x8x4xf32>
    %286 = vector.shape_cast %285 : vector<1x8x4xf32> to vector<8x4xf32>
    %cst_268 = arith.constant dense<0.000000e+00> : vector<8x384xf32>
    %287 = tpu.matmul %286, %280, %cst_268 {dimension_numbers = #tpu.dot_dimension_numbers<[1], [0], [0], [1], [0, 0, 1, 1], [], []>} : vector<8x4xf32>, vector<4x384xf32>, vector<8x384xf32> -> vector<8x384xf32>
    %288 = arith.addf %284, %287 : vector<8x384xf32>
    %c0_269 = arith.constant 0 : index
    %c0_270 = arith.constant 0 : index
    %c169 = arith.constant 169 : index
    %289 = vector.load %arg1[%c0_269, %c0_270, %c169] : memref<1x4x600xf32, #tpu.memory_space<vmem>>, vector<1x4x384xf32>
    %290 = vector.shape_cast %289 : vector<1x4x384xf32> to vector<4x384xf32>
    %c0_271 = arith.constant 0 : index
    %c0_272 = arith.constant 0 : index
    %c169_273 = arith.constant 169 : index
    %291 = vector.load %arg2[%c0_271, %c0_272, %c169_273] : memref<1x4x600xf32, #tpu.memory_space<vmem>>, vector<1x4x384xf32>
    %292 = vector.shape_cast %291 : vector<1x4x384xf32> to vector<4x384xf32>
    %c48 = arith.constant 48 : index
    %c0_274 = arith.constant 0 : index
    %c0_275 = arith.constant 0 : index
    %293 = vector.load %arg3[%c48, %c0_274, %c0_275] : memref<72x8x4xf32, #tpu.memory_space<vmem>>, vector<1x8x4xf32>
    %294 = vector.shape_cast %293 : vector<1x8x4xf32> to vector<8x4xf32>
    %cst_276 = arith.constant dense<0.000000e+00> : vector<8x384xf32>
    %295 = tpu.matmul %294, %290, %cst_276 {dimension_numbers = #tpu.dot_dimension_numbers<[1], [0], [0], [1], [0, 0, 1, 1], [], []>} : vector<8x4xf32>, vector<4x384xf32>, vector<8x384xf32> -> vector<8x384xf32>
    %296 = arith.addf %288, %295 : vector<8x384xf32>
    %c49 = arith.constant 49 : index
    %c0_277 = arith.constant 0 : index
    %c0_278 = arith.constant 0 : index
    %297 = vector.load %arg3[%c49, %c0_277, %c0_278] : memref<72x8x4xf32, #tpu.memory_space<vmem>>, vector<1x8x4xf32>
    %298 = vector.shape_cast %297 : vector<1x8x4xf32> to vector<8x4xf32>
    %cst_279 = arith.constant dense<0.000000e+00> : vector<8x384xf32>
    %299 = tpu.matmul %298, %292, %cst_279 {dimension_numbers = #tpu.dot_dimension_numbers<[1], [0], [0], [1], [0, 0, 1, 1], [], []>} : vector<8x4xf32>, vector<4x384xf32>, vector<8x384xf32> -> vector<8x384xf32>
    %300 = arith.addf %296, %299 : vector<8x384xf32>
    %c0_280 = arith.constant 0 : index
    %c0_281 = arith.constant 0 : index
    %c172 = arith.constant 172 : index
    %301 = vector.load %arg1[%c0_280, %c0_281, %c172] : memref<1x4x600xf32, #tpu.memory_space<vmem>>, vector<1x4x384xf32>
    %302 = vector.shape_cast %301 : vector<1x4x384xf32> to vector<4x384xf32>
    %c0_282 = arith.constant 0 : index
    %c0_283 = arith.constant 0 : index
    %c172_284 = arith.constant 172 : index
    %303 = vector.load %arg2[%c0_282, %c0_283, %c172_284] : memref<1x4x600xf32, #tpu.memory_space<vmem>>, vector<1x4x384xf32>
    %304 = vector.shape_cast %303 : vector<1x4x384xf32> to vector<4x384xf32>
    %c50_285 = arith.constant 50 : index
    %c0_286 = arith.constant 0 : index
    %c0_287 = arith.constant 0 : index
    %305 = vector.load %arg3[%c50_285, %c0_286, %c0_287] : memref<72x8x4xf32, #tpu.memory_space<vmem>>, vector<1x8x4xf32>
    %306 = vector.shape_cast %305 : vector<1x8x4xf32> to vector<8x4xf32>
    %cst_288 = arith.constant dense<0.000000e+00> : vector<8x384xf32>
    %307 = tpu.matmul %306, %302, %cst_288 {dimension_numbers = #tpu.dot_dimension_numbers<[1], [0], [0], [1], [0, 0, 1, 1], [], []>} : vector<8x4xf32>, vector<4x384xf32>, vector<8x384xf32> -> vector<8x384xf32>
    %308 = arith.addf %300, %307 : vector<8x384xf32>
    %c51 = arith.constant 51 : index
    %c0_289 = arith.constant 0 : index
    %c0_290 = arith.constant 0 : index
    %309 = vector.load %arg3[%c51, %c0_289, %c0_290] : memref<72x8x4xf32, #tpu.memory_space<vmem>>, vector<1x8x4xf32>
    %310 = vector.shape_cast %309 : vector<1x8x4xf32> to vector<8x4xf32>
    %cst_291 = arith.constant dense<0.000000e+00> : vector<8x384xf32>
    %311 = tpu.matmul %310, %304, %cst_291 {dimension_numbers = #tpu.dot_dimension_numbers<[1], [0], [0], [1], [0, 0, 1, 1], [], []>} : vector<8x4xf32>, vector<4x384xf32>, vector<8x384xf32> -> vector<8x384xf32>
    %312 = arith.addf %308, %311 : vector<8x384xf32>
    %c0_292 = arith.constant 0 : index
    %c0_293 = arith.constant 0 : index
    %c175 = arith.constant 175 : index
    %313 = vector.load %arg1[%c0_292, %c0_293, %c175] : memref<1x4x600xf32, #tpu.memory_space<vmem>>, vector<1x4x384xf32>
    %314 = vector.shape_cast %313 : vector<1x4x384xf32> to vector<4x384xf32>
    %c0_294 = arith.constant 0 : index
    %c0_295 = arith.constant 0 : index
    %c175_296 = arith.constant 175 : index
    %315 = vector.load %arg2[%c0_294, %c0_295, %c175_296] : memref<1x4x600xf32, #tpu.memory_space<vmem>>, vector<1x4x384xf32>
    %316 = vector.shape_cast %315 : vector<1x4x384xf32> to vector<4x384xf32>
    %c52_297 = arith.constant 52 : index
    %c0_298 = arith.constant 0 : index
    %c0_299 = arith.constant 0 : index
    %317 = vector.load %arg3[%c52_297, %c0_298, %c0_299] : memref<72x8x4xf32, #tpu.memory_space<vmem>>, vector<1x8x4xf32>
    %318 = vector.shape_cast %317 : vector<1x8x4xf32> to vector<8x4xf32>
    %cst_300 = arith.constant dense<0.000000e+00> : vector<8x384xf32>
    %319 = tpu.matmul %318, %314, %cst_300 {dimension_numbers = #tpu.dot_dimension_numbers<[1], [0], [0], [1], [0, 0, 1, 1], [], []>} : vector<8x4xf32>, vector<4x384xf32>, vector<8x384xf32> -> vector<8x384xf32>
    %320 = arith.addf %312, %319 : vector<8x384xf32>
    %c53 = arith.constant 53 : index
    %c0_301 = arith.constant 0 : index
    %c0_302 = arith.constant 0 : index
    %321 = vector.load %arg3[%c53, %c0_301, %c0_302] : memref<72x8x4xf32, #tpu.memory_space<vmem>>, vector<1x8x4xf32>
    %322 = vector.shape_cast %321 : vector<1x8x4xf32> to vector<8x4xf32>
    %cst_303 = arith.constant dense<0.000000e+00> : vector<8x384xf32>
    %323 = tpu.matmul %322, %316, %cst_303 {dimension_numbers = #tpu.dot_dimension_numbers<[1], [0], [0], [1], [0, 0, 1, 1], [], []>} : vector<8x4xf32>, vector<4x384xf32>, vector<8x384xf32> -> vector<8x384xf32>
    %324 = arith.addf %320, %323 : vector<8x384xf32>
    %c0_304 = arith.constant 0 : index
    %c0_305 = arith.constant 0 : index
    %c0_306 = arith.constant 0 : index
    %325 = vector.load %arg1[%c0_304, %c0_305, %c0_306] : memref<1x4x600xf32, #tpu.memory_space<vmem>>, vector<1x4x384xf32>
    %326 = vector.shape_cast %325 : vector<1x4x384xf32> to vector<4x384xf32>
    %c0_307 = arith.constant 0 : index
    %c0_308 = arith.constant 0 : index
    %c0_309 = arith.constant 0 : index
    %327 = vector.load %arg2[%c0_307, %c0_308, %c0_309] : memref<1x4x600xf32, #tpu.memory_space<vmem>>, vector<1x4x384xf32>
    %328 = vector.shape_cast %327 : vector<1x4x384xf32> to vector<4x384xf32>
    %c54_310 = arith.constant 54 : index
    %c0_311 = arith.constant 0 : index
    %c0_312 = arith.constant 0 : index
    %329 = vector.load %arg3[%c54_310, %c0_311, %c0_312] : memref<72x8x4xf32, #tpu.memory_space<vmem>>, vector<1x8x4xf32>
    %330 = vector.shape_cast %329 : vector<1x8x4xf32> to vector<8x4xf32>
    %cst_313 = arith.constant dense<0.000000e+00> : vector<8x384xf32>
    %331 = tpu.matmul %330, %326, %cst_313 {dimension_numbers = #tpu.dot_dimension_numbers<[1], [0], [0], [1], [0, 0, 1, 1], [], []>} : vector<8x4xf32>, vector<4x384xf32>, vector<8x384xf32> -> vector<8x384xf32>
    %332 = arith.addf %324, %331 : vector<8x384xf32>
    %c55 = arith.constant 55 : index
    %c0_314 = arith.constant 0 : index
    %c0_315 = arith.constant 0 : index
    %333 = vector.load %arg3[%c55, %c0_314, %c0_315] : memref<72x8x4xf32, #tpu.memory_space<vmem>>, vector<1x8x4xf32>
    %334 = vector.shape_cast %333 : vector<1x8x4xf32> to vector<8x4xf32>
    %cst_316 = arith.constant dense<0.000000e+00> : vector<8x384xf32>
    %335 = tpu.matmul %334, %328, %cst_316 {dimension_numbers = #tpu.dot_dimension_numbers<[1], [0], [0], [1], [0, 0, 1, 1], [], []>} : vector<8x4xf32>, vector<4x384xf32>, vector<8x384xf32> -> vector<8x384xf32>
    %336 = arith.addf %332, %335 : vector<8x384xf32>
    %c0_317 = arith.constant 0 : index
    %c0_318 = arith.constant 0 : index
    %c4_319 = arith.constant 4 : index
    %337 = vector.load %arg1[%c0_317, %c0_318, %c4_319] : memref<1x4x600xf32, #tpu.memory_space<vmem>>, vector<1x4x384xf32>
    %338 = vector.shape_cast %337 : vector<1x4x384xf32> to vector<4x384xf32>
    %c0_320 = arith.constant 0 : index
    %c0_321 = arith.constant 0 : index
    %c4_322 = arith.constant 4 : index
    %339 = vector.load %arg2[%c0_320, %c0_321, %c4_322] : memref<1x4x600xf32, #tpu.memory_space<vmem>>, vector<1x4x384xf32>
    %340 = vector.shape_cast %339 : vector<1x4x384xf32> to vector<4x384xf32>
    %c56 = arith.constant 56 : index
    %c0_323 = arith.constant 0 : index
    %c0_324 = arith.constant 0 : index
    %341 = vector.load %arg3[%c56, %c0_323, %c0_324] : memref<72x8x4xf32, #tpu.memory_space<vmem>>, vector<1x8x4xf32>
    %342 = vector.shape_cast %341 : vector<1x8x4xf32> to vector<8x4xf32>
    %cst_325 = arith.constant dense<0.000000e+00> : vector<8x384xf32>
    %343 = tpu.matmul %342, %338, %cst_325 {dimension_numbers = #tpu.dot_dimension_numbers<[1], [0], [0], [1], [0, 0, 1, 1], [], []>} : vector<8x4xf32>, vector<4x384xf32>, vector<8x384xf32> -> vector<8x384xf32>
    %344 = arith.addf %336, %343 : vector<8x384xf32>
    %c57 = arith.constant 57 : index
    %c0_326 = arith.constant 0 : index
    %c0_327 = arith.constant 0 : index
    %345 = vector.load %arg3[%c57, %c0_326, %c0_327] : memref<72x8x4xf32, #tpu.memory_space<vmem>>, vector<1x8x4xf32>
    %346 = vector.shape_cast %345 : vector<1x8x4xf32> to vector<8x4xf32>
    %cst_328 = arith.constant dense<0.000000e+00> : vector<8x384xf32>
    %347 = tpu.matmul %346, %340, %cst_328 {dimension_numbers = #tpu.dot_dimension_numbers<[1], [0], [0], [1], [0, 0, 1, 1], [], []>} : vector<8x4xf32>, vector<4x384xf32>, vector<8x384xf32> -> vector<8x384xf32>
    %348 = arith.addf %344, %347 : vector<8x384xf32>
    %c0_329 = arith.constant 0 : index
    %c0_330 = arith.constant 0 : index
    %c8_331 = arith.constant 8 : index
    %349 = vector.load %arg1[%c0_329, %c0_330, %c8_331] : memref<1x4x600xf32, #tpu.memory_space<vmem>>, vector<1x4x384xf32>
    %350 = vector.shape_cast %349 : vector<1x4x384xf32> to vector<4x384xf32>
    %c0_332 = arith.constant 0 : index
    %c0_333 = arith.constant 0 : index
    %c8_334 = arith.constant 8 : index
    %351 = vector.load %arg2[%c0_332, %c0_333, %c8_334] : memref<1x4x600xf32, #tpu.memory_space<vmem>>, vector<1x4x384xf32>
    %352 = vector.shape_cast %351 : vector<1x4x384xf32> to vector<4x384xf32>
    %c58 = arith.constant 58 : index
    %c0_335 = arith.constant 0 : index
    %c0_336 = arith.constant 0 : index
    %353 = vector.load %arg3[%c58, %c0_335, %c0_336] : memref<72x8x4xf32, #tpu.memory_space<vmem>>, vector<1x8x4xf32>
    %354 = vector.shape_cast %353 : vector<1x8x4xf32> to vector<8x4xf32>
    %cst_337 = arith.constant dense<0.000000e+00> : vector<8x384xf32>
    %355 = tpu.matmul %354, %350, %cst_337 {dimension_numbers = #tpu.dot_dimension_numbers<[1], [0], [0], [1], [0, 0, 1, 1], [], []>} : vector<8x4xf32>, vector<4x384xf32>, vector<8x384xf32> -> vector<8x384xf32>
    %356 = arith.addf %348, %355 : vector<8x384xf32>
    %c59 = arith.constant 59 : index
    %c0_338 = arith.constant 0 : index
    %c0_339 = arith.constant 0 : index
    %357 = vector.load %arg3[%c59, %c0_338, %c0_339] : memref<72x8x4xf32, #tpu.memory_space<vmem>>, vector<1x8x4xf32>
    %358 = vector.shape_cast %357 : vector<1x8x4xf32> to vector<8x4xf32>
    %cst_340 = arith.constant dense<0.000000e+00> : vector<8x384xf32>
    %359 = tpu.matmul %358, %352, %cst_340 {dimension_numbers = #tpu.dot_dimension_numbers<[1], [0], [0], [1], [0, 0, 1, 1], [], []>} : vector<8x4xf32>, vector<4x384xf32>, vector<8x384xf32> -> vector<8x384xf32>
    %360 = arith.addf %356, %359 : vector<8x384xf32>
    %c0_341 = arith.constant 0 : index
    %c0_342 = arith.constant 0 : index
    %c96 = arith.constant 96 : index
    %361 = vector.load %arg1[%c0_341, %c0_342, %c96] : memref<1x4x600xf32, #tpu.memory_space<vmem>>, vector<1x4x384xf32>
    %362 = vector.shape_cast %361 : vector<1x4x384xf32> to vector<4x384xf32>
    %c0_343 = arith.constant 0 : index
    %c0_344 = arith.constant 0 : index
    %c96_345 = arith.constant 96 : index
    %363 = vector.load %arg2[%c0_343, %c0_344, %c96_345] : memref<1x4x600xf32, #tpu.memory_space<vmem>>, vector<1x4x384xf32>
    %364 = vector.shape_cast %363 : vector<1x4x384xf32> to vector<4x384xf32>
    %c60 = arith.constant 60 : index
    %c0_346 = arith.constant 0 : index
    %c0_347 = arith.constant 0 : index
    %365 = vector.load %arg3[%c60, %c0_346, %c0_347] : memref<72x8x4xf32, #tpu.memory_space<vmem>>, vector<1x8x4xf32>
    %366 = vector.shape_cast %365 : vector<1x8x4xf32> to vector<8x4xf32>
    %cst_348 = arith.constant dense<0.000000e+00> : vector<8x384xf32>
    %367 = tpu.matmul %366, %362, %cst_348 {dimension_numbers = #tpu.dot_dimension_numbers<[1], [0], [0], [1], [0, 0, 1, 1], [], []>} : vector<8x4xf32>, vector<4x384xf32>, vector<8x384xf32> -> vector<8x384xf32>
    %368 = arith.addf %360, %367 : vector<8x384xf32>
    %c61 = arith.constant 61 : index
    %c0_349 = arith.constant 0 : index
    %c0_350 = arith.constant 0 : index
    %369 = vector.load %arg3[%c61, %c0_349, %c0_350] : memref<72x8x4xf32, #tpu.memory_space<vmem>>, vector<1x8x4xf32>
    %370 = vector.shape_cast %369 : vector<1x8x4xf32> to vector<8x4xf32>
    %cst_351 = arith.constant dense<0.000000e+00> : vector<8x384xf32>
    %371 = tpu.matmul %370, %364, %cst_351 {dimension_numbers = #tpu.dot_dimension_numbers<[1], [0], [0], [1], [0, 0, 1, 1], [], []>} : vector<8x4xf32>, vector<4x384xf32>, vector<8x384xf32> -> vector<8x384xf32>
    %372 = arith.addf %368, %371 : vector<8x384xf32>
    %c0_352 = arith.constant 0 : index
    %c0_353 = arith.constant 0 : index
    %c100_354 = arith.constant 100 : index
    %373 = vector.load %arg1[%c0_352, %c0_353, %c100_354] : memref<1x4x600xf32, #tpu.memory_space<vmem>>, vector<1x4x384xf32>
    %374 = vector.shape_cast %373 : vector<1x4x384xf32> to vector<4x384xf32>
    %c0_355 = arith.constant 0 : index
    %c0_356 = arith.constant 0 : index
    %c100_357 = arith.constant 100 : index
    %375 = vector.load %arg2[%c0_355, %c0_356, %c100_357] : memref<1x4x600xf32, #tpu.memory_space<vmem>>, vector<1x4x384xf32>
    %376 = vector.shape_cast %375 : vector<1x4x384xf32> to vector<4x384xf32>
    %c62 = arith.constant 62 : index
    %c0_358 = arith.constant 0 : index
    %c0_359 = arith.constant 0 : index
    %377 = vector.load %arg3[%c62, %c0_358, %c0_359] : memref<72x8x4xf32, #tpu.memory_space<vmem>>, vector<1x8x4xf32>
    %378 = vector.shape_cast %377 : vector<1x8x4xf32> to vector<8x4xf32>
    %cst_360 = arith.constant dense<0.000000e+00> : vector<8x384xf32>
    %379 = tpu.matmul %378, %374, %cst_360 {dimension_numbers = #tpu.dot_dimension_numbers<[1], [0], [0], [1], [0, 0, 1, 1], [], []>} : vector<8x4xf32>, vector<4x384xf32>, vector<8x384xf32> -> vector<8x384xf32>
    %380 = arith.addf %372, %379 : vector<8x384xf32>
    %c63 = arith.constant 63 : index
    %c0_361 = arith.constant 0 : index
    %c0_362 = arith.constant 0 : index
    %381 = vector.load %arg3[%c63, %c0_361, %c0_362] : memref<72x8x4xf32, #tpu.memory_space<vmem>>, vector<1x8x4xf32>
    %382 = vector.shape_cast %381 : vector<1x8x4xf32> to vector<8x4xf32>
    %cst_363 = arith.constant dense<0.000000e+00> : vector<8x384xf32>
    %383 = tpu.matmul %382, %376, %cst_363 {dimension_numbers = #tpu.dot_dimension_numbers<[1], [0], [0], [1], [0, 0, 1, 1], [], []>} : vector<8x4xf32>, vector<4x384xf32>, vector<8x384xf32> -> vector<8x384xf32>
    %384 = arith.addf %380, %383 : vector<8x384xf32>
    %c0_364 = arith.constant 0 : index
    %c0_365 = arith.constant 0 : index
    %c104 = arith.constant 104 : index
    %385 = vector.load %arg1[%c0_364, %c0_365, %c104] : memref<1x4x600xf32, #tpu.memory_space<vmem>>, vector<1x4x384xf32>
    %386 = vector.shape_cast %385 : vector<1x4x384xf32> to vector<4x384xf32>
    %c0_366 = arith.constant 0 : index
    %c0_367 = arith.constant 0 : index
    %c104_368 = arith.constant 104 : index
    %387 = vector.load %arg2[%c0_366, %c0_367, %c104_368] : memref<1x4x600xf32, #tpu.memory_space<vmem>>, vector<1x4x384xf32>
    %388 = vector.shape_cast %387 : vector<1x4x384xf32> to vector<4x384xf32>
    %c64 = arith.constant 64 : index
    %c0_369 = arith.constant 0 : index
    %c0_370 = arith.constant 0 : index
    %389 = vector.load %arg3[%c64, %c0_369, %c0_370] : memref<72x8x4xf32, #tpu.memory_space<vmem>>, vector<1x8x4xf32>
    %390 = vector.shape_cast %389 : vector<1x8x4xf32> to vector<8x4xf32>
    %cst_371 = arith.constant dense<0.000000e+00> : vector<8x384xf32>
    %391 = tpu.matmul %390, %386, %cst_371 {dimension_numbers = #tpu.dot_dimension_numbers<[1], [0], [0], [1], [0, 0, 1, 1], [], []>} : vector<8x4xf32>, vector<4x384xf32>, vector<8x384xf32> -> vector<8x384xf32>
    %392 = arith.addf %384, %391 : vector<8x384xf32>
    %c65 = arith.constant 65 : index
    %c0_372 = arith.constant 0 : index
    %c0_373 = arith.constant 0 : index
    %393 = vector.load %arg3[%c65, %c0_372, %c0_373] : memref<72x8x4xf32, #tpu.memory_space<vmem>>, vector<1x8x4xf32>
    %394 = vector.shape_cast %393 : vector<1x8x4xf32> to vector<8x4xf32>
    %cst_374 = arith.constant dense<0.000000e+00> : vector<8x384xf32>
    %395 = tpu.matmul %394, %388, %cst_374 {dimension_numbers = #tpu.dot_dimension_numbers<[1], [0], [0], [1], [0, 0, 1, 1], [], []>} : vector<8x4xf32>, vector<4x384xf32>, vector<8x384xf32> -> vector<8x384xf32>
    %396 = arith.addf %392, %395 : vector<8x384xf32>
    %c0_375 = arith.constant 0 : index
    %c0_376 = arith.constant 0 : index
    %c192 = arith.constant 192 : index
    %397 = vector.load %arg1[%c0_375, %c0_376, %c192] : memref<1x4x600xf32, #tpu.memory_space<vmem>>, vector<1x4x384xf32>
    %398 = vector.shape_cast %397 : vector<1x4x384xf32> to vector<4x384xf32>
    %c0_377 = arith.constant 0 : index
    %c0_378 = arith.constant 0 : index
    %c192_379 = arith.constant 192 : index
    %399 = vector.load %arg2[%c0_377, %c0_378, %c192_379] : memref<1x4x600xf32, #tpu.memory_space<vmem>>, vector<1x4x384xf32>
    %400 = vector.shape_cast %399 : vector<1x4x384xf32> to vector<4x384xf32>
    %c66 = arith.constant 66 : index
    %c0_380 = arith.constant 0 : index
    %c0_381 = arith.constant 0 : index
    %401 = vector.load %arg3[%c66, %c0_380, %c0_381] : memref<72x8x4xf32, #tpu.memory_space<vmem>>, vector<1x8x4xf32>
    %402 = vector.shape_cast %401 : vector<1x8x4xf32> to vector<8x4xf32>
    %cst_382 = arith.constant dense<0.000000e+00> : vector<8x384xf32>
    %403 = tpu.matmul %402, %398, %cst_382 {dimension_numbers = #tpu.dot_dimension_numbers<[1], [0], [0], [1], [0, 0, 1, 1], [], []>} : vector<8x4xf32>, vector<4x384xf32>, vector<8x384xf32> -> vector<8x384xf32>
    %404 = arith.addf %396, %403 : vector<8x384xf32>
    %c67 = arith.constant 67 : index
    %c0_383 = arith.constant 0 : index
    %c0_384 = arith.constant 0 : index
    %405 = vector.load %arg3[%c67, %c0_383, %c0_384] : memref<72x8x4xf32, #tpu.memory_space<vmem>>, vector<1x8x4xf32>
    %406 = vector.shape_cast %405 : vector<1x8x4xf32> to vector<8x4xf32>
    %cst_385 = arith.constant dense<0.000000e+00> : vector<8x384xf32>
    %407 = tpu.matmul %406, %400, %cst_385 {dimension_numbers = #tpu.dot_dimension_numbers<[1], [0], [0], [1], [0, 0, 1, 1], [], []>} : vector<8x4xf32>, vector<4x384xf32>, vector<8x384xf32> -> vector<8x384xf32>
    %408 = arith.addf %404, %407 : vector<8x384xf32>
    %c0_386 = arith.constant 0 : index
    %c0_387 = arith.constant 0 : index
    %c196 = arith.constant 196 : index
    %409 = vector.load %arg1[%c0_386, %c0_387, %c196] : memref<1x4x600xf32, #tpu.memory_space<vmem>>, vector<1x4x384xf32>
    %410 = vector.shape_cast %409 : vector<1x4x384xf32> to vector<4x384xf32>
    %c0_388 = arith.constant 0 : index
    %c0_389 = arith.constant 0 : index
    %c196_390 = arith.constant 196 : index
    %411 = vector.load %arg2[%c0_388, %c0_389, %c196_390] : memref<1x4x600xf32, #tpu.memory_space<vmem>>, vector<1x4x384xf32>
    %412 = vector.shape_cast %411 : vector<1x4x384xf32> to vector<4x384xf32>
    %c68 = arith.constant 68 : index
    %c0_391 = arith.constant 0 : index
    %c0_392 = arith.constant 0 : index
    %413 = vector.load %arg3[%c68, %c0_391, %c0_392] : memref<72x8x4xf32, #tpu.memory_space<vmem>>, vector<1x8x4xf32>
    %414 = vector.shape_cast %413 : vector<1x8x4xf32> to vector<8x4xf32>
    %cst_393 = arith.constant dense<0.000000e+00> : vector<8x384xf32>
    %415 = tpu.matmul %414, %410, %cst_393 {dimension_numbers = #tpu.dot_dimension_numbers<[1], [0], [0], [1], [0, 0, 1, 1], [], []>} : vector<8x4xf32>, vector<4x384xf32>, vector<8x384xf32> -> vector<8x384xf32>
    %416 = arith.addf %408, %415 : vector<8x384xf32>
    %c69 = arith.constant 69 : index
    %c0_394 = arith.constant 0 : index
    %c0_395 = arith.constant 0 : index
    %417 = vector.load %arg3[%c69, %c0_394, %c0_395] : memref<72x8x4xf32, #tpu.memory_space<vmem>>, vector<1x8x4xf32>
    %418 = vector.shape_cast %417 : vector<1x8x4xf32> to vector<8x4xf32>
    %cst_396 = arith.constant dense<0.000000e+00> : vector<8x384xf32>
    %419 = tpu.matmul %418, %412, %cst_396 {dimension_numbers = #tpu.dot_dimension_numbers<[1], [0], [0], [1], [0, 0, 1, 1], [], []>} : vector<8x4xf32>, vector<4x384xf32>, vector<8x384xf32> -> vector<8x384xf32>
    %420 = arith.addf %416, %419 : vector<8x384xf32>
    %c0_397 = arith.constant 0 : index
    %c0_398 = arith.constant 0 : index
    %c200 = arith.constant 200 : index
    %421 = vector.load %arg1[%c0_397, %c0_398, %c200] : memref<1x4x600xf32, #tpu.memory_space<vmem>>, vector<1x4x384xf32>
    %422 = vector.shape_cast %421 : vector<1x4x384xf32> to vector<4x384xf32>
    %c0_399 = arith.constant 0 : index
    %c0_400 = arith.constant 0 : index
    %c200_401 = arith.constant 200 : index
    %423 = vector.load %arg2[%c0_399, %c0_400, %c200_401] : memref<1x4x600xf32, #tpu.memory_space<vmem>>, vector<1x4x384xf32>
    %424 = vector.shape_cast %423 : vector<1x4x384xf32> to vector<4x384xf32>
    %c70 = arith.constant 70 : index
    %c0_402 = arith.constant 0 : index
    %c0_403 = arith.constant 0 : index
    %425 = vector.load %arg3[%c70, %c0_402, %c0_403] : memref<72x8x4xf32, #tpu.memory_space<vmem>>, vector<1x8x4xf32>
    %426 = vector.shape_cast %425 : vector<1x8x4xf32> to vector<8x4xf32>
    %cst_404 = arith.constant dense<0.000000e+00> : vector<8x384xf32>
    %427 = tpu.matmul %426, %422, %cst_404 {dimension_numbers = #tpu.dot_dimension_numbers<[1], [0], [0], [1], [0, 0, 1, 1], [], []>} : vector<8x4xf32>, vector<4x384xf32>, vector<8x384xf32> -> vector<8x384xf32>
    %428 = arith.addf %420, %427 : vector<8x384xf32>
    %c71 = arith.constant 71 : index
    %c0_405 = arith.constant 0 : index
    %c0_406 = arith.constant 0 : index
    %429 = vector.load %arg3[%c71, %c0_405, %c0_406] : memref<72x8x4xf32, #tpu.memory_space<vmem>>, vector<1x8x4xf32>
    %430 = vector.shape_cast %429 : vector<1x8x4xf32> to vector<8x4xf32>
    %cst_407 = arith.constant dense<0.000000e+00> : vector<8x384xf32>
    %431 = tpu.matmul %430, %424, %cst_407 {dimension_numbers = #tpu.dot_dimension_numbers<[1], [0], [0], [1], [0, 0, 1, 1], [], []>} : vector<8x4xf32>, vector<4x384xf32>, vector<8x384xf32> -> vector<8x384xf32>
    %432 = arith.addf %428, %431 : vector<8x384xf32>
    %c0_408 = arith.constant 0 : index
    %c0_409 = arith.constant 0 : index
    %433 = vector.load %arg4[%c0_408, %c0_409] : memref<8x1xf32, #tpu.memory_space<vmem>>, vector<8x1xf32>
    %434 = vector.broadcast %433 : vector<8x1xf32> to vector<8x384xf32>
    %435 = arith.addf %432, %434 : vector<8x384xf32>
    %436 = vector.extract_strided_slice %435 {offsets = [0, 0], sizes = [8, 16], strides = [1, 1]} : vector<8x384xf32> to vector<8x16xf32>
    %c0_410 = arith.constant 0 : index
    %c0_411 = arith.constant 0 : index
    %c0_412 = arith.constant 0 : index
    %c0_413 = arith.constant 0 : index
    %437 = vector.load %arg5[%c0_410, %c0_411, %c0_412, %c0_413] : memref<1x8x16x16xf32, #tpu.memory_space<vmem>>, vector<1x8x1x16xf32>
    %438 = vector.shape_cast %437 : vector<1x8x1x16xf32> to vector<8x16xf32>
    %439 = vector.shape_cast %436 : vector<8x16xf32> to vector<1x8x1x16xf32>
    tpu.vector_store %arg5[%c0_410, %c0_411, %c0_412, %c0_413], %439 {strides = array<i32>} : memref<1x8x16x16xf32, #tpu.memory_space<vmem>>, vector<1x8x1x16xf32>,
    %440 = vector.extract_strided_slice %435 {offsets = [0, 24], sizes = [8, 16], strides = [1, 1]} : vector<8x384xf32> to vector<8x16xf32>
    %c0_414 = arith.constant 0 : index
    %c0_415 = arith.constant 0 : index
    %c1_416 = arith.constant 1 : index
    %c0_417 = arith.constant 0 : index
    %441 = vector.load %arg5[%c0_414, %c0_415, %c1_416, %c0_417] : memref<1x8x16x16xf32, #tpu.memory_space<vmem>>, vector<1x8x1x16xf32>
    %442 = vector.shape_cast %441 : vector<1x8x1x16xf32> to vector<8x16xf32>
    %443 = vector.shape_cast %440 : vector<8x16xf32> to vector<1x8x1x16xf32>
    tpu.vector_store %arg5[%c0_414, %c0_415, %c1_416, %c0_417], %443 {strides = array<i32>} : memref<1x8x16x16xf32, #tpu.memory_space<vmem>>, vector<1x8x1x16xf32>,
    %444 = vector.extract_strided_slice %435 {offsets = [0, 48], sizes = [8, 16], strides = [1, 1]} : vector<8x384xf32> to vector<8x16xf32>
    %c0_418 = arith.constant 0 : index
    %c0_419 = arith.constant 0 : index
    %c2_420 = arith.constant 2 : index
    %c0_421 = arith.constant 0 : index
    %445 = vector.load %arg5[%c0_418, %c0_419, %c2_420, %c0_421] : memref<1x8x16x16xf32, #tpu.memory_space<vmem>>, vector<1x8x1x16xf32>
    %446 = vector.shape_cast %445 : vector<1x8x1x16xf32> to vector<8x16xf32>
    %447 = vector.shape_cast %444 : vector<8x16xf32> to vector<1x8x1x16xf32>
    tpu.vector_store %arg5[%c0_418, %c0_419, %c2_420, %c0_421], %447 {strides = array<i32>} : memref<1x8x16x16xf32, #tpu.memory_space<vmem>>, vector<1x8x1x16xf32>,
    %448 = vector.extract_strided_slice %435 {offsets = [0, 72], sizes = [8, 16], strides = [1, 1]} : vector<8x384xf32> to vector<8x16xf32>
    %c0_422 = arith.constant 0 : index
    %c0_423 = arith.constant 0 : index
    %c3_424 = arith.constant 3 : index
    %c0_425 = arith.constant 0 : index
    %449 = vector.load %arg5[%c0_422, %c0_423, %c3_424, %c0_425] : memref<1x8x16x16xf32, #tpu.memory_space<vmem>>, vector<1x8x1x16xf32>
    %450 = vector.shape_cast %449 : vector<1x8x1x16xf32> to vector<8x16xf32>
    %451 = vector.shape_cast %448 : vector<8x16xf32> to vector<1x8x1x16xf32>
    tpu.vector_store %arg5[%c0_422, %c0_423, %c3_424, %c0_425], %451 {strides = array<i32>} : memref<1x8x16x16xf32, #tpu.memory_space<vmem>>, vector<1x8x1x16xf32>,
    %452 = vector.extract_strided_slice %435 {offsets = [0, 96], sizes = [8, 16], strides = [1, 1]} : vector<8x384xf32> to vector<8x16xf32>
    %c0_426 = arith.constant 0 : index
    %c0_427 = arith.constant 0 : index
    %c4_428 = arith.constant 4 : index
    %c0_429 = arith.constant 0 : index
    %453 = vector.load %arg5[%c0_426, %c0_427, %c4_428, %c0_429] : memref<1x8x16x16xf32, #tpu.memory_space<vmem>>, vector<1x8x1x16xf32>
    %454 = vector.shape_cast %453 : vector<1x8x1x16xf32> to vector<8x16xf32>
    %455 = vector.shape_cast %452 : vector<8x16xf32> to vector<1x8x1x16xf32>
    tpu.vector_store %arg5[%c0_426, %c0_427, %c4_428, %c0_429], %455 {strides = array<i32>} : memref<1x8x16x16xf32, #tpu.memory_space<vmem>>, vector<1x8x1x16xf32>,
    %456 = vector.extract_strided_slice %435 {offsets = [0, 120], sizes = [8, 16], strides = [1, 1]} : vector<8x384xf32> to vector<8x16xf32>
    %c0_430 = arith.constant 0 : index
    %c0_431 = arith.constant 0 : index
    %c5_432 = arith.constant 5 : index
    %c0_433 = arith.constant 0 : index
    %457 = vector.load %arg5[%c0_430, %c0_431, %c5_432, %c0_433] : memref<1x8x16x16xf32, #tpu.memory_space<vmem>>, vector<1x8x1x16xf32>
    %458 = vector.shape_cast %457 : vector<1x8x1x16xf32> to vector<8x16xf32>
    %459 = vector.shape_cast %456 : vector<8x16xf32> to vector<1x8x1x16xf32>
    tpu.vector_store %arg5[%c0_430, %c0_431, %c5_432, %c0_433], %459 {strides = array<i32>} : memref<1x8x16x16xf32, #tpu.memory_space<vmem>>, vector<1x8x1x16xf32>,
    %460 = vector.extract_strided_slice %435 {offsets = [0, 144], sizes = [8, 16], strides = [1, 1]} : vector<8x384xf32> to vector<8x16xf32>
    %c0_434 = arith.constant 0 : index
    %c0_435 = arith.constant 0 : index
    %c6_436 = arith.constant 6 : index
    %c0_437 = arith.constant 0 : index
    %461 = vector.load %arg5[%c0_434, %c0_435, %c6_436, %c0_437] : memref<1x8x16x16xf32, #tpu.memory_space<vmem>>, vector<1x8x1x16xf32>
    %462 = vector.shape_cast %461 : vector<1x8x1x16xf32> to vector<8x16xf32>
    %463 = vector.shape_cast %460 : vector<8x16xf32> to vector<1x8x1x16xf32>
    tpu.vector_store %arg5[%c0_434, %c0_435, %c6_436, %c0_437], %463 {strides = array<i32>} : memref<1x8x16x16xf32, #tpu.memory_space<vmem>>, vector<1x8x1x16xf32>,
    %464 = vector.extract_strided_slice %435 {offsets = [0, 168], sizes = [8, 16], strides = [1, 1]} : vector<8x384xf32> to vector<8x16xf32>
    %c0_438 = arith.constant 0 : index
    %c0_439 = arith.constant 0 : index
    %c7_440 = arith.constant 7 : index
    %c0_441 = arith.constant 0 : index
    %465 = vector.load %arg5[%c0_438, %c0_439, %c7_440, %c0_441] : memref<1x8x16x16xf32, #tpu.memory_space<vmem>>, vector<1x8x1x16xf32>
    %466 = vector.shape_cast %465 : vector<1x8x1x16xf32> to vector<8x16xf32>
    %467 = vector.shape_cast %464 : vector<8x16xf32> to vector<1x8x1x16xf32>
    tpu.vector_store %arg5[%c0_438, %c0_439, %c7_440, %c0_441], %467 {strides = array<i32>} : memref<1x8x16x16xf32, #tpu.memory_space<vmem>>, vector<1x8x1x16xf32>,
    %468 = vector.extract_strided_slice %435 {offsets = [0, 192], sizes = [8, 16], strides = [1, 1]} : vector<8x384xf32> to vector<8x16xf32>
    %c0_442 = arith.constant 0 : index
    %c0_443 = arith.constant 0 : index
    %c8_444 = arith.constant 8 : index
    %c0_445 = arith.constant 0 : index
    %469 = vector.load %arg5[%c0_442, %c0_443, %c8_444, %c0_445] : memref<1x8x16x16xf32, #tpu.memory_space<vmem>>, vector<1x8x1x16xf32>
    %470 = vector.shape_cast %469 : vector<1x8x1x16xf32> to vector<8x16xf32>
    %471 = vector.shape_cast %468 : vector<8x16xf32> to vector<1x8x1x16xf32>
    tpu.vector_store %arg5[%c0_442, %c0_443, %c8_444, %c0_445], %471 {strides = array<i32>} : memref<1x8x16x16xf32, #tpu.memory_space<vmem>>, vector<1x8x1x16xf32>,
    %472 = vector.extract_strided_slice %435 {offsets = [0, 216], sizes = [8, 16], strides = [1, 1]} : vector<8x384xf32> to vector<8x16xf32>
    %c0_446 = arith.constant 0 : index
    %c0_447 = arith.constant 0 : index
    %c9_448 = arith.constant 9 : index
    %c0_449 = arith.constant 0 : index
    %473 = vector.load %arg5[%c0_446, %c0_447, %c9_448, %c0_449] : memref<1x8x16x16xf32, #tpu.memory_space<vmem>>, vector<1x8x1x16xf32>
    %474 = vector.shape_cast %473 : vector<1x8x1x16xf32> to vector<8x16xf32>
    %475 = vector.shape_cast %472 : vector<8x16xf32> to vector<1x8x1x16xf32>
    tpu.vector_store %arg5[%c0_446, %c0_447, %c9_448, %c0_449], %475 {strides = array<i32>} : memref<1x8x16x16xf32, #tpu.memory_space<vmem>>, vector<1x8x1x16xf32>,
    %476 = vector.extract_strided_slice %435 {offsets = [0, 240], sizes = [8, 16], strides = [1, 1]} : vector<8x384xf32> to vector<8x16xf32>
    %c0_450 = arith.constant 0 : index
    %c0_451 = arith.constant 0 : index
    %c10_452 = arith.constant 10 : index
    %c0_453 = arith.constant 0 : index
    %477 = vector.load %arg5[%c0_450, %c0_451, %c10_452, %c0_453] : memref<1x8x16x16xf32, #tpu.memory_space<vmem>>, vector<1x8x1x16xf32>
    %478 = vector.shape_cast %477 : vector<1x8x1x16xf32> to vector<8x16xf32>
    %479 = vector.shape_cast %476 : vector<8x16xf32> to vector<1x8x1x16xf32>
    tpu.vector_store %arg5[%c0_450, %c0_451, %c10_452, %c0_453], %479 {strides = array<i32>} : memref<1x8x16x16xf32, #tpu.memory_space<vmem>>, vector<1x8x1x16xf32>,
    %480 = vector.extract_strided_slice %435 {offsets = [0, 264], sizes = [8, 16], strides = [1, 1]} : vector<8x384xf32> to vector<8x16xf32>
    %c0_454 = arith.constant 0 : index
    %c0_455 = arith.constant 0 : index
    %c11_456 = arith.constant 11 : index
    %c0_457 = arith.constant 0 : index
    %481 = vector.load %arg5[%c0_454, %c0_455, %c11_456, %c0_457] : memref<1x8x16x16xf32, #tpu.memory_space<vmem>>, vector<1x8x1x16xf32>
    %482 = vector.shape_cast %481 : vector<1x8x1x16xf32> to vector<8x16xf32>
    %483 = vector.shape_cast %480 : vector<8x16xf32> to vector<1x8x1x16xf32>
    tpu.vector_store %arg5[%c0_454, %c0_455, %c11_456, %c0_457], %483 {strides = array<i32>} : memref<1x8x16x16xf32, #tpu.memory_space<vmem>>, vector<1x8x1x16xf32>,
    %484 = vector.extract_strided_slice %435 {offsets = [0, 288], sizes = [8, 16], strides = [1, 1]} : vector<8x384xf32> to vector<8x16xf32>
    %c0_458 = arith.constant 0 : index
    %c0_459 = arith.constant 0 : index
    %c12_460 = arith.constant 12 : index
    %c0_461 = arith.constant 0 : index
    %485 = vector.load %arg5[%c0_458, %c0_459, %c12_460, %c0_461] : memref<1x8x16x16xf32, #tpu.memory_space<vmem>>, vector<1x8x1x16xf32>
    %486 = vector.shape_cast %485 : vector<1x8x1x16xf32> to vector<8x16xf32>
    %487 = vector.shape_cast %484 : vector<8x16xf32> to vector<1x8x1x16xf32>
    tpu.vector_store %arg5[%c0_458, %c0_459, %c12_460, %c0_461], %487 {strides = array<i32>} : memref<1x8x16x16xf32, #tpu.memory_space<vmem>>, vector<1x8x1x16xf32>,
    %488 = vector.extract_strided_slice %435 {offsets = [0, 312], sizes = [8, 16], strides = [1, 1]} : vector<8x384xf32> to vector<8x16xf32>
    %c0_462 = arith.constant 0 : index
    %c0_463 = arith.constant 0 : index
    %c13_464 = arith.constant 13 : index
    %c0_465 = arith.constant 0 : index
    %489 = vector.load %arg5[%c0_462, %c0_463, %c13_464, %c0_465] : memref<1x8x16x16xf32, #tpu.memory_space<vmem>>, vector<1x8x1x16xf32>
    %490 = vector.shape_cast %489 : vector<1x8x1x16xf32> to vector<8x16xf32>
    %491 = vector.shape_cast %488 : vector<8x16xf32> to vector<1x8x1x16xf32>
    tpu.vector_store %arg5[%c0_462, %c0_463, %c13_464, %c0_465], %491 {strides = array<i32>} : memref<1x8x16x16xf32, #tpu.memory_space<vmem>>, vector<1x8x1x16xf32>,
    %492 = vector.extract_strided_slice %435 {offsets = [0, 336], sizes = [8, 16], strides = [1, 1]} : vector<8x384xf32> to vector<8x16xf32>
    %c0_466 = arith.constant 0 : index
    %c0_467 = arith.constant 0 : index
    %c14_468 = arith.constant 14 : index
    %c0_469 = arith.constant 0 : index
    %493 = vector.load %arg5[%c0_466, %c0_467, %c14_468, %c0_469] : memref<1x8x16x16xf32, #tpu.memory_space<vmem>>, vector<1x8x1x16xf32>
    %494 = vector.shape_cast %493 : vector<1x8x1x16xf32> to vector<8x16xf32>
    %495 = vector.shape_cast %492 : vector<8x16xf32> to vector<1x8x1x16xf32>
    tpu.vector_store %arg5[%c0_466, %c0_467, %c14_468, %c0_469], %495 {strides = array<i32>} : memref<1x8x16x16xf32, #tpu.memory_space<vmem>>, vector<1x8x1x16xf32>,
    %496 = vector.extract_strided_slice %435 {offsets = [0, 360], sizes = [8, 16], strides = [1, 1]} : vector<8x384xf32> to vector<8x16xf32>
    %c0_470 = arith.constant 0 : index
    %c0_471 = arith.constant 0 : index
    %c15_472 = arith.constant 15 : index
    %c0_473 = arith.constant 0 : index
    %497 = vector.load %arg5[%c0_470, %c0_471, %c15_472, %c0_473] : memref<1x8x16x16xf32, #tpu.memory_space<vmem>>, vector<1x8x1x16xf32>
    %498 = vector.shape_cast %497 : vector<1x8x1x16xf32> to vector<8x16xf32>
    %499 = vector.shape_cast %496 : vector<8x16xf32> to vector<1x8x1x16xf32>
    tpu.vector_store %arg5[%c0_470, %c0_471, %c15_472, %c0_473], %499 {strides = array<i32>} : memref<1x8x16x16xf32, #tpu.memory_space<vmem>>, vector<1x8x1x16xf32>,
    return
  }
  func.func @transform_0(%arg0: i32) -> (i32, i32, i32) {
    %c0_i32 = arith.constant 0 : i32
    %c0_i32_0 = arith.constant 0 : i32
    %c0_i32_1 = arith.constant 0 : i32
    return %arg0, %c0_i32, %c0_i32_0 : i32, i32, i32
  }
  func.func @transform_1(%arg0: i32) -> (i32, i32, i32) {
    %c0_i32 = arith.constant 0 : i32
    %c0_i32_0 = arith.constant 0 : i32
    %c0_i32_1 = arith.constant 0 : i32
    return %arg0, %c0_i32, %c0_i32_0 : i32, i32, i32
  }
  func.func @transform_2(%arg0: i32) -> (i32, i32, i32) {
    %c0_i32 = arith.constant 0 : i32
    %c0_i32_0 = arith.constant 0 : i32
    %c0_i32_1 = arith.constant 0 : i32
    %c0_i32_2 = arith.constant 0 : i32
    return %c0_i32, %c0_i32_0, %c0_i32_1 : i32, i32, i32
  }
  func.func @transform_3(%arg0: i32) -> (i32, i32) {
    %c0_i32 = arith.constant 0 : i32
    %c0_i32_0 = arith.constant 0 : i32
    %c0_i32_1 = arith.constant 0 : i32
    return %c0_i32, %c0_i32_0 : i32, i32
  }
  func.func @transform_4(%arg0: i32) -> (i32, i32, i32, i32) {
    %c0_i32 = arith.constant 0 : i32
    %c0_i32_0 = arith.constant 0 : i32
    %c0_i32_1 = arith.constant 0 : i32
    %c0_i32_2 = arith.constant 0 : i32
    return %arg0, %c0_i32, %c0_i32_0, %c0_i32_1 : i32, i32, i32, i32
  }
}

</mosaic_0001>

<bundles_post_ra>
// kernel: pcf_forward.1
= control target key start
LH: loop header
LB: loop body
LE: loop exit
PB: predicated region body
PF: predicated region fallthrough
CT: control target
= control target key end

     0   :  { %s14528_s15 = smov 0   ;;  %s16997_s0 = inlined_call_operand.vmem [shape: f32[2,4,600], index: 0, kind: input, shape index: {}]   ;;  %s16998_s1 = inlined_call_operand.vmem [shape: f32[2,4,600], index: 1, kind: input, shape index: {}]   ;;  %s16999_s2 = inlined_call_operand.vmem [shape: f32[72,8,4], index: 2, kind: input, shape index: {}]   ;;  %s17000_s3 = inlined_call_operand.vmem [shape: f32[8,1], index: 3, kind: input, shape index: {}]   ;;  %s17001_s4 = inlined_call_operand.vmem [shape: f32[2,8,16,16], index: 4, kind: output, shape index: {}]  }
   0x1 LB: > { %s13424_s16 = sadd.s32 4294967295, %s14455_s15   ;;  %p13428_p0 = scmp.ge.s32.totalorder %s14455_s15, 1  ;;  %s14455_s15 = sphi %s14528_s15, %s14_s15  }
   0x2   : > { %p172_p1 = scmp.lt.s32.totalorder %s14455_s15, 3 }
   0x4   : > { %p173_p2 = pnand %p13428_p0, %p172_p1 }
   0x5   : > { %p203_p3 = scmp.lt.s32.totalorder (!%p173_p2), %s13424_s16, 1  ;;  %s14458_s24 = smov (!%p173_p2), 53  }
   0x6   : > { %176 = sbr.rel (%p173_p2) target bundleno = 1225 (0x4c9), region = 36  ;;  %s14460_s25 = smov (!%p173_p2), 52  }
   0x7   : > { %s14461_s26 = smov (!%p173_p2), 51   ;;  %s14462_s27 = smov (!%p173_p2), 29  }
   0x8   : > { %s14463_s28 = smov (!%p173_p2), 28   ;;  %s14464_s29 = smov (!%p173_p2), 27  }
   0x9   : > { %s14465_s30 = smov (!%p173_p2), 5   ;;  %s14466_s5 = smov (!%p173_p2), 4  }
   0xa   : > { %s14467_s8 = smov (!%p173_p2), 3   ;;  %s14468_s13 = smov (!%p173_p2), 78  }
   0xb   : > { %v14457_v0 = vmov 0.0   ;;  %s17003_s16 = smov (!%p203_p3, %s13424_s16), 1  ;;  %vm14459_vm0 = vmmov 0   ;;  %vm237_vm1 = vcmask 433152   ;;  %vm245_vm2 = vcmask 1043456   ;;  %v13433_v14 = vld [vmem:[%s16999_s2 + $0x8] sm:$0xff] }
   0xc   : > { %14011 = vmatprep.subr.mxu1 %v14457_v0  ;;  %316 = vmatprep.mubr.f32.mxu0 %v14457_v0  ;;  %s14371_s17 = smul.u32 20, %s17003_s16  ;;  %vm241_vm3 = vcmask 31744   ;;  %v222_v23 = vld [vmem:[%s16999_s2] sm:$0xff]  ;;  %vm576_vm4 = vcmask 424960   ;;  %v13444_v31 = vld [vmem:[%s16999_s2 + $0x10] sm:$0xff]  ;;  %v13450_v39 = vld [vmem:[%s16999_s2 + $0x18] sm:$0xff] }
   0xd   : > { %14013 = vmatprep.mubr.msk.f32.mxu1 %vm14459_vm0, %v14457_v0  ;;  %vm921_vm5 = vcmask 416768   ;;  %v13456_v47 = vld [vmem:[%s16999_s2 + $0x20] sm:$0xff]  ;;  %s14469_s21 = smov 76   ;;  %v13462_v55 = vld [vmem:[%s16999_s2 + $0x28] sm:$0xff]  ;;  %vm1266_vm6 = vcmask 236544   ;;  %v13468_v63 = vld [vmem:[%s16999_s2 + $0x30] sm:$0xff] }
   0xe   : > { %s14544_s20 = scalar_lea.vmem %s16998_s1, %s14371_s17  ;;  %s14549_s23 = scalar_lea.vmem %s16997_s0, %s14371_s17  ;;  %vm1611_vm7 = vcmask 228352   ;;  %vm1956_vm8 = vcmask 220160   ;;  %vm2301_vm9 = vcmask 39936   ;;  %vm2990_vm10 = vcmask 23552  }
   0xf   : > { %v14552_v1 = vld [vmem:[%s14544_s20 + $0x8] sm:$0xff]  ;;  %v14555_v2 = vld [vmem:[%s14544_s20] sm:$0xff]  ;;  %s14471_s6 = smov 30   ;;  %s14472_s11 = smov 26   ;;  %vm3335_vm11 = vcmask 637952   ;;  %vm3680_vm12 = vcmask 621568  }
  0x10   : > { %233 = vrot.lane.b32.xlu1 %v14552_v1, %s14458_s24  ;;  %v14560_v3 = vcombine.high %v14552_v1, %v14552_v1  ;;  %229 = vrot.lane.b32.xlu0 %v14555_v2, %s14458_s24  ;;  %v14564_v4 = vld [vmem:[%s14549_s23] sm:$0xff]  ;;  %v14570_v5 = vcombine.high %v14555_v2, %v14555_v2  ;;  %v14579_v7 = vld [vmem:[%s14549_s23 + $0x8] sm:$0xff]  ;;  %s14473_s18 = smov 110   ;;  %s14476_s9 = smov 103   ;;  %vm4025_vm13 = vcmask 605184   ;;  %vm4370_vm14 = vcmask 244736  }
  0x11   : > { %v14576_v6 = vcombine.high %v14564_v4, %v14564_v4  ;;  %v14585_v8 = vcombine.high %v14579_v7, %v14579_v7  ;;  %s14477_s14 = smov 100   ;;  %s14478_s22 = smov 97   ;;  %vm5013_vm15 = vcmask 211968  }
  0x12   : > { %s14500_s17 = smov 96   ;;  %s14502_s19 = smov 48  }
  0x14   : > { %235 = vrot.lane.b32.xlu1 %v14560_v3, %s14458_s24  ;;  %397 = vrot.lane.b32.xlu0 %v14564_v4, %s14458_s24 }
  0x18   : > { %231 = vrot.lane.b32.xlu0 %v14570_v5, %s14458_s24  ;;  %399 = vrot.lane.b32.xlu1 %v14576_v6, %s14458_s24 }
  0x1c   : > { %401 = vrot.lane.b32.xlu0 %v14579_v7, %s14458_s24  ;;  %403 = vrot.lane.b32.xlu1 %v14585_v8, %s14458_s24 }
  0x20   : > { %568 = vrot.lane.b32.xlu0 %v14564_v4, %s14460_s25  ;;  %570 = vrot.lane.b32.xlu1 %v14576_v6, %s14460_s25 }
  0x24   : > { %572 = vrot.lane.b32.xlu0 %v14579_v7, %s14460_s25  ;;  %574 = vrot.lane.b32.xlu1 %v14585_v8, %s14460_s25 }
  0x28   : > { %739 = vrot.lane.b32.xlu0 %v14555_v2, %s14460_s25  ;;  %741 = vrot.lane.b32.xlu1 %v14570_v5, %s14460_s25 }
  0x2c   : > { %743 = vrot.lane.b32.xlu0 %v14552_v1, %s14460_s25  ;;  %745 = vrot.lane.b32.xlu1 %v14560_v3, %s14460_s25  ;;  %s14474_s25 = smov 108  }
  0x30   : > { %913 = vrot.lane.b32.xlu0 %v14564_v4, %s14461_s26  ;;  %915 = vrot.lane.b32.xlu1 %v14576_v6, %s14461_s26 }
  0x34   : > { %917 = vrot.lane.b32.xlu0 %v14579_v7, %s14461_s26  ;;  %919 = vrot.lane.b32.xlu1 %v14585_v8, %s14461_s26 }
  0x38   : > { %1084 = vrot.lane.b32.xlu0 %v14555_v2, %s14461_s26  ;;  %1086 = vrot.lane.b32.xlu1 %v14570_v5, %s14461_s26 }
  0x3c   : > { %1088 = vrot.lane.b32.xlu0 %v14552_v1, %s14461_s26  ;;  %1090 = vrot.lane.b32.xlu1 %v14560_v3, %s14461_s26 }
  0x40   : > { %1258 = vrot.lane.b32.xlu0 %v14564_v4, %s14462_s27  ;;  %1260 = vrot.lane.b32.xlu1 %v14576_v6, %s14462_s27 }
  0x44   : > { %1262 = vrot.lane.b32.xlu0 %v14579_v7, %s14462_s27  ;;  %1264 = vrot.lane.b32.xlu1 %v14585_v8, %s14462_s27 }
  0x48   : > { %1429 = vrot.lane.b32.xlu0 %v14555_v2, %s14462_s27  ;;  %1431 = vrot.lane.b32.xlu1 %v14570_v5, %s14462_s27 }
  0x4c   : > { %1433 = vrot.lane.b32.xlu0 %v14552_v1, %s14462_s27  ;;  %1435 = vrot.lane.b32.xlu1 %v14560_v3, %s14462_s27  ;;  %s14470_s27 = smov 74  }
  0x50   : > { %1603 = vrot.lane.b32.xlu0 %v14564_v4, %s14463_s28  ;;  %1605 = vrot.lane.b32.xlu1 %v14576_v6, %s14463_s28 }
  0x54   : > { %1607 = vrot.lane.b32.xlu0 %v14579_v7, %s14463_s28  ;;  %1609 = vrot.lane.b32.xlu1 %v14585_v8, %s14463_s28 }
  0x58   : > { %1774 = vrot.lane.b32.xlu0 %v14555_v2, %s14463_s28  ;;  %1776 = vrot.lane.b32.xlu1 %v14570_v5, %s14463_s28 }
  0x5c   : > { %1778 = vrot.lane.b32.xlu0 %v14552_v1, %s14463_s28  ;;  %1780 = vrot.lane.b32.xlu1 %v14560_v3, %s14463_s28 }
  0x60   : > { %1948 = vrot.lane.b32.xlu0 %v14564_v4, %s14464_s29  ;;  %1950 = vrot.lane.b32.xlu1 %v14576_v6, %s14464_s29 }
  0x64   : > { %1952 = vrot.lane.b32.xlu0 %v14579_v7, %s14464_s29  ;;  %1954 = vrot.lane.b32.xlu1 %v14585_v8, %s14464_s29 }
  0x68   : > { %2119 = vrot.lane.b32.xlu0 %v14555_v2, %s14464_s29  ;;  %2121 = vrot.lane.b32.xlu1 %v14570_v5, %s14464_s29 }
  0x6c   : > { %2123 = vrot.lane.b32.xlu0 %v14552_v1, %s14464_s29  ;;  %2125 = vrot.lane.b32.xlu1 %v14560_v3, %s14464_s29  ;;  %s14490_s29 = smov 56  }
  0x70   : > { %2293 = vrot.lane.b32.xlu0 %v14564_v4, %s14465_s30  ;;  %2295 = vrot.lane.b32.xlu1 %v14576_v6, %s14465_s30 }
  0x74   : > { %2297 = vrot.lane.b32.xlu0 %v14579_v7, %s14465_s30  ;;  %2299 = vrot.lane.b32.xlu1 %v14585_v8, %s14465_s30 }
  0x78   : > { %2464 = vrot.lane.b32.xlu0 %v14555_v2, %s14465_s30  ;;  %2466 = vrot.lane.b32.xlu1 %v14570_v5, %s14465_s30 }
  0x7c   : > { %2468 = vrot.lane.b32.xlu0 %v14552_v1, %s14465_s30  ;;  %2470 = vrot.lane.b32.xlu1 %v14560_v3, %s14465_s30  ;;  %s14475_s30 = smov 106  }
  0x80   : > { %2638 = vrot.lane.b32.xlu0 %v14564_v4, %s14466_s5  ;;  %2640 = vrot.lane.b32.xlu1 %v14576_v6, %s14466_s5 }
  0x82   : > { %v234_v9 = vpop.permute.xlu1 %233  ;;  %v230_v10 = vpop.permute.xlu0 %229 }
  0x84   : > { %2642 = vrot.lane.b32.xlu0 %v14579_v7, %s14466_s5  ;;  %2644 = vrot.lane.b32.xlu1 %v14585_v8, %s14466_s5 }
  0x86   : > { %v236_v11 = vpop.permute.xlu1 %235  ;;  %v398_v12 = vpop.permute.xlu0 %397 }
  0x87   : > { %v240_v13 = vsel %vm237_vm1, %v234_v9, %v236_v11 }
  0x88   : > { %14012 = vmatpush3.msk.msra.mxu1 %vm245_vm2, %v240_v13  ;;  %2808 = vrot.lane.b32.xlu0 %v14555_v2, %s14466_s5 }
  0x89   : > { %2810 = vrot.lane.b32.xlu1 %v14570_v5, %s14466_s5  ;;  %14016 = vmatprep.subr.mxu1 %v14457_v0 }
  0x8a   : > { %v232_v15 = vpop.permute.xlu0 %231  ;;  %v400_v16 = vpop.permute.xlu1 %399  ;;  %14014 = vmatmul.mubr.msk.f32.vlgmr.msra.gmra.mxu1 %vm241_vm3, %v13433_v14 }
  0x8b   : > { %v239_v17 = vsel %vm237_vm1, %v232_v15, %v234_v9  ;;  %v238_v18 = vsel %vm237_vm1, %v230_v10, %v232_v15  ;;  %14018 = vmatprep.mubr.msk.f32.mxu1 %vm14459_vm0, %v14457_v0  ;;  %v405_v24 = vsel %vm237_vm1, %v398_v12, %v400_v16 }
  0x8c   : > { %2812 = vrot.lane.b32.xlu0 %v14552_v1, %s14466_s5  ;;  %13434 = vmatprep.subr.msk.mxu0 %vm245_vm2, %v239_v17 }
  0x8d   : > { %2814 = vrot.lane.b32.xlu1 %v14560_v3, %s14466_s5  ;;  %13435 = vmatpush1.msk.msra.mxu0 %vm245_vm2, %v238_v18 }
  0x8e   : > { %v402_v19 = vpop.permute.xlu0 %401  ;;  %v404_v20 = vpop.permute.xlu1 %403  ;;  %13436 = vmatmul.mubr.msk.f32.vlgmr.msra.gmra.mxu0 %vm241_vm3, %v13433_v14 }
  0x8f   : > { %v407_v21 = vsel %vm237_vm1, %v402_v19, %v404_v20  ;;  %v406_v22 = vsel %vm237_vm1, %v400_v16, %v402_v19  ;;  %481 = vmatprep.mubr.f32.mxu0 %v14457_v0  ;;  %v13474_v16 = vld [vmem:[%s16999_s2 + $0x38] sm:$0xff]  ;;  %vm5358_vm1 = vcmask 900096  }
  0x90   : > { %2982 = vrot.lane.b32.xlu0 %v14564_v4, %s14467_s8  ;;  %13439 = vmatprep.subr.msk.mxu0 %vm245_vm2, %v406_v22 }
  0x91   : > { %2984 = vrot.lane.b32.xlu1 %v14576_v6, %s14467_s8  ;;  %14017 = vmatpush3.msk.msra.mxu1 %vm245_vm2, %v407_v21 }
  0x92   : > { %13440 = vmatpush1.msk.msra.mxu0 %vm245_vm2, %v405_v24  ;;  %v569_v25 = vpop.permute.xlu0 %568  ;;  %v571_v26 = vpop.permute.xlu1 %570  ;;  %14021 = vmatprep.subr.mxu1 %v14457_v0  ;;  %v13480_v24 = vld [vmem:[%s16999_s2 + $0x40] sm:$0xff] }
  0x93   : > { %14019 = vmatmul.mubr.msk.f32.vlgmr.msra.gmra.mxu1 %vm241_vm3, %v222_v23  ;;  %13441 = vmatmul.mubr.msk.f32.vlgmr.msra.gmra.mxu0 %vm241_vm3, %v222_v23  ;;  %v577_v32 = vsel %vm576_vm4, %v569_v25, %v571_v26 }
  0x94   : > { %2986 = vrot.lane.b32.xlu0 %v14579_v7, %s14467_s8  ;;  %14023 = vmatprep.mubr.msk.f32.mxu1 %vm14459_vm0, %v14457_v0 }
  0x95   : > { %2988 = vrot.lane.b32.xlu1 %v14585_v8, %s14467_s8  ;;  %653 = vmatprep.mubr.f32.mxu0 %v14457_v0 }
  0x96   : > { %v573_v27 = vpop.permute.xlu0 %572  ;;  %v575_v28 = vpop.permute.xlu1 %574 }
  0x97   : > { %v579_v29 = vsel %vm576_vm4, %v573_v27, %v575_v28  ;;  %v578_v30 = vsel %vm576_vm4, %v571_v26, %v573_v27 }
  0x98   : > { %3153 = vrot.lane.b32.xlu0 %v14555_v2, %s14467_s8  ;;  %13445 = vmatprep.subr.msk.mxu0 %vm245_vm2, %v578_v30 }
  0x99   : > { %3155 = vrot.lane.b32.xlu1 %v14570_v5, %s14467_s8  ;;  %14022 = vmatpush3.msk.msra.mxu1 %vm245_vm2, %v579_v29 }
  0x9a   : > { %13446 = vmatpush1.msk.msra.mxu0 %vm245_vm2, %v577_v32  ;;  %v740_v33 = vpop.permute.xlu0 %739  ;;  %v742_v34 = vpop.permute.xlu1 %741  ;;  %14026 = vmatprep.subr.mxu1 %v14457_v0  ;;  %v13486_v32 = vld [vmem:[%s16999_s2 + $0x48] sm:$0xff] }
  0x9b   : > { %14024 = vmatmul.mubr.msk.f32.vlgmr.msra.gmra.mxu1 %vm241_vm3, %v13444_v31  ;;  %13447 = vmatmul.mubr.msk.f32.vlgmr.msra.gmra.mxu0 %vm241_vm3, %v13444_v31  ;;  %v747_v40 = vsel %vm576_vm4, %v740_v33, %v742_v34 }
  0x9c   : > { %3157 = vrot.lane.b32.xlu0 %v14552_v1, %s14467_s8  ;;  %14028 = vmatprep.mubr.msk.f32.mxu1 %vm14459_vm0, %v14457_v0 }
  0x9d   : > { %3159 = vrot.lane.b32.xlu1 %v14560_v3, %s14467_s8  ;;  %823 = vmatprep.mubr.f32.mxu0 %v14457_v0 }
  0x9e   : > { %v744_v35 = vpop.permute.xlu0 %743  ;;  %v746_v36 = vpop.permute.xlu1 %745 }
  0x9f   : > { %v749_v37 = vsel %vm576_vm4, %v744_v35, %v746_v36  ;;  %v748_v38 = vsel %vm576_vm4, %v742_v34, %v744_v35  ;;  %vm5703_vm4 = vcmask 883712  }
  0xa0   : > { %3327 = vrot.lane.b32.xlu0 %v14564_v4, %s14468_s13  ;;  %13451 = vmatprep.subr.msk.mxu0 %vm245_vm2, %v748_v38 }
  0xa1   : > { %3329 = vrot.lane.b32.xlu1 %v14576_v6, %s14468_s13  ;;  %14027 = vmatpush3.msk.msra.mxu1 %vm245_vm2, %v749_v37 }
  0xa2   : > { %13452 = vmatpush1.msk.msra.mxu0 %vm245_vm2, %v747_v40  ;;  %v914_v41 = vpop.permute.xlu0 %913  ;;  %v916_v42 = vpop.permute.xlu1 %915  ;;  %14031 = vmatprep.subr.mxu1 %v14457_v0  ;;  %v13492_v40 = vld [vmem:[%s16999_s2 + $0x50] sm:$0xff] }
  0xa3   : > { %14029 = vmatmul.mubr.msk.f32.vlgmr.msra.gmra.mxu1 %vm241_vm3, %v13450_v39  ;;  %13453 = vmatmul.mubr.msk.f32.vlgmr.msra.gmra.mxu0 %vm241_vm3, %v13450_v39  ;;  %v922_v48 = vsel %vm921_vm5, %v914_v41, %v916_v42 }
  0xa4   : > { %3331 = vrot.lane.b32.xlu0 %v14579_v7, %s14468_s13  ;;  %14033 = vmatprep.mubr.msk.f32.mxu1 %vm14459_vm0, %v14457_v0 }
  0xa5   : > { %3333 = vrot.lane.b32.xlu1 %v14585_v8, %s14468_s13  ;;  %998 = vmatprep.mubr.f32.mxu0 %v14457_v0 }
  0xa6   : > { %v918_v43 = vpop.permute.xlu0 %917  ;;  %v920_v44 = vpop.permute.xlu1 %919 }
  0xa7   : > { %v924_v45 = vsel %vm921_vm5, %v918_v43, %v920_v44  ;;  %v923_v46 = vsel %vm921_vm5, %v916_v42, %v918_v43 }
  0xa8   : > { %3498 = vrot.lane.b32.xlu0 %v14555_v2, %s14468_s13  ;;  %13457 = vmatprep.subr.msk.mxu0 %vm245_vm2, %v923_v46 }
  0xa9   : > { %3500 = vrot.lane.b32.xlu1 %v14570_v5, %s14468_s13  ;;  %14032 = vmatpush3.msk.msra.mxu1 %vm245_vm2, %v924_v45 }
  0xaa   : > { %13458 = vmatpush1.msk.msra.mxu0 %vm245_vm2, %v922_v48  ;;  %v1085_v49 = vpop.permute.xlu0 %1084  ;;  %v1087_v50 = vpop.permute.xlu1 %1086  ;;  %14036 = vmatprep.subr.mxu1 %v14457_v0  ;;  %v13498_v48 = vld [vmem:[%s16999_s2 + $0x58] sm:$0xff] }
  0xab   : > { %14034 = vmatmul.mubr.msk.f32.vlgmr.msra.gmra.mxu1 %vm241_vm3, %v13456_v47  ;;  %13459 = vmatmul.mubr.msk.f32.vlgmr.msra.gmra.mxu0 %vm241_vm3, %v13456_v47  ;;  %v1092_v56 = vsel %vm921_vm5, %v1085_v49, %v1087_v50 }
  0xac   : > { %3502 = vrot.lane.b32.xlu0 %v14552_v1, %s14468_s13  ;;  %14038 = vmatprep.mubr.msk.f32.mxu1 %vm14459_vm0, %v14457_v0 }
  0xad   : > { %3504 = vrot.lane.b32.xlu1 %v14560_v3, %s14468_s13  ;;  %1168 = vmatprep.mubr.f32.mxu0 %v14457_v0  ;;  %s14495_s13 = smov 112  }
  0xae   : > { %v1089_v51 = vpop.permute.xlu0 %1088  ;;  %v1091_v52 = vpop.permute.xlu1 %1090 }
  0xaf   : > { %v1094_v53 = vsel %vm921_vm5, %v1089_v51, %v1091_v52  ;;  %v1093_v54 = vsel %vm921_vm5, %v1087_v50, %v1089_v51  ;;  %vm6048_vm5 = vcmask 867328  }
  0xb0   : > { %3672 = vrot.lane.b32.xlu0 %v14564_v4, %s14469_s21  ;;  %13463 = vmatprep.subr.msk.mxu0 %vm245_vm2, %v1093_v54 }
  0xb1   : > { %3674 = vrot.lane.b32.xlu1 %v14576_v6, %s14469_s21  ;;  %14037 = vmatpush3.msk.msra.mxu1 %vm245_vm2, %v1094_v53 }
  0xb2   : > { %13464 = vmatpush1.msk.msra.mxu0 %vm245_vm2, %v1092_v56  ;;  %v1259_v57 = vpop.permute.xlu0 %1258  ;;  %v1261_v58 = vpop.permute.xlu1 %1260  ;;  %14041 = vmatprep.subr.mxu1 %v14457_v0 }
  0xb3   : > { %14039 = vmatmul.mubr.msk.f32.vlgmr.msra.gmra.mxu1 %vm241_vm3, %v13462_v55  ;;  %13465 = vmatmul.mubr.msk.f32.vlgmr.msra.gmra.mxu0 %vm241_vm3, %v13462_v55  ;;  %v1267_v9 = vsel %vm1266_vm6, %v1259_v57, %v1261_v58 }
  0xb4   : > { %3676 = vrot.lane.b32.xlu0 %v14579_v7, %s14469_s21  ;;  %14043 = vmatprep.mubr.msk.f32.mxu1 %vm14459_vm0, %v14457_v0 }
  0xb5   : > { %3678 = vrot.lane.b32.xlu1 %v14585_v8, %s14469_s21  ;;  %1343 = vmatprep.mubr.f32.mxu0 %v14457_v0 }
  0xb6   : > { %v1263_v59 = vpop.permute.xlu0 %1262  ;;  %v1265_v60 = vpop.permute.xlu1 %1264 }
  0xb7   : > { %v1269_v61 = vsel %vm1266_vm6, %v1263_v59, %v1265_v60  ;;  %v1268_v62 = vsel %vm1266_vm6, %v1261_v58, %v1263_v59  ;;  %v14962_v58 = vld [vmem:[%s14549_s23 + $0xc] sm:$0xff] }
  0xb8   : > { %3843 = vrot.lane.b32.xlu0 %v14555_v2, %s14469_s21  ;;  %13469 = vmatprep.subr.msk.mxu0 %vm245_vm2, %v1268_v62 }
  0xb9   : > { %3845 = vrot.lane.b32.xlu1 %v14570_v5, %s14469_s21  ;;  %14042 = vmatpush3.msk.msra.mxu1 %vm245_vm2, %v1269_v61  ;;  %v14978_v61 = vcombine.high %v14962_v58, %v14962_v58 }
  0xba   : > { %13470 = vmatpush1.msk.msra.mxu0 %vm245_vm2, %v1267_v9  ;;  %v1430_v10 = vpop.permute.xlu0 %1429  ;;  %v1432_v11 = vpop.permute.xlu1 %1431  ;;  %14046 = vmatprep.subr.mxu1 %v14457_v0  ;;  %v14983_v9 = vld [vmem:[%s14544_s20 + $0x4] sm:$0xff] }
  0xbb   : > { %14044 = vmatmul.mubr.msk.f32.vlgmr.msra.gmra.mxu1 %vm241_vm3, %v13468_v63  ;;  %13471 = vmatmul.mubr.msk.f32.vlgmr.msra.gmra.mxu0 %vm241_vm3, %v13468_v63  ;;  %v1437_v17 = vsel %vm1266_vm6, %v1430_v10, %v1432_v11  ;;  %v14995_v10 = vcombine.high %v14983_v9, %v14983_v9 }
  0xbc   : > { %3847 = vrot.lane.b32.xlu0 %v14552_v1, %s14469_s21  ;;  %14048 = vmatprep.mubr.msk.f32.mxu1 %vm14459_vm0, %v14457_v0 }
  0xbd   : > { %3849 = vrot.lane.b32.xlu1 %v14560_v3, %s14469_s21  ;;  %1513 = vmatprep.mubr.f32.mxu0 %v14457_v0  ;;  %s14481_s21 = smov 87  }
  0xbe   : > { %v1434_v12 = vpop.permute.xlu0 %1433  ;;  %v1436_v13 = vpop.permute.xlu1 %1435 }
  0xbf   : > { %v1439_v14 = vsel %vm1266_vm6, %v1434_v12, %v1436_v13  ;;  %v1438_v15 = vsel %vm1266_vm6, %v1432_v11, %v1434_v12  ;;  %v14999_v13 = vld [vmem:[%s14544_s20 + $0xc] sm:$0xff]  ;;  %vm6393_vm6 = vcmask 842752  }
  0xc0   : > { %4017 = vrot.lane.b32.xlu0 %v14564_v4, %s14470_s27  ;;  %13475 = vmatprep.subr.msk.mxu0 %vm245_vm2, %v1438_v15 }
  0xc1   : > { %4019 = vrot.lane.b32.xlu1 %v14576_v6, %s14470_s27  ;;  %14047 = vmatpush3.msk.msra.mxu1 %vm245_vm2, %v1439_v14 }
  0xc2   : > { %13476 = vmatpush1.msk.msra.mxu0 %vm245_vm2, %v1437_v17  ;;  %v1604_v18 = vpop.permute.xlu0 %1603  ;;  %v1606_v19 = vpop.permute.xlu1 %1605  ;;  %14051 = vmatprep.subr.mxu1 %v14457_v0 }
  0xc3   : > { %14049 = vmatmul.mubr.msk.f32.vlgmr.msra.gmra.mxu1 %vm241_vm3, %v13474_v16  ;;  %13477 = vmatmul.mubr.msk.f32.vlgmr.msra.gmra.mxu0 %vm241_vm3, %v13474_v16  ;;  %v14835_v25 = vsel %vm1611_vm7, %v1604_v18, %v1606_v19  ;;  %v13516_v16 = vld [vmem:[%s16999_s2 + $0x70] sm:$0xff]  ;;  %v15015_v18 = vcombine.high %v14999_v13, %v14999_v13 }
  0xc4   : > { %4021 = vrot.lane.b32.xlu0 %v14579_v7, %s14470_s27  ;;  %14053 = vmatprep.mubr.msk.f32.mxu1 %vm14459_vm0, %v14457_v0 }
  0xc5   : > { %4023 = vrot.lane.b32.xlu1 %v14585_v8, %s14470_s27  ;;  %1688 = vmatprep.mubr.f32.mxu0 %v14457_v0 }
  0xc6   : > { %v1608_v20 = vpop.permute.xlu0 %1607  ;;  %v1610_v21 = vpop.permute.xlu1 %1609 }
  0xc7   : > { %v14822_v22 = vsel %vm1611_vm7, %v1608_v20, %v1610_v21  ;;  %v14825_v23 = vsel %vm1611_vm7, %v1606_v19, %v1608_v20 }
  0xc8   : > { %4188 = vrot.lane.b32.xlu0 %v14555_v2, %s14470_s27  ;;  %13481 = vmatprep.subr.msk.mxu0 %vm245_vm2, %v14825_v23 }
  0xc9   : > { %4190 = vrot.lane.b32.xlu1 %v14570_v5, %s14470_s27  ;;  %14052 = vmatpush3.msk.msra.mxu1 %vm245_vm2, %v14822_v22 }
  0xca   : > { %13482 = vmatpush1.msk.msra.mxu0 %vm245_vm2, %v14835_v25  ;;  %v1775_v26 = vpop.permute.xlu0 %1774  ;;  %v1777_v27 = vpop.permute.xlu1 %1776  ;;  %14056 = vmatprep.subr.mxu1 %v14457_v0 }
  0xcb   : > { %14054 = vmatmul.mubr.msk.f32.vlgmr.msra.gmra.mxu1 %vm241_vm3, %v13480_v24  ;;  %13483 = vmatmul.mubr.msk.f32.vlgmr.msra.gmra.mxu0 %vm241_vm3, %v13480_v24  ;;  %v14867_v33 = vsel %vm1611_vm7, %v1775_v26, %v1777_v27 }
  0xcc   : > { %4192 = vrot.lane.b32.xlu0 %v14552_v1, %s14470_s27  ;;  %14058 = vmatprep.mubr.msk.f32.mxu1 %vm14459_vm0, %v14457_v0 }
  0xcd   : > { %4194 = vrot.lane.b32.xlu1 %v14560_v3, %s14470_s27  ;;  %1858 = vmatprep.mubr.f32.mxu0 %v14457_v0  ;;  %s14482_s27 = smov 84  }
  0xce   : > { %v1779_v28 = vpop.permute.xlu0 %1778  ;;  %v1781_v29 = vpop.permute.xlu1 %1780 }
  0xcf   : > { %v14854_v30 = vsel %vm1611_vm7, %v1779_v28, %v1781_v29  ;;  %v14857_v31 = vsel %vm1611_vm7, %v1777_v27, %v1779_v28  ;;  %v13522_v28 = vld [vmem:[%s16999_s2 + $0x78] sm:$0xff]  ;;  %vm6738_vm7 = vcmask 818176  }
  0xd0   : > { %4362 = vrot.lane.b32.xlu0 %v14564_v4, %s14471_s6  ;;  %13487 = vmatprep.subr.msk.mxu0 %vm245_vm2, %v14857_v31 }
  0xd1   : > { %4364 = vrot.lane.b32.xlu1 %v14576_v6, %s14471_s6  ;;  %14057 = vmatpush3.msk.msra.mxu1 %vm245_vm2, %v14854_v30 }
  0xd2   : > { %13488 = vmatpush1.msk.msra.mxu0 %vm245_vm2, %v14867_v33  ;;  %v1949_v34 = vpop.permute.xlu0 %1948  ;;  %v1951_v35 = vpop.permute.xlu1 %1950  ;;  %14061 = vmatprep.subr.mxu1 %v14457_v0 }
  0xd3   : > { %14059 = vmatmul.mubr.msk.f32.vlgmr.msra.gmra.mxu1 %vm241_vm3, %v13486_v32  ;;  %13489 = vmatmul.mubr.msk.f32.vlgmr.msra.gmra.mxu0 %vm241_vm3, %v13486_v32  ;;  %v1957_v41 = vsel %vm1956_vm8, %v1949_v34, %v1951_v35 }
  0xd4   : > { %4366 = vrot.lane.b32.xlu0 %v14579_v7, %s14471_s6  ;;  %14063 = vmatprep.mubr.msk.f32.mxu1 %vm14459_vm0, %v14457_v0 }
  0xd5   : > { %4368 = vrot.lane.b32.xlu1 %v14585_v8, %s14471_s6  ;;  %2033 = vmatprep.mubr.f32.mxu0 %v14457_v0 }
  0xd6   : > { %v1953_v36 = vpop.permute.xlu0 %1952  ;;  %v1955_v37 = vpop.permute.xlu1 %1954 }
  0xd7   : > { %v1959_v38 = vsel %vm1956_vm8, %v1953_v36, %v1955_v37  ;;  %v1958_v39 = vsel %vm1956_vm8, %v1951_v35, %v1953_v36 }
  0xd8   : > { %4533 = vrot.lane.b32.xlu0 %v14555_v2, %s14471_s6  ;;  %13493 = vmatprep.subr.msk.mxu0 %vm245_vm2, %v1958_v39  ;;  %v13528_v39 = vld [vmem:[%s16999_s2 + $0x80] sm:$0xff] }
  0xd9   : > { %4535 = vrot.lane.b32.xlu1 %v14570_v5, %s14471_s6  ;;  %14062 = vmatpush3.msk.msra.mxu1 %vm245_vm2, %v1959_v38 }
  0xda   : > { %13494 = vmatpush1.msk.msra.mxu0 %vm245_vm2, %v1957_v41  ;;  %v2120_v42 = vpop.permute.xlu0 %2119  ;;  %v2122_v43 = vpop.permute.xlu1 %2121  ;;  %14066 = vmatprep.subr.mxu1 %v14457_v0 }
  0xdb   : > { %14064 = vmatmul.mubr.msk.f32.vlgmr.msra.gmra.mxu1 %vm241_vm3, %v13492_v40  ;;  %13495 = vmatmul.mubr.msk.f32.vlgmr.msra.gmra.mxu0 %vm241_vm3, %v13492_v40  ;;  %v2127_v49 = vsel %vm1956_vm8, %v2120_v42, %v2122_v43 }
  0xdc   : > { %4537 = vrot.lane.b32.xlu0 %v14552_v1, %s14471_s6  ;;  %14068 = vmatprep.mubr.msk.f32.mxu1 %vm14459_vm0, %v14457_v0 }
  0xdd   : > { %4539 = vrot.lane.b32.xlu1 %v14560_v3, %s14471_s6  ;;  %2203 = vmatprep.mubr.f32.mxu0 %v14457_v0  ;;  %s14483_s6 = smov 81  }
  0xde   : > { %v2124_v44 = vpop.permute.xlu0 %2123  ;;  %v2126_v45 = vpop.permute.xlu1 %2125 }
  0xdf   : > { %v2129_v46 = vsel %vm1956_vm8, %v2124_v44, %v2126_v45  ;;  %v2128_v47 = vsel %vm1956_vm8, %v2122_v43, %v2124_v44  ;;  %vm7083_vm8 = vcmask 793600  }
  0xe0   : > { %5005 = vrot.lane.b32.xlu0 %v14564_v4, %s14472_s11  ;;  %13499 = vmatprep.subr.msk.mxu0 %vm245_vm2, %v2128_v47  ;;  %v13534_v47 = vld [vmem:[%s16999_s2 + $0x88] sm:$0xff] }
  0xe1   : > { %5007 = vrot.lane.b32.xlu1 %v14576_v6, %s14472_s11  ;;  %14067 = vmatpush3.msk.msra.mxu1 %vm245_vm2, %v2129_v46 }
  0xe2   : > { %13500 = vmatpush1.msk.msra.mxu0 %vm245_vm2, %v2127_v49  ;;  %v2294_v50 = vpop.permute.xlu0 %2293  ;;  %v2296_v51 = vpop.permute.xlu1 %2295  ;;  %14071 = vmatprep.subr.mxu1 %v14457_v0 }
  0xe3   : > { %14069 = vmatmul.mubr.msk.f32.vlgmr.msra.gmra.mxu1 %vm241_vm3, %v13498_v48  ;;  %13501 = vmatmul.mubr.msk.f32.vlgmr.msra.gmra.mxu0 %vm241_vm3, %v13498_v48 }
  0xe4   : > { %5009 = vrot.lane.b32.xlu0 %v14579_v7, %s14472_s11  ;;  %14073 = vmatprep.mubr.msk.f32.mxu1 %vm14459_vm0, %v14457_v0  ;;  %v13504_v7 = vld [vmem:[%s16999_s2 + $0x60] sm:$0xff] }
  0xe5   : > { %5011 = vrot.lane.b32.xlu1 %v14585_v8, %s14472_s11  ;;  %2378 = vmatprep.mubr.f32.mxu0 %v14457_v0  ;;  %v2302_v8 = vsel %vm2301_vm9, %v2294_v50, %v2296_v51 }
  0xe6   : > { %v2298_v4 = vpop.permute.xlu0 %2297  ;;  %v2300_v6 = vpop.permute.xlu1 %2299 }
  0xe7   : > { %v2304_v52 = vsel %vm2301_vm9, %v2298_v4, %v2300_v6  ;;  %v2303_v53 = vsel %vm2301_vm9, %v2296_v51, %v2298_v4 }
  0xe8   : > { %5176 = vrot.lane.b32.xlu0 %v14555_v2, %s14472_s11  ;;  %13505 = vmatprep.subr.msk.mxu0 %vm245_vm2, %v2303_v53  ;;  %v14946_v2 = vld [vmem:[%s14549_s23 + $0x4] sm:$0xff]  ;;  %v13540_v53 = vld [vmem:[%s16999_s2 + $0x90] sm:$0xff] }
  0xe9   : > { %5178 = vrot.lane.b32.xlu1 %v14570_v5, %s14472_s11  ;;  %14072 = vmatpush3.msk.msra.mxu1 %vm245_vm2, %v2304_v52  ;;  %v14958_v5 = vcombine.high %v14946_v2, %v14946_v2 }
  0xea   : > { %13506 = vmatpush1.msk.msra.mxu0 %vm245_vm2, %v2302_v8  ;;  %v2465_v54 = vpop.permute.xlu0 %2464  ;;  %v2467_v55 = vpop.permute.xlu1 %2466  ;;  %14076 = vmatprep.subr.mxu1 %v14457_v0 }
  0xeb   : > { %14074 = vmatmul.mubr.msk.f32.vlgmr.msra.gmra.mxu1 %vm241_vm3, %v13504_v7  ;;  %13507 = vmatmul.mubr.msk.f32.vlgmr.msra.gmra.mxu0 %vm241_vm3, %v13504_v7  ;;  %v2472_v60 = vsel %vm2301_vm9, %v2465_v54, %v2467_v55  ;;  %v15112_v54 = vld [vmem:[%s14549_s23] sm:$0xff] }
  0xec   : > { %5180 = vrot.lane.b32.xlu0 %v14552_v1, %s14472_s11  ;;  %14078 = vmatprep.mubr.msk.f32.mxu1 %vm14459_vm0, %v14457_v0 }
  0xed   : > { %5182 = vrot.lane.b32.xlu1 %v14560_v3, %s14472_s11  ;;  %2548 = vmatprep.mubr.f32.mxu0 %v14457_v0  ;;  %v13510_v3 = vld [vmem:[%s16999_s2 + $0x68] sm:$0xff]  ;;  %s14480_s11 = smov 25  }
  0xee   : > { %v2469_v56 = vpop.permute.xlu0 %2468  ;;  %v2471_v57 = vpop.permute.xlu1 %2470 }
  0xef   : > { %v2474_v59 = vsel %vm2301_vm9, %v2469_v56, %v2471_v57  ;;  %v2473_v1 = vsel %vm2301_vm9, %v2467_v55, %v2469_v56  ;;  %v15124_v56 = vcombine.high %v15112_v54, %v15112_v54  ;;  %vm7428_vm9 = vcmask 252928  }
  0xf0   : > { %5350 = vrot.lane.b32.xlu0 %v14946_v2, %s14473_s18  ;;  %13511 = vmatprep.subr.msk.mxu0 %vm245_vm2, %v2473_v1 }
  0xf1   : > { %5352 = vrot.lane.b32.xlu1 %v14958_v5, %s14473_s18  ;;  %14077 = vmatpush3.msk.msra.mxu1 %vm245_vm2, %v2474_v59  ;;  %v15128_v59 = vld [vmem:[%s14549_s23 + $0x8] sm:$0xff] }
  0xf2   : > { %13512 = vmatpush1.msk.msra.mxu0 %vm245_vm2, %v2472_v60  ;;  %v2639_v62 = vpop.permute.xlu0 %2638  ;;  %v2641_v63 = vpop.permute.xlu1 %2640  ;;  %14081 = vmatprep.subr.mxu1 %v14457_v0 }
  0xf3   : > { %14079 = vmatmul.mubr.msk.f32.vlgmr.msra.gmra.mxu1 %vm241_vm3, %v13510_v3  ;;  %13513 = vmatmul.mubr.msk.f32.vlgmr.msra.gmra.mxu0 %vm241_vm3, %v13510_v3  ;;  %v2646_v17 = vsel %vm241_vm3, %v2639_v62, %v2641_v63  ;;  %v13546_v62 = vld [vmem:[%s16999_s2 + $0x98] sm:$0xff] }
  0xf4   : > { %5354 = vrot.lane.b32.xlu0 %v14962_v58, %s14473_s18  ;;  %14083 = vmatprep.mubr.msk.f32.mxu1 %vm14459_vm0, %v14457_v0 }
  0xf5   : > { %5356 = vrot.lane.b32.xlu1 %v14978_v61, %s14473_s18  ;;  %2722 = vmatprep.mubr.f32.mxu0 %v14457_v0 }
  0xf6   : > { %v2643_v11 = vpop.permute.xlu0 %2642  ;;  %v2645_v12 = vpop.permute.xlu1 %2644 }
  0xf7   : > { %v2648_v14 = vsel %vm241_vm3, %v2643_v11, %v2645_v12  ;;  %v2647_v15 = vsel %vm241_vm3, %v2641_v63, %v2643_v11  ;;  %v15144_v11 = vcombine.high %v15128_v59, %v15128_v59 }
  0xf8   : > { %5521 = vrot.lane.b32.xlu0 %v14983_v9, %s14473_s18  ;;  %13517 = vmatprep.subr.msk.mxu0 %vm245_vm2, %v2647_v15 }
  0xf9   : > { %5523 = vrot.lane.b32.xlu1 %v14995_v10, %s14473_s18  ;;  %14082 = vmatpush3.msk.msra.mxu1 %vm245_vm2, %v2648_v14  ;;  %v15149_v14 = vld [vmem:[%s14544_s20] sm:$0xff] }
  0xfa   : > { %13518 = vmatpush1.msk.msra.mxu0 %vm245_vm2, %v2646_v17  ;;  %v2809_v19 = vpop.permute.xlu0 %2808  ;;  %14086 = vmatprep.subr.mxu1 %v14457_v0 }
  0xfb   : > { %v2811_v20 = vpop.permute.xlu1 %2810  ;;  %14084 = vmatmul.mubr.msk.f32.vlgmr.msra.gmra.mxu1 %vm241_vm3, %v13516_v16  ;;  %13519 = vmatmul.mubr.msk.f32.vlgmr.msra.gmra.mxu0 %vm241_vm3, %v13516_v16  ;;  %v15161_v16 = vcombine.high %v15149_v14, %v15149_v14 }
  0xfc   : > { %5525 = vrot.lane.b32.xlu0 %v14999_v13, %s14473_s18  ;;  %14088 = vmatprep.mubr.msk.f32.mxu1 %vm14459_vm0, %v14457_v0  ;;  %v2816_v29 = vsel %vm241_vm3, %v2809_v19, %v2811_v20  ;;  %v15165_v19 = vld [vmem:[%s14544_s20 + $0x8] sm:$0xff] }
  0xfd   : > { %5527 = vrot.lane.b32.xlu1 %v15015_v18, %s14473_s18  ;;  %2892 = vmatprep.mubr.f32.mxu0 %v14457_v0  ;;  %s14485_s18 = smov 120  }
  0xfe   : > { %v2813_v21 = vpop.permute.xlu0 %2812 }
  0xff   : > { %v2815_v24 = vpop.permute.xlu1 %2814  ;;  %v2817_v26 = vsel %vm241_vm3, %v2811_v20, %v2813_v21 }
 0x100   : > { %v2818_v27 = vsel %vm241_vm3, %v2813_v21, %v2815_v24  ;;  %5695 = vrot.lane.b32.xlu0 %v14946_v2, %s14474_s25  ;;  %13523 = vmatprep.subr.msk.mxu0 %vm245_vm2, %v2817_v26  ;;  %v13552_v26 = vld [vmem:[%s16999_s2 + $0xa0] sm:$0xff] }
 0x101   : > { %5697 = vrot.lane.b32.xlu1 %v14958_v5, %s14474_s25  ;;  %14087 = vmatpush3.msk.msra.mxu1 %vm245_vm2, %v2818_v27 }
 0x102   : > { %13524 = vmatpush1.msk.msra.mxu0 %vm245_vm2, %v2816_v29  ;;  %v2983_v32 = vpop.permute.xlu0 %2982  ;;  %14091 = vmatprep.subr.mxu1 %v14457_v0 }
 0x103   : > { %v2985_v34 = vpop.permute.xlu1 %2984  ;;  %14089 = vmatmul.mubr.msk.f32.vlgmr.msra.gmra.mxu1 %vm241_vm3, %v13522_v28  ;;  %13525 = vmatmul.mubr.msk.f32.vlgmr.msra.gmra.mxu0 %vm241_vm3, %v13522_v28  ;;  %v15181_v28 = vcombine.high %v15165_v19, %v15165_v19 }
 0x104   : > { %5699 = vrot.lane.b32.xlu0 %v14962_v58, %s14474_s25  ;;  %14093 = vmatprep.mubr.msk.f32.mxu1 %vm14459_vm0, %v14457_v0  ;;  %v2991_v40 = vsel %vm2990_vm10, %v2983_v32, %v2985_v34 }
 0x105   : > { %5701 = vrot.lane.b32.xlu1 %v14978_v61, %s14474_s25  ;;  %3067 = vmatprep.mubr.f32.mxu0 %v14457_v0 }
 0x106   : > { %v2987_v35 = vpop.permute.xlu0 %2986 }
 0x107   : > { %v2989_v36 = vpop.permute.xlu1 %2988  ;;  %v2992_v37 = vsel %vm2990_vm10, %v2985_v34, %v2987_v35 }
 0x108   : > { %v2993_v38 = vsel %vm2990_vm10, %v2987_v35, %v2989_v36  ;;  %5866 = vrot.lane.b32.xlu0 %v14983_v9, %s14474_s25  ;;  %13529 = vmatprep.subr.msk.mxu0 %vm245_vm2, %v2992_v37 }
 0x109   : > { %5868 = vrot.lane.b32.xlu1 %v14995_v10, %s14474_s25  ;;  %14092 = vmatpush3.msk.msra.mxu1 %vm245_vm2, %v2993_v38  ;;  %v13558_v38 = vld [vmem:[%s16999_s2 + $0xa8] sm:$0xff] }
 0x10a   : > { %13530 = vmatpush1.msk.msra.mxu0 %vm245_vm2, %v2991_v40  ;;  %v3154_v41 = vpop.permute.xlu0 %3153  ;;  %14096 = vmatprep.subr.mxu1 %v14457_v0 }
 0x10b   : > { %v3156_v42 = vpop.permute.xlu1 %3155  ;;  %14094 = vmatmul.mubr.msk.f32.vlgmr.msra.gmra.mxu1 %vm241_vm3, %v13528_v39  ;;  %13531 = vmatmul.mubr.msk.f32.vlgmr.msra.gmra.mxu0 %vm241_vm3, %v13528_v39 }
 0x10c   : > { %5870 = vrot.lane.b32.xlu0 %v14999_v13, %s14474_s25  ;;  %14098 = vmatprep.mubr.msk.f32.mxu1 %vm14459_vm0, %v14457_v0  ;;  %v3161_v48 = vsel %vm2990_vm10, %v3154_v41, %v3156_v42 }
 0x10d   : > { %5872 = vrot.lane.b32.xlu1 %v15015_v18, %s14474_s25  ;;  %3237 = vmatprep.mubr.f32.mxu0 %v14457_v0  ;;  %s14486_s25 = smov 32  }
 0x10e   : > { %v3158_v43 = vpop.permute.xlu0 %3157 }
 0x10f   : > { %v3160_v44 = vpop.permute.xlu1 %3159  ;;  %v3162_v45 = vsel %vm2990_vm10, %v3156_v42, %v3158_v43 }
 0x110   : > { %v3163_v46 = vsel %vm2990_vm10, %v3158_v43, %v3160_v44  ;;  %6040 = vrot.lane.b32.xlu0 %v14946_v2, %s14475_s30  ;;  %13535 = vmatprep.subr.msk.mxu0 %vm245_vm2, %v3162_v45  ;;  %vm8071_vm10 = vcmask 203776  }
 0x111   : > { %6042 = vrot.lane.b32.xlu1 %v14958_v5, %s14475_s30  ;;  %14097 = vmatpush3.msk.msra.mxu1 %vm245_vm2, %v3163_v46  ;;  %v13564_v46 = vld [vmem:[%s16999_s2 + $0xb0] sm:$0xff] }
 0x112   : > { %13536 = vmatpush1.msk.msra.mxu0 %vm245_vm2, %v3161_v48  ;;  %v3328_v49 = vpop.permute.xlu0 %3327  ;;  %14101 = vmatprep.subr.mxu1 %v14457_v0 }
 0x113   : > { %v3330_v50 = vpop.permute.xlu1 %3329  ;;  %14099 = vmatmul.mubr.msk.f32.vlgmr.msra.gmra.mxu1 %vm241_vm3, %v13534_v47  ;;  %13537 = vmatmul.mubr.msk.f32.vlgmr.msra.gmra.mxu0 %vm241_vm3, %v13534_v47 }
 0x114   : > { %6044 = vrot.lane.b32.xlu0 %v14962_v58, %s14475_s30  ;;  %14103 = vmatprep.mubr.msk.f32.mxu1 %vm14459_vm0, %v14457_v0  ;;  %v3336_v7 = vsel %vm3335_vm11, %v3328_v49, %v3330_v50 }
 0x115   : > { %6046 = vrot.lane.b32.xlu1 %v14978_v61, %s14475_s30  ;;  %3412 = vmatprep.mubr.f32.mxu0 %v14457_v0 }
 0x116   : > { %v3332_v51 = vpop.permute.xlu0 %3331 }
 0x117   : > { %v3334_v4 = vpop.permute.xlu1 %3333  ;;  %v3337_v6 = vsel %vm3335_vm11, %v3330_v50, %v3332_v51 }
 0x118   : > { %v3338_v52 = vsel %vm3335_vm11, %v3332_v51, %v3334_v4  ;;  %6211 = vrot.lane.b32.xlu0 %v14983_v9, %s14475_s30  ;;  %13541 = vmatprep.subr.msk.mxu0 %vm245_vm2, %v3337_v6 }
 0x119   : > { %6213 = vrot.lane.b32.xlu1 %v14995_v10, %s14475_s30  ;;  %14102 = vmatpush3.msk.msra.mxu1 %vm245_vm2, %v3338_v52  ;;  %v13570_v52 = vld [vmem:[%s16999_s2 + $0xb8] sm:$0xff] }
 0x11a   : > { %13542 = vmatpush1.msk.msra.mxu0 %vm245_vm2, %v3336_v7  ;;  %v3499_v8 = vpop.permute.xlu0 %3498  ;;  %14106 = vmatprep.subr.mxu1 %v14457_v0 }
 0x11b   : > { %v3501_v55 = vpop.permute.xlu1 %3500  ;;  %14104 = vmatmul.mubr.msk.f32.vlgmr.msra.gmra.mxu1 %vm241_vm3, %v13540_v53  ;;  %13543 = vmatmul.mubr.msk.f32.vlgmr.msra.gmra.mxu0 %vm241_vm3, %v13540_v53 }
 0x11c   : > { %6215 = vrot.lane.b32.xlu0 %v14999_v13, %s14475_s30  ;;  %14108 = vmatprep.mubr.msk.f32.mxu1 %vm14459_vm0, %v14457_v0  ;;  %v3506_v63 = vsel %vm3335_vm11, %v3499_v8, %v3501_v55 }
 0x11d   : > { %6217 = vrot.lane.b32.xlu1 %v15015_v18, %s14475_s30  ;;  %3582 = vmatprep.mubr.f32.mxu0 %v14457_v0  ;;  %s14479_s30 = smov 31  }
 0x11e   : > { %v3503_v57 = vpop.permute.xlu0 %3502 }
 0x11f   : > { %v3505_v1 = vpop.permute.xlu1 %3504  ;;  %v3507_v3 = vsel %vm3335_vm11, %v3501_v55, %v3503_v57 }
 0x120   : > { %v3508_v60 = vsel %vm3335_vm11, %v3503_v57, %v3505_v1  ;;  %6385 = vrot.lane.b32.xlu0 %v15112_v54, %s14476_s9  ;;  %13547 = vmatprep.subr.msk.mxu0 %vm245_vm2, %v3507_v3  ;;  %v13576_v3 = vld [vmem:[%s16999_s2 + $0xc0] sm:$0xff]  ;;  %vm8416_vm11 = vcmask 711680  }
 0x121   : > { %6387 = vrot.lane.b32.xlu1 %v15124_v56, %s14476_s9  ;;  %14107 = vmatpush3.msk.msra.mxu1 %vm245_vm2, %v3508_v60 }
 0x122   : > { %13548 = vmatpush1.msk.msra.mxu0 %vm245_vm2, %v3506_v63  ;;  %v3673_v12 = vpop.permute.xlu0 %3672  ;;  %14111 = vmatprep.subr.mxu1 %v14457_v0 }
 0x123   : > { %v3675_v15 = vpop.permute.xlu1 %3674  ;;  %14109 = vmatmul.mubr.msk.f32.vlgmr.msra.gmra.mxu1 %vm241_vm3, %v13546_v62  ;;  %13549 = vmatmul.mubr.msk.f32.vlgmr.msra.gmra.mxu0 %vm241_vm3, %v13546_v62 }
 0x124   : > { %6389 = vrot.lane.b32.xlu0 %v15128_v59, %s14476_s9  ;;  %14113 = vmatprep.mubr.msk.f32.mxu1 %vm14459_vm0, %v14457_v0  ;;  %v3681_v27 = vsel %vm3680_vm12, %v3673_v12, %v3675_v15 }
 0x125   : > { %6391 = vrot.lane.b32.xlu1 %v15144_v11, %s14476_s9  ;;  %3757 = vmatprep.mubr.f32.mxu0 %v14457_v0 }
 0x126   : > { %v3677_v17 = vpop.permute.xlu0 %3676 }
 0x127   : > { %v3679_v20 = vpop.permute.xlu1 %3678  ;;  %v3682_v21 = vsel %vm3680_vm12, %v3675_v15, %v3677_v17 }
 0x128   : > { %v3683_v24 = vsel %vm3680_vm12, %v3677_v17, %v3679_v20  ;;  %6556 = vrot.lane.b32.xlu0 %v15149_v14, %s14476_s9  ;;  %13553 = vmatprep.subr.msk.mxu0 %vm245_vm2, %v3682_v21  ;;  %v13582_v21 = vld [vmem:[%s16999_s2 + $0xc8] sm:$0xff] }
 0x129   : > { %6558 = vrot.lane.b32.xlu1 %v15161_v16, %s14476_s9  ;;  %14112 = vmatpush3.msk.msra.mxu1 %vm245_vm2, %v3683_v24 }
 0x12a   : > { %13554 = vmatpush1.msk.msra.mxu0 %vm245_vm2, %v3681_v27  ;;  %v3844_v29 = vpop.permute.xlu0 %3843  ;;  %14116 = vmatprep.subr.mxu1 %v14457_v0 }
 0x12b   : > { %v3846_v32 = vpop.permute.xlu1 %3845  ;;  %14114 = vmatmul.mubr.msk.f32.vlgmr.msra.gmra.mxu1 %vm241_vm3, %v13552_v26  ;;  %13555 = vmatmul.mubr.msk.f32.vlgmr.msra.gmra.mxu0 %vm241_vm3, %v13552_v26 }
 0x12c   : > { %6560 = vrot.lane.b32.xlu0 %v15165_v19, %s14476_s9  ;;  %14118 = vmatprep.mubr.msk.f32.mxu1 %vm14459_vm0, %v14457_v0  ;;  %v3851_v39 = vsel %vm3680_vm12, %v3844_v29, %v3846_v32 }
 0x12d   : > { %6562 = vrot.lane.b32.xlu1 %v15181_v28, %s14476_s9  ;;  %3927 = vmatprep.mubr.f32.mxu0 %v14457_v0  ;;  %s13866_s9 = sshll.u32 %s17003_s16, 7  ;;  %s14493_s16 = smov 80  }
 0x12e   : > { %v3848_v34 = vpop.permute.xlu0 %3847  ;;  %s16341_s12 = scalar_lea.vmem %s17001_s4, %s13866_s9 }
 0x12f   : > { %v3850_v35 = vpop.permute.xlu1 %3849  ;;  %v3852_v36 = vsel %vm3680_vm12, %v3846_v32, %v3848_v34  ;;  %v13588_v32 = vld [vmem:[%s16999_s2 + $0xd0] sm:$0xff] }
 0x130   : > { %v3853_v37 = vsel %vm3680_vm12, %v3848_v34, %v3850_v35  ;;  %6730 = vrot.lane.b32.xlu0 %v15112_v54, %s14477_s14  ;;  %13559 = vmatprep.subr.msk.mxu0 %vm245_vm2, %v3852_v36  ;;  %vm8761_vm12 = vcmask 687104  }
 0x131   : > { %6732 = vrot.lane.b32.xlu1 %v15124_v56, %s14477_s14  ;;  %14117 = vmatpush3.msk.msra.mxu1 %vm245_vm2, %v3853_v37  ;;  %v13594_v37 = vld [vmem:[%s16999_s2 + $0xd8] sm:$0xff] }
 0x132   : > { %13560 = vmatpush1.msk.msra.mxu0 %vm245_vm2, %v3851_v39  ;;  %v4018_v40 = vpop.permute.xlu0 %4017  ;;  %14121 = vmatprep.subr.mxu1 %v14457_v0 }
 0x133   : > { %v4020_v41 = vpop.permute.xlu1 %4019  ;;  %14119 = vmatmul.mubr.msk.f32.vlgmr.msra.gmra.mxu1 %vm241_vm3, %v13558_v38  ;;  %13561 = vmatmul.mubr.msk.f32.vlgmr.msra.gmra.mxu0 %vm241_vm3, %v13558_v38 }
 0x134   : > { %6734 = vrot.lane.b32.xlu0 %v15128_v59, %s14477_s14  ;;  %14123 = vmatprep.mubr.msk.f32.mxu1 %vm14459_vm0, %v14457_v0  ;;  %v4026_v47 = vsel %vm4025_vm13, %v4018_v40, %v4020_v41 }
 0x135   : > { %6736 = vrot.lane.b32.xlu1 %v15144_v11, %s14477_s14  ;;  %4102 = vmatprep.mubr.f32.mxu0 %v14457_v0 }
 0x136   : > { %v4022_v42 = vpop.permute.xlu0 %4021 }
 0x137   : > { %v4024_v43 = vpop.permute.xlu1 %4023  ;;  %v4027_v44 = vsel %vm4025_vm13, %v4020_v41, %v4022_v42 }
 0x138   : > { %v4028_v45 = vsel %vm4025_vm13, %v4022_v42, %v4024_v43  ;;  %6901 = vrot.lane.b32.xlu0 %v15149_v14, %s14477_s14  ;;  %13565 = vmatprep.subr.msk.mxu0 %vm245_vm2, %v4027_v44 }
 0x139   : > { %6903 = vrot.lane.b32.xlu1 %v15161_v16, %s14477_s14  ;;  %14122 = vmatpush3.msk.msra.mxu1 %vm245_vm2, %v4028_v45 }
 0x13a   : > { %13566 = vmatpush1.msk.msra.mxu0 %vm245_vm2, %v4026_v47  ;;  %v4189_v48 = vpop.permute.xlu0 %4188  ;;  %14126 = vmatprep.subr.mxu1 %v14457_v0 }
 0x13b   : > { %v4191_v49 = vpop.permute.xlu1 %4190  ;;  %14124 = vmatmul.mubr.msk.f32.vlgmr.msra.gmra.mxu1 %vm241_vm3, %v13564_v46  ;;  %13567 = vmatmul.mubr.msk.f32.vlgmr.msra.gmra.mxu0 %vm241_vm3, %v13564_v46  ;;  %v13600_v46 = vld [vmem:[%s16999_s2 + $0xe0] sm:$0xff] }
 0x13c   : > { %6905 = vrot.lane.b32.xlu0 %v15165_v19, %s14477_s14  ;;  %14128 = vmatprep.mubr.msk.f32.mxu1 %vm14459_vm0, %v14457_v0  ;;  %v4196_v53 = vsel %vm4025_vm13, %v4189_v48, %v4191_v49 }
 0x13d   : > { %6907 = vrot.lane.b32.xlu1 %v15181_v28, %s14477_s14  ;;  %4272 = vmatprep.mubr.f32.mxu0 %v14457_v0  ;;  %s14496_s14 = smov 8  }
 0x13e   : > { %v4193_v50 = vpop.permute.xlu0 %4192 }
 0x13f   : > { %v4195_v51 = vpop.permute.xlu1 %4194  ;;  %v4197_v4 = vsel %vm4025_vm13, %v4191_v49, %v4193_v50 }
 0x140   : > { %v4198_v6 = vsel %vm4025_vm13, %v4193_v50, %v4195_v51  ;;  %7075 = vrot.lane.b32.xlu0 %v15112_v54, %s14478_s22  ;;  %13571 = vmatprep.subr.msk.mxu0 %vm245_vm2, %v4197_v4  ;;  %vm9106_vm13 = vcmask 662528  }
 0x141   : > { %7077 = vrot.lane.b32.xlu1 %v15124_v56, %s14478_s22  ;;  %14127 = vmatpush3.msk.msra.mxu1 %vm245_vm2, %v4198_v6 }
 0x142   : > { %13572 = vmatpush1.msk.msra.mxu0 %vm245_vm2, %v4196_v53  ;;  %v4363_v7 = vpop.permute.xlu0 %4362  ;;  %14131 = vmatprep.subr.mxu1 %v14457_v0  ;;  %v13606_v53 = vld [vmem:[%s16999_s2 + $0xe8] sm:$0xff] }
 0x143   : > { %v4365_v8 = vpop.permute.xlu1 %4364  ;;  %14129 = vmatmul.mubr.msk.f32.vlgmr.msra.gmra.mxu1 %vm241_vm3, %v13570_v52  ;;  %13573 = vmatmul.mubr.msk.f32.vlgmr.msra.gmra.mxu0 %vm241_vm3, %v13570_v52 }
 0x144   : > { %7079 = vrot.lane.b32.xlu0 %v15128_v59, %s14478_s22  ;;  %14133 = vmatprep.mubr.msk.f32.mxu1 %vm14459_vm0, %v14457_v0  ;;  %v4371_v62 = vsel %vm4370_vm14, %v4363_v7, %v4365_v8 }
 0x145   : > { %7081 = vrot.lane.b32.xlu1 %v15144_v11, %s14478_s22  ;;  %4447 = vmatprep.mubr.f32.mxu0 %v14457_v0 }
 0x146   : > { %v4367_v55 = vpop.permute.xlu0 %4366 }
 0x147   : > { %v4369_v57 = vpop.permute.xlu1 %4368  ;;  %v4372_v1 = vsel %vm4370_vm14, %v4365_v8, %v4367_v55 }
 0x148   : > { %v4373_v60 = vsel %vm4370_vm14, %v4367_v55, %v4369_v57  ;;  %7246 = vrot.lane.b32.xlu0 %v15149_v14, %s14478_s22  ;;  %13577 = vmatprep.subr.msk.mxu0 %vm245_vm2, %v4372_v1 }
 0x149   : > { %7248 = vrot.lane.b32.xlu1 %v15161_v16, %s14478_s22  ;;  %14132 = vmatpush3.msk.msra.mxu1 %vm245_vm2, %v4373_v60 }
 0x14a   : > { %13578 = vmatpush1.msk.msra.mxu0 %vm245_vm2, %v4371_v62  ;;  %v4534_v63 = vpop.permute.xlu0 %4533  ;;  %14134 = vmatmul.mubr.msk.f32.vlgmr.msra.gmra.mxu1 %vm241_vm3, %v13576_v3 }
 0x14b   : > { %v4536_v12 = vpop.permute.xlu1 %4535  ;;  %13579 = vmatmul.mubr.msk.f32.vlgmr.msra.gmra.mxu0 %vm241_vm3, %v13576_v3  ;;  %14136 = vmatprep.subr.mxu1 %v14457_v0 }
 0x14c   : > { %7250 = vrot.lane.b32.xlu0 %v15165_v19, %s14478_s22  ;;  %14138 = vmatprep.mubr.msk.f32.mxu1 %vm14459_vm0, %v14457_v0  ;;  %v4541_v26 = vsel %vm4370_vm14, %v4534_v63, %v4536_v12 }
 0x14d   : > { %7252 = vrot.lane.b32.xlu1 %v15181_v28, %s14478_s22  ;;  %4617 = vmatprep.mubr.f32.mxu0 %v14457_v0  ;;  %s14489_s22 = smov 60  }
 0x14e   : > { %v4538_v15 = vpop.permute.xlu0 %4537  ;;  %v318_v41 = vpop.f32.mrf.mxu0 }
 0x14f   : > { %v4540_v17 = vpop.permute.xlu1 %4539  ;;  %v4542_v20 = vsel %vm4370_vm14, %v4536_v12, %v4538_v15 }
 0x150   : > { %v4543_v24 = vsel %vm4370_vm14, %v4538_v15, %v4540_v17  ;;  %7420 = vrot.lane.b32.xlu0 %v15112_v54, %s14479_s30  ;;  %13583 = vmatprep.subr.msk.mxu0 %vm245_vm2, %v4542_v20  ;;  %v15345_v44 = vpop.f32.mrf.mxu0  ;;  %v13612_v15 = vld [vmem:[%s16999_s2 + $0xf0] sm:$0xff]  ;;  %vm9771_vm14 = vcmask 1014784  }
 0x151   : > { %7422 = vrot.lane.b32.xlu1 %v15124_v56, %s14479_s30  ;;  %14137 = vmatpush3.msk.msra.mxu1 %vm245_vm2, %v4543_v24 }
 0x152   : > { %13584 = vmatpush1.msk.msra.mxu0 %vm245_vm2, %v4541_v26  ;;  %14139 = vmatmul.mubr.msk.f32.vlgmr.msra.gmra.mxu1 %vm241_vm3, %v13582_v21  ;;  %v5006_v27 = vpop.permute.xlu0 %5005 }
 0x153   : > { %14141 = vmatprep.subr.mxu1 %v14457_v0  ;;  %13585 = vmatmul.mubr.msk.f32.vlgmr.msra.gmra.mxu0 %vm241_vm3, %v13582_v21  ;;  %v5008_v29 = vpop.permute.xlu1 %5007  ;;  %v483_v49 = vpop.f32.mrf.mxu0 }
 0x154   : > { %13589 = vmatprep.subr.msk.mxu0 %vm245_vm2, %v14825_v23  ;;  %14142 = vmatpush3.msk.msra.mxu1 %vm245_vm2, %v14822_v22  ;;  %v5014_v42 = vsel %vm5013_vm15, %v5006_v27, %v5008_v29  ;;  %v484_v51 = vadd.f32 %v483_v49, %v318_v41 }
 0x155   : > { %13590 = vmatpush1.msk.msra.mxu0 %vm245_vm2, %v14835_v25  ;;  %7424 = vrot.lane.b32.xlu0 %v15128_v59, %s14479_s30  ;;  %v15366_v6 = vpop.f32.mrf.mxu0 }
 0x156   : > { %7426 = vrot.lane.b32.xlu1 %v15144_v11, %s14479_s30  ;;  %14143 = vmatprep.mubr.msk.f32.mxu1 %vm14459_vm0, %v14457_v0  ;;  %v5010_v34 = vpop.permute.xlu0 %5009 }
 0x157   : > { %13595 = vmatprep.subr.msk.mxu0 %vm245_vm2, %v14857_v31  ;;  %14146 = vmatprep.subr.mxu1 %v14457_v0  ;;  %v5012_v35 = vpop.permute.xlu1 %5011  ;;  %v5015_v36 = vsel %vm5013_vm15, %v5008_v29, %v5010_v34 }
 0x158   : > { %4766 = vmatprep.mubr.f32.mxu0 %v14457_v0  ;;  %14144 = vmatmul.mubr.msk.f32.vlgmr.msra.gmra.mxu1 %vm241_vm3, %v13588_v32  ;;  %v5016_v39 = vsel %vm5013_vm15, %v5010_v34, %v5012_v35  ;;  %v13618_v34 = vld [vmem:[%s16999_s2 + $0xf8] sm:$0xff] }
 0x159   : > { %14147 = vmatpush3.msk.msra.mxu1 %vm245_vm2, %v14854_v30  ;;  %13591 = vmatmul.mubr.msk.f32.vlgmr.msra.gmra.mxu0 %vm241_vm3, %v13588_v32 }
 0x15a   : > { %13596 = vmatpush1.msk.msra.mxu0 %vm245_vm2, %v14867_v33  ;;  %7591 = vrot.lane.b32.xlu0 %v15149_v14, %s14479_s30  ;;  %v5177_v38 = vpop.permute.xlu0 %5176 }
 0x15b   : > { %7593 = vrot.lane.b32.xlu1 %v15161_v16, %s14479_s30  ;;  %14148 = vmatprep.mubr.msk.f32.mxu1 %vm14459_vm0, %v14457_v0  ;;  %v5179_v40 = vpop.permute.xlu1 %5178  ;;  %v655_v7 = vpop.f32.mrf.mxu0 }
 0x15c   : > { %13601 = vmatprep.subr.msk.mxu0 %vm245_vm2, %v5015_v36  ;;  %14151 = vmatprep.subr.mxu1 %v14457_v0  ;;  %v5184_v52 = vsel %vm5013_vm15, %v5177_v38, %v5179_v40  ;;  %v730_v55 = vadd.f32 %v655_v7, %v484_v51 }
 0x15d   : > { %4915 = vmatprep.mubr.f32.mxu0 %v14457_v0  ;;  %14149 = vmatmul.mubr.msk.f32.vlgmr.msra.gmra.mxu1 %vm241_vm3, %v13594_v37  ;;  %v15384_v3 = vpop.f32.mrf.mxu0 }
 0x15e   : > { %14152 = vmatpush3.msk.msra.mxu1 %vm245_vm2, %v5016_v39  ;;  %13597 = vmatmul.mubr.msk.f32.vlgmr.msra.gmra.mxu0 %vm241_vm3, %v13594_v37  ;;  %v5181_v43 = vpop.permute.xlu0 %5180 }
 0x15f   : > { %13602 = vmatpush1.msk.msra.mxu0 %vm245_vm2, %v5014_v42  ;;  %7595 = vrot.lane.b32.xlu0 %v15165_v19, %s14479_s30  ;;  %v5183_v45 = vpop.permute.xlu1 %5182  ;;  %v5185_v47 = vsel %vm5013_vm15, %v5179_v40, %v5181_v43 }
 0x160   : > { %7597 = vrot.lane.b32.xlu1 %v15181_v28, %s14479_s30  ;;  %v5186_v48 = vsel %vm5013_vm15, %v5181_v43, %v5183_v45  ;;  %14153 = vmatprep.mubr.msk.f32.mxu1 %vm14459_vm0, %v14457_v0  ;;  %s14487_s30 = smov 24   ;;  %vm10116_vm15 = vcmask 982016  }
 0x161   : > { %14156 = vmatprep.subr.mxu1 %v14457_v0  ;;  %5090 = vmatprep.mubr.f32.mxu0 %v14457_v0 }
 0x162   : > { %14154 = vmatmul.mubr.msk.f32.vlgmr.msra.gmra.mxu1 %vm241_vm3, %v13600_v46  ;;  %13607 = vmatprep.subr.msk.mxu0 %vm245_vm2, %v5185_v47  ;;  %v5351_v50 = vpop.permute.xlu0 %5350 }
 0x163   : > { %8063 = vrot.lane.b32.xlu0 %v15112_v54, %s14480_s11  ;;  %14157 = vmatpush3.msk.msra.mxu1 %vm245_vm2, %v5186_v48  ;;  %v5353_v4 = vpop.permute.xlu1 %5352  ;;  %v825_v63 = vpop.f32.mrf.mxu0 }
 0x164   : > { %8065 = vrot.lane.b32.xlu1 %v15124_v56, %s14480_s11  ;;  %13603 = vmatmul.mubr.msk.f32.vlgmr.msra.gmra.mxu0 %vm241_vm3, %v13600_v46  ;;  %v5359_v62 = vsel %vm5358_vm1, %v5351_v50, %v5353_v4  ;;  %v900_v17 = vadd.f32 %v825_v63, %v730_v55  ;;  %v13624_v46 = vld [vmem:[%s16999_s2 + $0x100] sm:$0xff]  ;;  %v13630_v55 = vld [vmem:[%s16999_s2 + $0x108] sm:$0xff] }
 0x165   : > { %13608 = vmatpush1.msk.msra.mxu0 %vm245_vm2, %v5184_v52  ;;  %14158 = vmatprep.mubr.msk.f32.mxu1 %vm14459_vm0, %v14457_v0  ;;  %v15402_v21 = vpop.f32.mrf.mxu0 }
 0x166   : > { %v5355_v8 = vpop.permute.xlu0 %5354  ;;  %14161 = vmatprep.subr.mxu1 %v14457_v0  ;;  %5260 = vmatprep.mubr.f32.mxu0 %v14457_v0 }
 0x167   : > { %8067 = vrot.lane.b32.xlu0 %v15128_v59, %s14480_s11  ;;  %v5357_v57 = vpop.permute.xlu1 %5356  ;;  %14159 = vmatmul.mubr.msk.f32.vlgmr.msra.gmra.mxu1 %vm241_vm3, %v13606_v53  ;;  %v5360_v1 = vsel %vm5358_vm1, %v5353_v4, %v5355_v8 }
 0x168   : > { %8069 = vrot.lane.b32.xlu1 %v15144_v11, %s14480_s11  ;;  %v5361_v60 = vsel %vm5358_vm1, %v5355_v8, %v5357_v57  ;;  %13613 = vmatprep.subr.msk.mxu0 %vm245_vm2, %v5360_v1 }
 0x169   : > { %14162 = vmatpush3.msk.msra.mxu1 %vm245_vm2, %v5361_v60  ;;  %13609 = vmatmul.mubr.msk.f32.vlgmr.msra.gmra.mxu0 %vm241_vm3, %v13606_v53 }
 0x16a   : > { %13614 = vmatpush1.msk.msra.mxu0 %vm245_vm2, %v5359_v62  ;;  %v5522_v12 = vpop.permute.xlu0 %5521  ;;  %14163 = vmatprep.mubr.msk.f32.mxu1 %vm14459_vm0, %v14457_v0 }
 0x16b   : > { %8234 = vrot.lane.b32.xlu0 %v15149_v14, %s14480_s11  ;;  %v5524_v20 = vpop.permute.xlu1 %5523  ;;  %14166 = vmatprep.subr.mxu1 %v14457_v0  ;;  %v1000_v24 = vpop.f32.mrf.mxu0 }
 0x16c   : > { %8236 = vrot.lane.b32.xlu1 %v15161_v16, %s14480_s11  ;;  %5435 = vmatprep.mubr.f32.mxu0 %v14457_v0  ;;  %v1075_v27 = vadd.f32 %v1000_v24, %v900_v17  ;;  %v5529_v36 = vsel %vm5358_vm1, %v5522_v12, %v5524_v20  ;;  %v13636_v24 = vld [vmem:[%s16999_s2 + $0x110] sm:$0xff] }
 0x16d   : > { %14164 = vmatmul.mubr.msk.f32.vlgmr.msra.gmra.mxu1 %vm241_vm3, %v13612_v15  ;;  %13615 = vmatmul.mubr.msk.f32.vlgmr.msra.gmra.mxu0 %vm241_vm3, %v13612_v15  ;;  %v15418_v35 = vpop.f32.mrf.mxu0 }
 0x16e   : > { %v5526_v26 = vpop.permute.xlu0 %5525  ;;  %14168 = vmatprep.mubr.msk.f32.mxu1 %vm14459_vm0, %v14457_v0  ;;  %5605 = vmatprep.mubr.f32.mxu0 %v14457_v0 }
 0x16f   : > { %8238 = vrot.lane.b32.xlu0 %v15165_v19, %s14480_s11  ;;  %v5528_v29 = vpop.permute.xlu1 %5527  ;;  %v5530_v32 = vsel %vm5358_vm1, %v5524_v20, %v5526_v26 }
 0x170   : > { %8240 = vrot.lane.b32.xlu1 %v15181_v28, %s14480_s11  ;;  %v5531_v37 = vsel %vm5358_vm1, %v5526_v26, %v5528_v29  ;;  %13619 = vmatprep.subr.msk.mxu0 %vm245_vm2, %v5530_v32  ;;  %s14484_s11 = smov 124   ;;  %vm10461_vm1 = vcmask 261120  }
 0x171   : > { %14167 = vmatpush3.msk.msra.mxu1 %vm245_vm2, %v5531_v37  ;;  %13620 = vmatpush1.msk.msra.mxu0 %vm245_vm2, %v5529_v36  ;;  %v15510_v36 = vld [vmem:[%s14549_s23 + $0x4] sm:$0xff] }
 0x172   : > { %v5696_v38 = vpop.permute.xlu0 %5695  ;;  %14171 = vmatprep.subr.mxu1 %v14457_v0  ;;  %14169 = vmatmul.mubr.msk.f32.vlgmr.msra.gmra.mxu1 %vm241_vm3, %v13618_v34 }
 0x173   : > { %8410 = vrot.lane.b32.xlu0 %v14958_v5, %s14481_s21  ;;  %v5698_v39 = vpop.permute.xlu1 %5697  ;;  %13621 = vmatmul.mubr.msk.f32.vlgmr.msra.gmra.mxu0 %vm241_vm3, %v13618_v34  ;;  %v1170_v40 = vpop.f32.mrf.mxu0 }
 0x174   : > { %8412 = vrot.lane.b32.xlu1 %v14962_v58, %s14481_s21  ;;  %14173 = vmatprep.mubr.msk.f32.mxu1 %vm14459_vm0, %v14457_v0  ;;  %v1245_v41 = vadd.f32 %v1170_v40, %v1075_v27  ;;  %v5704_v48 = vsel %vm5703_vm4, %v5696_v38, %v5698_v39 }
 0x175   : > { %5780 = vmatprep.mubr.f32.mxu0 %v14457_v0  ;;  %v15443_v47 = vpop.f32.mrf.mxu0 }
 0x176   : > { %v5700_v42 = vpop.permute.xlu0 %5699 }
 0x177   : > { %8408 = vrot.lane.b32.xlu0 %v14946_v2, %s14481_s21  ;;  %v5702_v43 = vpop.permute.xlu1 %5701  ;;  %v5705_v45 = vsel %vm5703_vm4, %v5698_v39, %v5700_v42  ;;  %v15519_v39 = vcombine.high %v15510_v36, %v15510_v36 }
 0x178   : > { %8414 = vrot.lane.b32.xlu1 %v14978_v61, %s14481_s21  ;;  %v5706_v49 = vsel %vm5703_vm4, %v5700_v42, %v5702_v43  ;;  %13625 = vmatprep.subr.msk.mxu0 %vm245_vm2, %v5705_v45 }
 0x179   : > { %14172 = vmatpush3.msk.msra.mxu1 %vm245_vm2, %v5706_v49  ;;  %13626 = vmatpush1.msk.msra.mxu0 %vm245_vm2, %v5704_v48  ;;  %v15542_v49 = vld [vmem:[%s14544_s20 + $0x4] sm:$0xff] }
 0x17a   : > { %v5867_v50 = vpop.permute.xlu0 %5866  ;;  %14176 = vmatprep.subr.mxu1 %v14457_v0  ;;  %14174 = vmatmul.mubr.msk.f32.vlgmr.msra.gmra.mxu1 %vm241_vm3, %v13624_v46 }
 0x17b   : > { %8581 = vrot.lane.b32.xlu0 %v14995_v10, %s14481_s21  ;;  %v5869_v51 = vpop.permute.xlu1 %5868  ;;  %13627 = vmatmul.mubr.msk.f32.vlgmr.msra.gmra.mxu0 %vm241_vm3, %v13624_v46  ;;  %v1345_v4 = vpop.f32.mrf.mxu0 }
 0x17c   : > { %8583 = vrot.lane.b32.xlu1 %v14999_v13, %s14481_s21  ;;  %14178 = vmatprep.mubr.msk.f32.mxu1 %vm14459_vm0, %v14457_v0  ;;  %v1420_v52 = vadd.f32 %v1345_v4, %v1245_v41  ;;  %v5874_v1 = vsel %vm5703_vm4, %v5867_v50, %v5869_v51  ;;  %v13642_v41 = vld [vmem:[%s16999_s2 + $0x118] sm:$0xff]  ;;  %v486_v4 = vadd.f32 %v15366_v6, %v15345_v44 }
 0x17d   : > { %5950 = vmatprep.mubr.f32.mxu0 %v14457_v0  ;;  %v15468_v57 = vpop.f32.mrf.mxu0 }
 0x17e   : > { %v5871_v53 = vpop.permute.xlu0 %5870 }
 0x17f   : > { %8579 = vrot.lane.b32.xlu0 %v14983_v9, %s14481_s21  ;;  %v5873_v7 = vpop.permute.xlu1 %5872  ;;  %v5875_v8 = vsel %vm5703_vm4, %v5869_v51, %v5871_v53 }
 0x180   : > { %8585 = vrot.lane.b32.xlu1 %v15015_v18, %s14481_s21  ;;  %v5876_v60 = vsel %vm5703_vm4, %v5871_v53, %v5873_v7  ;;  %13631 = vmatprep.subr.msk.mxu0 %vm245_vm2, %v5875_v8  ;;  %v13648_v7 = vld [vmem:[%s16999_s2 + $0x120] sm:$0xff]  ;;  %vm11104_vm4 = vcmask 195584  }
 0x181   : > { %14177 = vmatpush3.msk.msra.mxu1 %vm245_vm2, %v5876_v60  ;;  %13632 = vmatpush1.msk.msra.mxu0 %vm245_vm2, %v5874_v1  ;;  %v731_v1 = vadd.f32 %v15384_v3, %v486_v4 }
 0x182   : > { %v6041_v62 = vpop.permute.xlu0 %6040  ;;  %14181 = vmatprep.subr.mxu1 %v14457_v0  ;;  %14179 = vmatmul.mubr.msk.f32.vlgmr.msra.gmra.mxu1 %vm241_vm3, %v13630_v55 }
 0x183   : > { %8755 = vrot.lane.b32.xlu0 %v14958_v5, %s14482_s27  ;;  %v6043_v63 = vpop.permute.xlu1 %6042  ;;  %13633 = vmatmul.mubr.msk.f32.vlgmr.msra.gmra.mxu0 %vm241_vm3, %v13630_v55  ;;  %v1515_v12 = vpop.f32.mrf.mxu0 }
 0x184   : > { %8757 = vrot.lane.b32.xlu1 %v14962_v58, %s14482_s27  ;;  %14183 = vmatprep.mubr.msk.f32.mxu1 %vm14459_vm0, %v14457_v0  ;;  %v1590_v15 = vadd.f32 %v1515_v12, %v1420_v52  ;;  %v6049_v27 = vsel %vm6048_vm5, %v6041_v62, %v6043_v63  ;;  %v901_v12 = vadd.f32 %v15402_v21, %v731_v1  ;;  %v389_v21 = vpop.f32.mrf.mxu1 }
 0x185   : > { %6125 = vmatprep.mubr.f32.mxu0 %v14457_v0  ;;  %v15493_v26 = vpop.f32.mrf.mxu0 }
 0x186   : > { %v6045_v17 = vpop.permute.xlu0 %6044 }
 0x187   : > { %8753 = vrot.lane.b32.xlu0 %v14946_v2, %s14482_s27  ;;  %v6047_v20 = vpop.permute.xlu1 %6046  ;;  %v6050_v5 = vsel %vm6048_vm5, %v6043_v63, %v6045_v17 }
 0x188   : > { %8759 = vrot.lane.b32.xlu1 %v14978_v61, %s14482_s27  ;;  %v6051_v29 = vsel %vm6048_vm5, %v6045_v17, %v6047_v20  ;;  %13637 = vmatprep.subr.msk.mxu0 %vm245_vm2, %v6050_v5  ;;  %v13654_v17 = vld [vmem:[%s16999_s2 + $0x128] sm:$0xff] }
 0x189   : > { %14182 = vmatpush3.msk.msra.mxu1 %vm245_vm2, %v6051_v29  ;;  %13638 = vmatpush1.msk.msra.mxu0 %vm245_vm2, %v6049_v27  ;;  %v1076_v27 = vadd.f32 %v15418_v35, %v901_v12 }
 0x18a   : > { %v6212_v2 = vpop.permute.xlu0 %6211  ;;  %14186 = vmatprep.subr.mxu1 %v14457_v0  ;;  %14184 = vmatmul.mubr.msk.f32.vlgmr.msra.gmra.mxu1 %vm241_vm3, %v13636_v24 }
 0x18b   : > { %8926 = vrot.lane.b32.xlu0 %v14995_v10, %s14482_s27  ;;  %v6214_v32 = vpop.permute.xlu1 %6213  ;;  %13639 = vmatmul.mubr.msk.f32.vlgmr.msra.gmra.mxu0 %vm241_vm3, %v13636_v24  ;;  %v1690_v34 = vpop.f32.mrf.mxu0 }
 0x18c   : > { %8928 = vrot.lane.b32.xlu1 %v14999_v13, %s14482_s27  ;;  %14188 = vmatprep.mubr.msk.f32.mxu1 %vm14459_vm0, %v14457_v0  ;;  %v1765_v37 = vadd.f32 %v1690_v34, %v1590_v15  ;;  %v6219_v43 = vsel %vm6048_vm5, %v6212_v2, %v6214_v32  ;;  %v1246_v34 = vadd.f32 %v15443_v47, %v1076_v27 }
 0x18d   : > { %6295 = vmatprep.mubr.f32.mxu0 %v14457_v0  ;;  %v15525_v42 = vpop.f32.mrf.mxu0 }
 0x18e   : > { %v6216_v38 = vpop.permute.xlu0 %6215 }
 0x18f   : > { %8924 = vrot.lane.b32.xlu0 %v14983_v9, %s14482_s27  ;;  %v6218_v10 = vpop.permute.xlu1 %6217  ;;  %v6220_v40 = vsel %vm6048_vm5, %v6214_v32, %v6216_v38  ;;  %v14015_v32 = vpop.f32.mrf.mxu1 }
 0x190   : > { %8930 = vrot.lane.b32.xlu1 %v15015_v18, %s14482_s27  ;;  %v6221_v9 = vsel %vm6048_vm5, %v6216_v38, %v6218_v10  ;;  %13643 = vmatprep.subr.msk.mxu0 %vm245_vm2, %v6220_v40  ;;  %v13660_v10 = vld [vmem:[%s16999_s2 + $0x130] sm:$0xff]  ;;  %vm11449_vm5 = vcmask 523264  }
 0x191   : > { %14187 = vmatpush3.msk.msra.mxu1 %vm245_vm2, %v6221_v9  ;;  %13644 = vmatpush1.msk.msra.mxu0 %vm245_vm2, %v6219_v43  ;;  %v1421_v9 = vadd.f32 %v15468_v57, %v1246_v34 }
 0x192   : > { %v6386_v45 = vpop.permute.xlu0 %6385  ;;  %14191 = vmatprep.subr.mxu1 %v14457_v0  ;;  %14189 = vmatmul.mubr.msk.f32.vlgmr.msra.gmra.mxu1 %vm241_vm3, %v13642_v41 }
 0x193   : > { %9100 = vrot.lane.b32.xlu0 %v15519_v39, %s14483_s6  ;;  %v6388_v46 = vpop.permute.xlu1 %6387  ;;  %13645 = vmatmul.mubr.msk.f32.vlgmr.msra.gmra.mxu0 %vm241_vm3, %v13642_v41  ;;  %v1860_v48 = vpop.f32.mrf.mxu0 }
 0x194   : > { %9102 = vrot.lane.b32.xlu1 %v14962_v58, %s14483_s6  ;;  %14193 = vmatprep.mubr.msk.f32.mxu1 %vm14459_vm0, %v14457_v0  ;;  %v1935_v50 = vadd.f32 %v1860_v48, %v1765_v37  ;;  %v15553_v58 = vcombine.high %v15542_v49, %v15542_v49  ;;  %v6394_v55 = vsel %vm6393_vm6, %v6386_v45, %v6388_v46  ;;  %v554_v45 = vpop.f32.mrf.mxu1 }
 0x195   : > { %6470 = vmatprep.mubr.f32.mxu0 %v14457_v0  ;;  %v15559_v8 = vpop.f32.mrf.mxu0 }
 0x196   : > { %v6390_v51 = vpop.permute.xlu0 %6389  ;;  %v14020_v4 = vpop.f32.mrf.mxu1 }
 0x197   : > { %9098 = vrot.lane.b32.xlu0 %v15510_v36, %s14483_s6  ;;  %v6392_v52 = vpop.permute.xlu1 %6391  ;;  %v6395_v53 = vsel %vm6393_vm6, %v6388_v46, %v6390_v51 }
 0x198   : > { %9104 = vrot.lane.b32.xlu1 %v14978_v61, %s14483_s6  ;;  %v6396_v44 = vsel %vm6393_vm6, %v6390_v51, %v6392_v52  ;;  %13649 = vmatprep.subr.msk.mxu0 %vm245_vm2, %v6395_v53  ;;  %v1591_v52 = vadd.f32 %v15493_v26, %v1421_v9 }
 0x199   : > { %14192 = vmatpush3.msk.msra.mxu1 %vm245_vm2, %v6396_v44  ;;  %13650 = vmatpush1.msk.msra.mxu0 %vm245_vm2, %v6394_v55  ;;  %v13666_v55 = vld [vmem:[%s16999_s2 + $0x138] sm:$0xff] }
 0x19a   : > { %v6557_v6 = vpop.permute.xlu0 %6556  ;;  %14196 = vmatprep.subr.mxu1 %v14457_v0  ;;  %14194 = vmatmul.mubr.msk.f32.vlgmr.msra.gmra.mxu1 %vm241_vm3, %v13648_v7 }
 0x19b   : > { %9271 = vrot.lane.b32.xlu0 %v15553_v58, %s14483_s6  ;;  %v6559_v60 = vpop.permute.xlu1 %6558  ;;  %13651 = vmatmul.mubr.msk.f32.vlgmr.msra.gmra.mxu0 %vm241_vm3, %v13648_v7  ;;  %v2035_v61 = vpop.f32.mrf.mxu0 }
 0x19c   : > { %9273 = vrot.lane.b32.xlu1 %v14999_v13, %s14483_s6  ;;  %14198 = vmatprep.mubr.msk.f32.mxu1 %vm14459_vm0, %v14457_v0  ;;  %v2110_v62 = vadd.f32 %v2035_v61, %v1935_v50  ;;  %v6564_v20 = vsel %vm6393_vm6, %v6557_v6, %v6559_v60  ;;  %v555_v50 = vadd.f32 %v554_v45, %v389_v21  ;;  %v726_v61 = vpop.f32.mrf.mxu1 }
 0x19d   : > { %6640 = vmatprep.mubr.f32.mxu0 %v14457_v0  ;;  %v15586_v13 = vpop.f32.mrf.mxu0 }
 0x19e   : > { %v6561_v63 = vpop.permute.xlu0 %6560  ;;  %v732_v12 = vadd.f32 %v726_v61, %v555_v50 }
 0x19f   : > { %9269 = vrot.lane.b32.xlu0 %v15542_v49, %s14483_s6  ;;  %v6563_v3 = vpop.permute.xlu1 %6562  ;;  %v6565_v15 = vsel %vm6393_vm6, %v6559_v60, %v6561_v63  ;;  %v1766_v60 = vadd.f32 %v15525_v42, %v1591_v52  ;;  %v14447_v52 = vld [vmem:[%s14549_s23 + $0x8] sm:$0xff] }
 0x1a0   : > { %9275 = vrot.lane.b32.xlu1 %v15015_v18, %s14483_s6  ;;  %v6566_v5 = vsel %vm6393_vm6, %v6561_v63, %v6563_v3  ;;  %13655 = vmatprep.subr.msk.mxu0 %vm245_vm2, %v6565_v15  ;;  %v14025_v15 = vpop.f32.mrf.mxu1  ;;  %vm11794_vm6 = vcmask 490496  }
 0x1a1   : > { %14197 = vmatpush3.msk.msra.mxu1 %vm245_vm2, %v6566_v5  ;;  %13656 = vmatpush1.msk.msra.mxu0 %vm245_vm2, %v6564_v20 }
 0x1a2   : > { %v6731_v24 = vpop.permute.xlu0 %6730  ;;  %14201 = vmatprep.subr.mxu1 %v14457_v0  ;;  %14199 = vmatmul.mubr.msk.f32.vlgmr.msra.gmra.mxu1 %vm241_vm3, %v13654_v17 }
 0x1a3   : > { %9765 = vrot.lane.b32.xlu0 %v15124_v56, %s14484_s11  ;;  %v6733_v18 = vpop.permute.xlu1 %6732  ;;  %13657 = vmatmul.mubr.msk.f32.vlgmr.msra.gmra.mxu0 %vm241_vm3, %v13654_v17  ;;  %v2205_v29 = vpop.f32.mrf.mxu0  ;;  %v1936_v17 = vadd.f32 %v15559_v8, %v1766_v60 }
 0x1a4   : > { %9767 = vrot.lane.b32.xlu1 %v15128_v59, %s14484_s11  ;;  %6815 = vmatprep.mubr.f32.mxu0 %v14457_v0  ;;  %v2280_v2 = vadd.f32 %v2205_v29, %v2110_v62  ;;  %v6739_v41 = vsel %vm6738_vm7, %v6731_v24, %v6733_v18 }
 0x1a5   : > { %14203 = vmatprep.mubr.msk.f32.mxu1 %vm14459_vm0, %v14457_v0  ;;  %v15613_v40 = vpop.f32.mrf.mxu0  ;;  %v2111_v29 = vadd.f32 %v15586_v13, %v1936_v17 }
 0x1a6   : > { %v6735_v35 = vpop.permute.xlu0 %6734 }
 0x1a7   : > { %9763 = vrot.lane.b32.xlu0 %v15112_v54, %s14484_s11  ;;  %v6737_v37 = vpop.permute.xlu1 %6736  ;;  %v6740_v38 = vsel %vm6738_vm7, %v6733_v18, %v6735_v35 }
 0x1a8   : > { %9769 = vrot.lane.b32.xlu1 %v15144_v11, %s14484_s11  ;;  %v6741_v43 = vsel %vm6738_vm7, %v6735_v35, %v6737_v37  ;;  %13661 = vmatprep.subr.msk.mxu0 %vm245_vm2, %v6740_v38  ;;  %v15683_v35 = vld [vmem:[%s14549_s23] sm:$0xff] }
 0x1a9   : > { %14202 = vmatpush3.msk.msra.mxu1 %vm245_vm2, %v6741_v43  ;;  %13662 = vmatpush1.msk.msra.mxu0 %vm245_vm2, %v6739_v41 }
 0x1aa   : > { %v6902_v47 = vpop.permute.xlu0 %6901  ;;  %13663 = vmatmul.mubr.msk.f32.vlgmr.msra.gmra.mxu0 %vm241_vm3, %v13660_v10  ;;  %14206 = vmatprep.subr.mxu1 %v14457_v0 }
 0x1ab   : > { %9936 = vrot.lane.b32.xlu0 %v15161_v16, %s14484_s11  ;;  %v6904_v46 = vpop.permute.xlu1 %6903  ;;  %14204 = vmatmul.mubr.msk.f32.vlgmr.msra.gmra.mxu1 %vm241_vm3, %v13660_v10  ;;  %v2380_v48 = vpop.f32.mrf.mxu0 }
 0x1ac   : > { %9938 = vrot.lane.b32.xlu1 %v15165_v19, %s14484_s11  ;;  %6985 = vmatprep.mubr.f32.mxu0 %v14457_v0  ;;  %v2455_v51 = vadd.f32 %v2380_v48, %v2280_v2  ;;  %v6909_v6 = vsel %vm6738_vm7, %v6902_v47, %v6904_v46  ;;  %v13678_v47 = vld [vmem:[%s16999_s2 + $0x148] sm:$0xff] }
 0x1ad   : > { %14208 = vmatprep.mubr.msk.f32.mxu1 %vm14459_vm0, %v14457_v0  ;;  %v15640_v44 = vpop.f32.mrf.mxu0 }
 0x1ae   : > { %v6906_v57 = vpop.permute.xlu0 %6905 }
 0x1af   : > { %9934 = vrot.lane.b32.xlu0 %v15149_v14, %s14484_s11  ;;  %v6908_v53 = vpop.permute.xlu1 %6907  ;;  %v6910_v7 = vsel %vm6738_vm7, %v6904_v46, %v6906_v57 }
 0x1b0   : > { %9940 = vrot.lane.b32.xlu1 %v15181_v28, %s14484_s11  ;;  %v6911_v1 = vsel %vm6738_vm7, %v6906_v57, %v6908_v53  ;;  %13667 = vmatprep.subr.msk.mxu0 %vm245_vm2, %v6910_v7  ;;  %v15715_v53 = vld [vmem:[%s14544_s20] sm:$0xff]  ;;  %s14488_s11 = smov 64   ;;  %vm12139_vm7 = vcmask 457728  }
 0x1b1   : > { %14207 = vmatpush3.msk.msra.mxu1 %vm245_vm2, %v6911_v1  ;;  %13668 = vmatpush1.msk.msra.mxu0 %vm245_vm2, %v6909_v6  ;;  %v15724_v60 = vcombine.high %v15715_v53, %v15715_v53 }
 0x1b2   : > { %v7076_v26 = vpop.permute.xlu0 %7075  ;;  %13669 = vmatmul.mubr.msk.f32.vlgmr.msra.gmra.mxu0 %vm241_vm3, %v13666_v55  ;;  %14211 = vmatprep.subr.mxu1 %v14457_v0 }
 0x1b3   : > { %10110 = vrot.lane.b32.xlu0 %v15124_v56, %s14485_s18  ;;  %v7078_v62 = vpop.permute.xlu1 %7077  ;;  %14209 = vmatmul.mubr.msk.f32.vlgmr.msra.gmra.mxu1 %vm241_vm3, %v13666_v55  ;;  %v2550_v63 = vpop.f32.mrf.mxu0 }
 0x1b4   : > { %10112 = vrot.lane.b32.xlu1 %v15128_v59, %s14485_s18  ;;  %7160 = vmatprep.mubr.f32.mxu0 %v14457_v0  ;;  %v2625_v3 = vadd.f32 %v2550_v63, %v2455_v51  ;;  %v896_v56 = vpop.f32.mrf.mxu1  ;;  %v13672_v59 = vld [vmem:[%s16999_s2 + $0x140] sm:$0xff]  ;;  %v7084_v27 = vsel %vm7083_vm8, %v7076_v26, %v7078_v62 }
 0x1b5   : > { %14213 = vmatprep.mubr.msk.f32.mxu1 %vm14459_vm0, %v14457_v0  ;;  %v2552_v21 = vpop.f32.mrf.mxu0  ;;  %v902_v24 = vadd.f32 %v896_v56, %v732_v12  ;;  %v13684_v12 = vld [vmem:[%s16999_s2 + $0x150] sm:$0xff] }
 0x1b6   : > { %v7080_v42 = vpop.permute.xlu0 %7079 }
 0x1b7   : > { %10108 = vrot.lane.b32.xlu0 %v15112_v54, %s14485_s18  ;;  %v7082_v20 = vpop.permute.xlu1 %7081  ;;  %v7085_v5 = vsel %vm7083_vm8, %v7078_v62, %v7080_v42  ;;  %v14030_v54 = vpop.f32.mrf.mxu1 }
 0x1b8   : > { %10114 = vrot.lane.b32.xlu1 %v15144_v11, %s14485_s18  ;;  %v7086_v8 = vsel %vm7083_vm8, %v7080_v42, %v7082_v20  ;;  %13673 = vmatprep.subr.msk.mxu0 %vm245_vm2, %v7085_v5  ;;  %v14448_v5 = vld [vmem:[%s14544_s20 + $0x8] sm:$0xff] }
 0x1b9   : > { %14212 = vmatpush3.msk.msra.mxu1 %vm245_vm2, %v7086_v8  ;;  %13674 = vmatpush1.msk.msra.mxu0 %vm245_vm2, %v7084_v27  ;;  %v1071_v37 = vpop.f32.mrf.mxu1 }
 0x1ba   : > { %v7247_v18 = vpop.permute.xlu0 %7246  ;;  %13675 = vmatmul.mubr.msk.f32.vlgmr.msra.gmra.mxu0 %vm241_vm3, %v13672_v59  ;;  %14216 = vmatprep.subr.mxu1 %v14457_v0  ;;  %v1077_v13 = vadd.f32 %v1071_v37, %v902_v24 }
 0x1bb   : > { %10281 = vrot.lane.b32.xlu0 %v15161_v16, %s14485_s18  ;;  %v7249_v2 = vpop.permute.xlu1 %7248  ;;  %14214 = vmatmul.mubr.msk.f32.vlgmr.msra.gmra.mxu1 %vm241_vm3, %v13672_v59  ;;  %v2724_v32 = vpop.f32.mrf.mxu0  ;;  %v2281_v16 = vadd.f32 %v15613_v40, %v2111_v29 }
 0x1bc   : > { %10283 = vrot.lane.b32.xlu1 %v15165_v19, %s14485_s18  ;;  %7330 = vmatprep.mubr.f32.mxu0 %v14457_v0  ;;  %v2799_v34 = vadd.f32 %v2724_v32, %v2625_v3  ;;  %v14035_v10 = vpop.f32.mrf.mxu1  ;;  %v15693_v19 = vcombine.high %v15683_v35, %v15683_v35  ;;  %v7254_v45 = vsel %vm7083_vm8, %v7247_v18, %v7249_v2 }
 0x1bd   : > { %14218 = vmatprep.mubr.msk.f32.mxu1 %vm14459_vm0, %v14457_v0  ;;  %v2726_v9 = vpop.f32.mrf.mxu0  ;;  %v2456_v50 = vadd.f32 %v15640_v44, %v2281_v16  ;;  %v13690_v16 = vld [vmem:[%s16999_s2 + $0x158] sm:$0xff] }
 0x1be   : > { %v7251_v38 = vpop.permute.xlu0 %7250 }
 0x1bf   : > { %10279 = vrot.lane.b32.xlu0 %v15149_v14, %s14485_s18  ;;  %v7253_v41 = vpop.permute.xlu1 %7252  ;;  %v7255_v43 = vsel %vm7083_vm8, %v7249_v2, %v7251_v38  ;;  %v1241_v14 = vpop.f32.mrf.mxu1  ;;  %v2626_v6 = vadd.f32 %v2552_v21, %v2456_v50 }
 0x1c0   : > { %10285 = vrot.lane.b32.xlu1 %v15181_v28, %s14485_s18  ;;  %v7256_v40 = vsel %vm7083_vm8, %v7251_v38, %v7253_v41  ;;  %13679 = vmatprep.subr.msk.mxu0 %vm245_vm2, %v7255_v43  ;;  %v1247_v46 = vadd.f32 %v1241_v14, %v1077_v13 }
 0x1c1   : > { %14217 = vmatpush3.msk.msra.mxu1 %vm245_vm2, %v7256_v40  ;;  %13680 = vmatpush1.msk.msra.mxu0 %vm245_vm2, %v7254_v45  ;;  %v14040_v51 = vpop.f32.mrf.mxu1 }
 0x1c2   : > { %v7421_v48 = vpop.permute.xlu0 %7420  ;;  %13681 = vmatmul.mubr.msk.f32.vlgmr.msra.gmra.mxu0 %vm241_vm3, %v13678_v47  ;;  %14221 = vmatprep.subr.mxu1 %v14457_v0 }
 0x1c3   : > { %10455 = vrot.lane.b32.xlu0 %v15693_v19, %s14486_s25  ;;  %v7423_v4 = vpop.permute.xlu1 %7422  ;;  %14219 = vmatmul.mubr.msk.f32.vlgmr.msra.gmra.mxu1 %vm241_vm3, %v13678_v47  ;;  %v2894_v57 = vpop.f32.mrf.mxu0 }
 0x1c4   : > { %10457 = vrot.lane.b32.xlu1 %v14447_v52, %s14486_s25  ;;  %7505 = vmatprep.mubr.f32.mxu0 %v14457_v0  ;;  %v2969_v7 = vadd.f32 %v2894_v57, %v2799_v34  ;;  %v1416_v55 = vpop.f32.mrf.mxu1  ;;  %v7429_v15 = vsel %vm7428_vm9, %v7421_v48, %v7423_v4  ;;  %v11087_v34 = vld [vmem:[%s14549_s23 + $0x8] sm:$0xff] }
 0x1c5   : > { %14223 = vmatprep.mubr.msk.f32.mxu1 %vm14459_vm0, %v14457_v0  ;;  %v1422_v44 = vadd.f32 %v1416_v55, %v1247_v46  ;;  %v2896_v61 = vpop.f32.mrf.mxu0  ;;  %v11095_v45 = vcombine.high %v11087_v34, %v11087_v34 }
 0x1c6   : > { %v14045_v1 = vpop.f32.mrf.mxu1 }
 0x1c7   : > { %10453 = vrot.lane.b32.xlu0 %v15683_v35, %s14486_s25  ;;  %v7425_v26 = vpop.permute.xlu0 %7424 }
 0x1c8   : > { %10459 = vrot.lane.b32.xlu1 %v15144_v11, %s14486_s25  ;;  %v7427_v62 = vpop.permute.xlu1 %7426  ;;  %v7430_v63 = vsel %vm7428_vm9, %v7423_v4, %v7425_v26  ;;  %v1586_v3 = vpop.f32.mrf.mxu1  ;;  %v2800_v11 = vadd.f32 %v2726_v9, %v2626_v6  ;;  %v13696_v4 = vld [vmem:[%s16999_s2 + $0x160] sm:$0xff] }
 0x1c9   : > { %v7431_v42 = vsel %vm7428_vm9, %v7425_v26, %v7427_v62  ;;  %13685 = vmatprep.subr.msk.mxu0 %vm245_vm2, %v7430_v63  ;;  %v1592_v17 = vadd.f32 %v1586_v3, %v1422_v44  ;;  %v11089_v44 = vld [vmem:[%s14544_s20 + $0x8] sm:$0xff] }
 0x1ca   : > { %14222 = vmatpush3.msk.msra.mxu1 %vm245_vm2, %v7431_v42  ;;  %13686 = vmatpush1.msk.msra.mxu0 %vm245_vm2, %v7429_v15  ;;  %v14050_v56 = vpop.f32.mrf.mxu1  ;;  %v2970_v54 = vadd.f32 %v2896_v61, %v2800_v11  ;;  %v13702_v63 = vld [vmem:[%s16999_s2 + $0x168] sm:$0xff] }
 0x1cb   : > { %10626 = vrot.lane.b32.xlu0 %v15724_v60, %s14486_s25  ;;  %13687 = vmatmul.mubr.msk.f32.vlgmr.msra.gmra.mxu0 %vm241_vm3, %v13684_v12  ;;  %v3069_v20 = vpop.f32.mrf.mxu0  ;;  %v11266_v56 = vcombine.high %v11089_v44, %v11089_v44 }
 0x1cc   : > { %10628 = vrot.lane.b32.xlu1 %v14448_v5, %s14486_s25  ;;  %v7592_v59 = vpop.permute.xlu0 %7591  ;;  %14224 = vmatmul.mubr.msk.f32.vlgmr.msra.gmra.mxu1 %vm241_vm3, %v13684_v12  ;;  %v3144_v21 = vadd.f32 %v3069_v20, %v2969_v7  ;;  %v1761_v24 = vpop.f32.mrf.mxu1 }
 0x1cd   : > { %v7594_v27 = vpop.permute.xlu1 %7593  ;;  %14226 = vmatprep.subr.mxu1 %v14457_v0  ;;  %14228 = vmatprep.mubr.msk.f32.mxu1 %vm14459_vm0, %v14457_v0  ;;  %v1767_v8 = vadd.f32 %v1761_v24, %v1592_v17  ;;  %v3071_v29 = vpop.f32.mrf.mxu0  ;;  %v13708_v24 = vld [vmem:[%s16999_s2 + $0x170] sm:$0xff] }
 0x1ce   : > { %7675 = vmatprep.mubr.f32.mxu0 %v14457_v0  ;;  %v14055_v18 = vpop.f32.mrf.mxu1  ;;  %v3145_v10 = vadd.f32 %v3071_v29, %v2970_v54  ;;  %v7599_v47 = vsel %vm7428_vm9, %v7592_v59, %v7594_v27 }
 0x1cf   : > { %10624 = vrot.lane.b32.xlu0 %v15715_v53, %s14486_s25 }
 0x1d0   : > { %10630 = vrot.lane.b32.xlu1 %v15181_v28, %s14486_s25  ;;  %v1931_v2 = vpop.f32.mrf.mxu1 }
 0x1d1   : > { %v7596_v32 = vpop.permute.xlu0 %7595  ;;  %v1937_v37 = vadd.f32 %v1931_v2, %v1767_v8 }
 0x1d2   : > { %v7598_v13 = vpop.permute.xlu1 %7597  ;;  %v7600_v38 = vsel %vm7428_vm9, %v7594_v27, %v7596_v32  ;;  %v14060_v41 = vpop.f32.mrf.mxu1 }
 0x1d3   : > { %v7601_v43 = vsel %vm7428_vm9, %v7596_v32, %v7598_v13  ;;  %11098 = vrot.lane.b32.xlu0 %v15693_v19, %s14487_s30  ;;  %13691 = vmatprep.subr.msk.mxu0 %vm245_vm2, %v7600_v38  ;;  %v3239_v28 = vpop.f32.mrf.mxu0  ;;  %v15823_v32 = vld [vmem:[%s14549_s23 + $0xc] sm:$0xff] }
 0x1d4   : > { %11100 = vrot.lane.b32.xlu1 %v11087_v34, %s14487_s30  ;;  %14227 = vmatpush3.msk.msra.mxu1 %vm245_vm2, %v7601_v43  ;;  %v3314_v9 = vadd.f32 %v3239_v28, %v3144_v21  ;;  %v2106_v50 = vpop.f32.mrf.mxu1 }
 0x1d5   : > { %13692 = vmatpush1.msk.msra.mxu0 %vm245_vm2, %v7599_v47  ;;  %14229 = vmatmul.mubr.msk.f32.vlgmr.msra.gmra.mxu1 %vm241_vm3, %v13690_v16  ;;  %v8064_v40 = vpop.permute.xlu0 %8063  ;;  %v3241_v14 = vpop.f32.mrf.mxu0  ;;  %v2112_v51 = vadd.f32 %v2106_v50, %v1937_v37 }
 0x1d6   : > { %14231 = vmatprep.subr.mxu1 %v14457_v0  ;;  %13693 = vmatmul.mubr.msk.f32.vlgmr.msra.gmra.mxu0 %vm241_vm3, %v13690_v16  ;;  %v8066_v46 = vpop.permute.xlu1 %8065  ;;  %v3315_v48 = vadd.f32 %v3241_v14, %v3145_v10  ;;  %v14065_v57 = vpop.f32.mrf.mxu1  ;;  %v15831_v16 = vcombine.high %v15823_v32, %v15823_v32  ;;  %v13714_v10 = vld [vmem:[%s16999_s2 + $0x178] sm:$0xff] }
 0x1d7   : > { %13697 = vmatprep.subr.msk.mxu0 %vm245_vm2, %v14825_v23  ;;  %14232 = vmatpush3.msk.msra.mxu1 %vm245_vm2, %v14822_v22  ;;  %v8072_v59 = vsel %vm8071_vm10, %v8064_v40, %v8066_v46 }
 0x1d8   : > { %13698 = vmatpush1.msk.msra.mxu0 %vm245_vm2, %v14835_v25  ;;  %11096 = vrot.lane.b32.xlu0 %v15683_v35, %s14487_s30  ;;  %v2276_v55 = vpop.f32.mrf.mxu1 }
 0x1d9   : > { %11102 = vrot.lane.b32.xlu1 %v11095_v45, %s14487_s30  ;;  %14233 = vmatprep.mubr.msk.f32.mxu1 %vm14459_vm0, %v14457_v0  ;;  %v8068_v52 = vpop.permute.xlu0 %8067  ;;  %v2282_v1 = vadd.f32 %v2276_v55, %v2112_v51 }
 0x1da   : > { %13703 = vmatprep.subr.msk.mxu0 %vm245_vm2, %v14857_v31  ;;  %14236 = vmatprep.subr.mxu1 %v14457_v0  ;;  %v8070_v7 = vpop.permute.xlu1 %8069  ;;  %v8073_v26 = vsel %vm8071_vm10, %v8066_v46, %v8068_v52  ;;  %v14070_v62 = vpop.f32.mrf.mxu1 }
 0x1db   : > { %7824 = vmatprep.mubr.f32.mxu0 %v14457_v0  ;;  %14234 = vmatmul.mubr.msk.f32.vlgmr.msra.gmra.mxu1 %vm241_vm3, %v13696_v4  ;;  %v3414_v6 = vpop.f32.mrf.mxu0  ;;  %v8074_v15 = vsel %vm8071_vm10, %v8068_v52, %v8070_v7  ;;  %v15859_v7 = vld [vmem:[%s14544_s20 + $0xc] sm:$0xff] }
 0x1dc   : > { %14237 = vmatpush3.msk.msra.mxu1 %vm245_vm2, %v14854_v30  ;;  %13699 = vmatmul.mubr.msk.f32.vlgmr.msra.gmra.mxu0 %vm241_vm3, %v13696_v4  ;;  %v3489_v61 = vadd.f32 %v3414_v6, %v3314_v9  ;;  %v2451_v11 = vpop.f32.mrf.mxu1  ;;  %v13720_v4 = vld [vmem:[%s16999_s2 + $0x180] sm:$0xff] }
 0x1dd   : > { %13704 = vmatpush1.msk.msra.mxu0 %vm245_vm2, %v14867_v33  ;;  %11269 = vrot.lane.b32.xlu0 %v15724_v60, %s14487_s30  ;;  %v8235_v12 = vpop.permute.xlu0 %8234  ;;  %v3416_v3 = vpop.f32.mrf.mxu0  ;;  %v2457_v20 = vadd.f32 %v2451_v11, %v2282_v1 }
 0x1de   : > { %11271 = vrot.lane.b32.xlu1 %v11089_v44, %s14487_s30  ;;  %14238 = vmatprep.mubr.msk.f32.mxu1 %vm14459_vm0, %v14457_v0  ;;  %v8237_v42 = vpop.permute.xlu1 %8236  ;;  %v3490_v17 = vadd.f32 %v3416_v3, %v3315_v48  ;;  %v14075_v5 = vpop.f32.mrf.mxu1 }
 0x1df   : > { %13709 = vmatprep.subr.msk.mxu0 %vm245_vm2, %v8073_v26  ;;  %14241 = vmatprep.subr.mxu1 %v14457_v0  ;;  %v8242_v47 = vsel %vm8071_vm10, %v8235_v12, %v8237_v42 }
 0x1e0   : > { %7973 = vmatprep.mubr.f32.mxu0 %v14457_v0  ;;  %14239 = vmatmul.mubr.msk.f32.vlgmr.msra.gmra.mxu1 %vm241_vm3, %v13702_v63  ;;  %v2621_v8 = vpop.f32.mrf.mxu1 }
 0x1e1   : > { %14242 = vmatpush3.msk.msra.mxu1 %vm245_vm2, %v8074_v15  ;;  %13705 = vmatmul.mubr.msk.f32.vlgmr.msra.gmra.mxu0 %vm241_vm3, %v13702_v63  ;;  %v8239_v21 = vpop.permute.xlu0 %8238  ;;  %v2627_v29 = vadd.f32 %v2621_v8, %v2457_v20  ;;  %v15870_v63 = vcombine.high %v15859_v7, %v15859_v7 }
 0x1e2   : > { %13710 = vmatpush1.msk.msra.mxu0 %vm245_vm2, %v8072_v59  ;;  %11267 = vrot.lane.b32.xlu0 %v15715_v53, %s14487_s30  ;;  %v8241_v27 = vpop.permute.xlu1 %8240  ;;  %v8243_v54 = vsel %vm8071_vm10, %v8237_v42, %v8239_v21  ;;  %v14080_v37 = vpop.f32.mrf.mxu1 }
 0x1e3   : > { %11273 = vrot.lane.b32.xlu1 %v11266_v56, %s14487_s30  ;;  %8148 = vmatprep.mubr.f32.mxu0 %v14457_v0  ;;  %v3584_v18 = vpop.f32.mrf.mxu0  ;;  %v8244_v2 = vsel %vm8071_vm10, %v8239_v21, %v8241_v27 }
 0x1e4   : > { %14243 = vmatprep.mubr.msk.f32.mxu1 %vm14459_vm0, %v14457_v0  ;;  %14246 = vmatprep.subr.mxu1 %v14457_v0  ;;  %v3659_v34 = vadd.f32 %v3584_v18, %v3489_v61  ;;  %v2795_v28 = vpop.f32.mrf.mxu1 }
 0x1e5   : > { %13711 = vmatmul.mubr.msk.f32.vlgmr.msra.gmra.mxu0 %vm241_vm3, %v13708_v24  ;;  %14244 = vmatmul.mubr.msk.f32.vlgmr.msra.gmra.mxu1 %vm241_vm3, %v13708_v24  ;;  %v8411_v13 = vpop.permute.xlu0 %8410  ;;  %v3586_v38 = vpop.f32.mrf.mxu0  ;;  %v2801_v45 = vadd.f32 %v2795_v28, %v2627_v29 }
 0x1e6   : > { %11443 = vrot.lane.b32.xlu0 %v15519_v39, %s14488_s11  ;;  %13715 = vmatprep.subr.msk.mxu0 %vm245_vm2, %v8243_v54  ;;  %v8413_v41 = vpop.permute.xlu1 %8412  ;;  %v3660_v43 = vadd.f32 %v3586_v38, %v3490_v17  ;;  %v14085_v40 = vpop.f32.mrf.mxu1  ;;  %v13726_v17 = vld [vmem:[%s16999_s2 + $0x188] sm:$0xff] }
 0x1e7   : > { %11445 = vrot.lane.b32.xlu1 %v15823_v32, %s14488_s11  ;;  %14247 = vmatpush3.msk.msra.mxu1 %vm245_vm2, %v8244_v2  ;;  %v8418_v9 = vsel %vm8416_vm11, %v8411_v13, %v8413_v41 }
 0x1e8   : > { %13716 = vmatpush1.msk.msra.mxu0 %vm245_vm2, %v8242_v47  ;;  %8318 = vmatprep.mubr.f32.mxu0 %v14457_v0  ;;  %v2965_v50 = vpop.f32.mrf.mxu1 }
 0x1e9   : > { %13717 = vmatmul.mubr.msk.f32.vlgmr.msra.gmra.mxu0 %vm241_vm3, %v13714_v10  ;;  %13721 = vmatprep.subr.msk.mxu0 %vm245_vm2, %v8418_v9  ;;  %v8409_v14 = vpop.permute.xlu0 %8408  ;;  %v2971_v52 = vadd.f32 %v2965_v50, %v2801_v45 }
 0x1ea   : > { %11441 = vrot.lane.b32.xlu0 %v15510_v36, %s14488_s11  ;;  %v8417_v46 = vsel %vm8416_vm11, %v8409_v14, %v8411_v13  ;;  %v8415_v48 = vpop.permute.xlu1 %8414  ;;  %14248 = vmatprep.mubr.msk.f32.mxu1 %vm14459_vm0, %v14457_v0  ;;  %v14090_v44 = vpop.f32.mrf.mxu1 }
 0x1eb   : > { %11447 = vrot.lane.b32.xlu1 %v15831_v16, %s14488_s11  ;;  %v8419_v51 = vsel %vm8416_vm11, %v8413_v41, %v8415_v48  ;;  %14251 = vmatprep.subr.mxu1 %v14457_v0  ;;  %v3759_v57 = vpop.f32.mrf.mxu0 }
 0x1ec   : > { %14249 = vmatmul.mubr.msk.f32.vlgmr.msra.gmra.mxu1 %vm241_vm3, %v13714_v10  ;;  %13722 = vmatpush1.msk.msra.mxu0 %vm245_vm2, %v8417_v46  ;;  %v3834_v55 = vadd.f32 %v3759_v57, %v3659_v34  ;;  %v3140_v62 = vpop.f32.mrf.mxu1  ;;  %v13732_v10 = vld [vmem:[%s16999_s2 + $0x190] sm:$0xff] }
 0x1ed   : > { %8493 = vmatprep.mubr.f32.mxu0 %v14457_v0  ;;  %14252 = vmatpush3.msk.msra.mxu1 %vm245_vm2, %v8419_v51  ;;  %v8582_v6 = vpop.permute.xlu0 %8581  ;;  %v3761_v1 = vpop.f32.mrf.mxu0  ;;  %v3146_v3 = vadd.f32 %v3140_v62, %v2971_v52 }
 0x1ee   : > { %11614 = vrot.lane.b32.xlu0 %v15553_v58, %s14488_s11  ;;  %13723 = vmatmul.mubr.msk.f32.vlgmr.msra.gmra.mxu0 %vm241_vm3, %v13720_v4  ;;  %v8584_v26 = vpop.permute.xlu1 %8583  ;;  %v3835_v61 = vadd.f32 %v3761_v1, %v3660_v43  ;;  %v14095_v15 = vpop.f32.mrf.mxu1 }
 0x1ef   : > { %11616 = vrot.lane.b32.xlu1 %v15859_v7, %s14488_s11  ;;  %v8588_v12 = vsel %vm8416_vm11, %v8582_v6, %v8584_v26  ;;  %14253 = vmatprep.mubr.msk.f32.mxu1 %vm14459_vm0, %v14457_v0 }
 0x1f0   : > { %13727 = vmatprep.subr.msk.mxu0 %vm245_vm2, %v8588_v12  ;;  %14256 = vmatprep.subr.mxu1 %v14457_v0  ;;  %v3310_v20 = vpop.f32.mrf.mxu1 }
 0x1f1   : > { %v8580_v42 = vpop.permute.xlu0 %8579  ;;  %14254 = vmatmul.mubr.msk.f32.vlgmr.msra.gmra.mxu1 %vm241_vm3, %v13720_v4  ;;  %8663 = vmatprep.mubr.f32.mxu0 %v14457_v0  ;;  %v3316_v21 = vadd.f32 %v3310_v20, %v3146_v3 }
 0x1f2   : > { %11612 = vrot.lane.b32.xlu0 %v15542_v49, %s14488_s11  ;;  %v8587_v11 = vsel %vm8416_vm11, %v8580_v42, %v8582_v6  ;;  %v8586_v56 = vpop.permute.xlu1 %8585  ;;  %14258 = vmatprep.mubr.msk.f32.mxu1 %vm14459_vm0, %v14457_v0  ;;  %v14100_v27 = vpop.f32.mrf.mxu1  ;;  %v13738_v6 = vld [vmem:[%s16999_s2 + $0x198] sm:$0xff] }
 0x1f3   : > { %11618 = vrot.lane.b32.xlu1 %v15870_v63, %s14488_s11  ;;  %v8589_v5 = vsel %vm8416_vm11, %v8584_v26, %v8586_v56  ;;  %13728 = vmatpush1.msk.msra.mxu0 %vm245_vm2, %v8587_v11  ;;  %v3929_v59 = vpop.f32.mrf.mxu0 }
 0x1f4   : > { %14257 = vmatpush3.msk.msra.mxu1 %vm245_vm2, %v8589_v5  ;;  %13729 = vmatmul.mubr.msk.f32.vlgmr.msra.gmra.mxu0 %vm241_vm3, %v13726_v17  ;;  %v4004_v24 = vadd.f32 %v3929_v59, %v3834_v55  ;;  %v3485_v2 = vpop.f32.mrf.mxu1 }
 0x1f5   : > { %v8756_v8 = vpop.permute.xlu0 %8755  ;;  %14261 = vmatprep.subr.mxu1 %v14457_v0  ;;  %14259 = vmatmul.mubr.msk.f32.vlgmr.msra.gmra.mxu1 %vm241_vm3, %v13726_v17  ;;  %v3931_v54 = vpop.f32.mrf.mxu0  ;;  %v3491_v37 = vadd.f32 %v3485_v2, %v3316_v21 }
 0x1f6   : > { %11788 = vrot.lane.b32.xlu0 %v15519_v39, %s14489_s22  ;;  %v8758_v18 = vpop.permute.xlu1 %8757  ;;  %8838 = vmatprep.mubr.f32.mxu0 %v14457_v0  ;;  %v4005_v29 = vadd.f32 %v3931_v54, %v3835_v61  ;;  %v14105_v13 = vpop.f32.mrf.mxu1 }
 0x1f7   : > { %11790 = vrot.lane.b32.xlu1 %v15823_v32, %s14489_s22  ;;  %v8763_v34 = vsel %vm8761_vm12, %v8756_v8, %v8758_v18  ;;  %14263 = vmatprep.mubr.msk.f32.mxu1 %vm14459_vm0, %v14457_v0 }
 0x1f8   : > { %13733 = vmatprep.subr.msk.mxu0 %vm245_vm2, %v8763_v34  ;;  %v3655_v28 = vpop.f32.mrf.mxu1 }
 0x1f9   : > { %v8754_v38 = vpop.permute.xlu0 %8753  ;;  %v3661_v45 = vadd.f32 %v3655_v28, %v3491_v37 }
 0x1fa   : > { %11786 = vrot.lane.b32.xlu0 %v15510_v36, %s14489_s22  ;;  %v8762_v41 = vsel %vm8761_vm12, %v8754_v38, %v8756_v8  ;;  %v8760_v43 = vpop.permute.xlu1 %8759  ;;  %v14110_v14 = vpop.f32.mrf.mxu1 }
 0x1fb   : > { %11792 = vrot.lane.b32.xlu1 %v15831_v16, %s14489_s22  ;;  %v8764_v47 = vsel %vm8761_vm12, %v8758_v18, %v8760_v43  ;;  %13734 = vmatpush1.msk.msra.mxu0 %vm245_vm2, %v8762_v41  ;;  %v4104_v9 = vpop.f32.mrf.mxu0 }
 0x1fc   : > { %14262 = vmatpush3.msk.msra.mxu1 %vm245_vm2, %v8764_v47  ;;  %13735 = vmatmul.mubr.msk.f32.vlgmr.msra.gmra.mxu0 %vm241_vm3, %v13732_v10  ;;  %v4179_v40 = vadd.f32 %v4104_v9, %v4004_v24  ;;  %v3830_v4 = vpop.f32.mrf.mxu1 }
 0x1fd   : > { %v8927_v46 = vpop.permute.xlu0 %8926  ;;  %14266 = vmatprep.subr.mxu1 %v14457_v0  ;;  %14264 = vmatmul.mubr.msk.f32.vlgmr.msra.gmra.mxu1 %vm241_vm3, %v13732_v10  ;;  %v4106_v48 = vpop.f32.mrf.mxu0  ;;  %v3836_v52 = vadd.f32 %v3830_v4, %v3661_v45 }
 0x1fe   : > { %11959 = vrot.lane.b32.xlu0 %v15553_v58, %s14489_s22  ;;  %v8929_v50 = vpop.permute.xlu1 %8928  ;;  %9008 = vmatprep.mubr.f32.mxu0 %v14457_v0  ;;  %v4180_v51 = vadd.f32 %v4106_v48, %v4005_v29  ;;  %v14115_v55 = vpop.f32.mrf.mxu1  ;;  %v9434_v48 = vld [vmem:[%s14549_s23 + $0x8] sm:$0xf] }
 0x1ff   : > { %11961 = vrot.lane.b32.xlu1 %v15859_v7, %s14489_s22  ;;  %v8933_v57 = vsel %vm8761_vm12, %v8927_v46, %v8929_v50  ;;  %14268 = vmatprep.mubr.msk.f32.mxu1 %vm14459_vm0, %v14457_v0 }
 0x200   : > { %13739 = vmatprep.subr.msk.mxu0 %vm245_vm2, %v8933_v57  ;;  %v4000_v61 = vpop.f32.mrf.mxu1  ;;  %v13756_v57 = vld [vmem:[%s16999_s2 + $0x1b0] sm:$0xff] }
 0x201   : > { %v8925_v44 = vpop.permute.xlu0 %8924  ;;  %v4006_v3 = vadd.f32 %v4000_v61, %v3836_v52 }
 0x202   : > { %11957 = vrot.lane.b32.xlu0 %v15542_v49, %s14489_s22  ;;  %v8932_v1 = vsel %vm8761_vm12, %v8925_v44, %v8927_v46  ;;  %v8931_v26 = vpop.permute.xlu1 %8930  ;;  %v14120_v42 = vpop.f32.mrf.mxu1 }
 0x203   : > { %11963 = vrot.lane.b32.xlu1 %v15870_v63, %s14489_s22  ;;  %v8934_v62 = vsel %vm8761_vm12, %v8929_v50, %v8931_v26  ;;  %13740 = vmatpush1.msk.msra.mxu0 %vm245_vm2, %v8932_v1  ;;  %v4274_v12 = vpop.f32.mrf.mxu0 }
 0x204   : > { %14267 = vmatpush3.msk.msra.mxu1 %vm245_vm2, %v8934_v62  ;;  %13741 = vmatmul.mubr.msk.f32.vlgmr.msra.gmra.mxu0 %vm241_vm3, %v13738_v6  ;;  %v4349_v15 = vadd.f32 %v4274_v12, %v4179_v40  ;;  %v4175_v5 = vpop.f32.mrf.mxu1 }
 0x205   : > { %v9101_v17 = vpop.permute.xlu0 %9100  ;;  %14271 = vmatprep.subr.mxu1 %v14457_v0  ;;  %14269 = vmatmul.mubr.msk.f32.vlgmr.msra.gmra.mxu1 %vm241_vm3, %v13738_v6  ;;  %v4276_v11 = vpop.f32.mrf.mxu0  ;;  %v4181_v21 = vadd.f32 %v4175_v5, %v4006_v3 }
 0x206   : > { %12133 = vrot.lane.b32.xlu0 %v15519_v39, %s14490_s29  ;;  %v9103_v56 = vpop.permute.xlu1 %9102  ;;  %9183 = vmatprep.mubr.f32.mxu0 %v14457_v0  ;;  %v4350_v20 = vadd.f32 %v4276_v11, %v4180_v51  ;;  %v14125_v24 = vpop.f32.mrf.mxu1  ;;  %v13744_v39 = vld [vmem:[%s16999_s2 + $0x1a0] sm:$0xff] }
 0x207   : > { %12135 = vrot.lane.b32.xlu1 %v15823_v32, %s14490_s29  ;;  %v9108_v59 = vsel %vm9106_vm13, %v9101_v17, %v9103_v56  ;;  %14273 = vmatprep.mubr.msk.f32.mxu1 %vm14459_vm0, %v14457_v0 }
 0x208   : > { %13745 = vmatprep.subr.msk.mxu0 %vm245_vm2, %v9108_v59  ;;  %v4345_v54 = vpop.f32.mrf.mxu1 }
 0x209   : > { %v9099_v27 = vpop.permute.xlu0 %9098  ;;  %v4351_v2 = vadd.f32 %v4345_v54, %v4181_v21 }
 0x20a   : > { %12131 = vrot.lane.b32.xlu0 %v15510_v36, %s14490_s29  ;;  %v9107_v8 = vsel %vm9106_vm13, %v9099_v27, %v9101_v17  ;;  %v9105_v32 = vpop.permute.xlu1 %9104  ;;  %v14130_v37 = vpop.f32.mrf.mxu1 }
 0x20b   : > { %12137 = vrot.lane.b32.xlu1 %v15831_v16, %s14490_s29  ;;  %v9109_v18 = vsel %vm9106_vm13, %v9103_v56, %v9105_v32  ;;  %13746 = vmatpush1.msk.msra.mxu0 %vm245_vm2, %v9107_v8  ;;  %v4449_v29 = vpop.f32.mrf.mxu0  ;;  %v13768_v56 = vld [vmem:[%s16999_s2 + $0x1c0] sm:$0xff] }
 0x20c   : > { %14272 = vmatpush3.msk.msra.mxu1 %vm245_vm2, %v9109_v18  ;;  %13747 = vmatmul.mubr.msk.f32.vlgmr.msra.gmra.mxu0 %vm241_vm3, %v13744_v39  ;;  %v4524_v34 = vadd.f32 %v4449_v29, %v4349_v15  ;;  %v4520_v10 = vpop.f32.mrf.mxu1  ;;  %v13774_v18 = vld [vmem:[%s16999_s2 + $0x1c8] sm:$0xff] }
 0x20d   : > { %v9272_v36 = vpop.permute.xlu0 %9271  ;;  %14274 = vmatmul.mubr.msk.f32.vlgmr.msra.gmra.mxu1 %vm241_vm3, %v13744_v39  ;;  %14276 = vmatprep.subr.mxu1 %v14457_v0  ;;  %v4451_v13 = vpop.f32.mrf.mxu0  ;;  %v4526_v43 = vadd.f32 %v4520_v10, %v4351_v2 }
 0x20e   : > { %12304 = vrot.lane.b32.xlu0 %v15553_v58, %s14490_s29  ;;  %v9274_v16 = vpop.permute.xlu1 %9273  ;;  %9353 = vmatprep.mubr.f32.mxu0 %v14457_v0  ;;  %v4525_v38 = vadd.f32 %v4451_v13, %v4350_v20  ;;  %v14135_v28 = vpop.f32.mrf.mxu1  ;;  %v13750_v58 = vld [vmem:[%s16999_s2 + $0x1a8] sm:$0xff] }
 0x20f   : > { %12306 = vrot.lane.b32.xlu1 %v15859_v7, %s14490_s29  ;;  %v9278_v41 = vsel %vm9106_vm13, %v9272_v36, %v9274_v16  ;;  %14278 = vmatprep.mubr.msk.f32.mxu1 %vm14459_vm0, %v14457_v0 }
 0x210   : > { %13751 = vmatprep.subr.msk.mxu0 %vm245_vm2, %v9278_v41 }
 0x211   : > { %v9270_v47 = vpop.permute.xlu0 %9269 }
 0x212   : > { %12302 = vrot.lane.b32.xlu0 %v15542_v49, %s14490_s29  ;;  %v9277_v7 = vsel %vm9106_vm13, %v9270_v47, %v9272_v36  ;;  %v9276_v9 = vpop.permute.xlu1 %9275  ;;  %v4690_v45 = vpop.f32.mrf.mxu1 }
 0x213   : > { %12308 = vrot.lane.b32.xlu1 %v15870_v63, %s14490_s29  ;;  %v9279_v40 = vsel %vm9106_vm13, %v9274_v16, %v9276_v9  ;;  %13752 = vmatpush1.msk.msra.mxu0 %vm245_vm2, %v9277_v7  ;;  %v4619_v14 = vpop.f32.mrf.mxu0  ;;  %v4696_v46 = vadd.f32 %v4690_v45, %v4526_v43  ;;  %v13780_v7 = vld [vmem:[%s16999_s2 + $0x1d0] sm:$0xff] }
 0x214   : > { %14277 = vmatpush3.msk.msra.mxu1 %vm245_vm2, %v9279_v40  ;;  %13753 = vmatmul.mubr.msk.f32.vlgmr.msra.gmra.mxu0 %vm241_vm3, %v13750_v58  ;;  %v4694_v50 = vadd.f32 %v4619_v14, %v4524_v34  ;;  %v14140_v49 = vpop.f32.mrf.mxu1 }
 0x215   : > { %14279 = vmatmul.mubr.msk.f32.vlgmr.msra.gmra.mxu1 %vm241_vm3, %v13750_v58  ;;  %v9766_v51 = vpop.permute.xlu0 %9765  ;;  %13757 = vmatprep.subr.msk.mxu0 %vm245_vm2, %v15693_v19  ;;  %v4621_v63 = vpop.f32.mrf.mxu0  ;;  %v9436_v19 = vld [vmem:[%s14544_s20 + $0x8] sm:$0xf]  ;;  %s14494_s20 = smov 104  }
 0x216   : > { %v9768_v4 = vpop.permute.xlu1 %9767  ;;  %13758 = vmatpush1.msk.msra.mxu0 %vm245_vm2, %v15683_v35  ;;  %14281 = vmatprep.subr.mxu1 %v14457_v0  ;;  %v4695_v52 = vadd.f32 %v4621_v63, %v4525_v38 }
 0x217   : > { %9515 = vmatprep.mubr.f32.mxu0 %v14457_v0  ;;  %14282 = vmatpush3.msk.msra.mxu1 %vm245_vm2, %v9434_v48  ;;  %v9773_v1 = vsel %vm9771_vm14, %v9766_v51, %v9768_v4 }
 0x218   : > { %14283 = vmatprep.mubr.msk.f32.mxu1 %vm14459_vm0, %v14457_v0  ;;  %13763 = vmatprep.subr.msk.mxu0 %vm245_vm2, %v15724_v60  ;;  %v4839_v35 = vpop.f32.mrf.mxu1  ;;  %v13762_v60 = vld [vmem:[%s16999_s2 + $0x1b8] sm:$0xff] }
 0x219   : > { %13759 = vmatmul.mubr.msk.f32.vlgmr.msra.gmra.mxu0 %vm241_vm3, %v13756_v57  ;;  %14284 = vmatmul.mubr.msk.f32.vlgmr.msra.gmra.mxu1 %vm241_vm3, %v13756_v57  ;;  %v9764_v55 = vpop.permute.xlu0 %9763  ;;  %v4768_v44 = vpop.f32.mrf.mxu0  ;;  %v4845_v6 = vadd.f32 %v4839_v35, %v4696_v46 }
 0x21a   : > { %13764 = vmatpush1.msk.msra.mxu0 %vm245_vm2, %v15715_v53  ;;  %14286 = vmatprep.subr.mxu1 %v14457_v0  ;;  %v9770_v26 = vpop.permute.xlu1 %9769  ;;  %v4843_v61 = vadd.f32 %v4768_v44, %v4694_v50  ;;  %v14145_v62 = vpop.f32.mrf.mxu1  ;;  %v9772_v12 = vsel %vm9771_vm14, %v9764_v55, %v9766_v51 }
 0x21b   : > { %13769 = vmatprep.subr.msk.mxu0 %vm245_vm2, %v9773_v1  ;;  %14287 = vmatpush3.msk.msra.mxu1 %vm245_vm2, %v9436_v19  ;;  %v4770_v3 = vpop.f32.mrf.mxu0  ;;  %v9774_v53 = vsel %vm9771_vm14, %v9768_v4, %v9770_v26  ;;  %v13786_v26 = vld [vmem:[%s16999_s2 + $0x1d8] sm:$0xff] }
 0x21c   : > { %9673 = vmatprep.mubr.f32.mxu0 %v14457_v0  ;;  %14288 = vmatprep.mubr.msk.f32.mxu1 %vm14459_vm0, %v14457_v0  ;;  %v4844_v15 = vadd.f32 %v4770_v3, %v4695_v52 }
 0x21d   : > { %14291 = vmatprep.subr.mxu1 %v14457_v0  ;;  %13765 = vmatmul.mubr.msk.f32.vlgmr.msra.gmra.mxu0 %vm241_vm3, %v13762_v60  ;;  %v9937_v42 = vpop.permute.xlu0 %9936  ;;  %v4988_v17 = vpop.f32.mrf.mxu1 }
 0x21e   : > { %14289 = vmatmul.mubr.msk.f32.vlgmr.msra.gmra.mxu1 %vm241_vm3, %v13762_v60  ;;  %13770 = vmatpush1.msk.msra.mxu0 %vm245_vm2, %v9772_v12  ;;  %v9939_v11 = vpop.permute.xlu1 %9938  ;;  %v4917_v20 = vpop.f32.mrf.mxu0  ;;  %v4994_v5 = vadd.f32 %v4988_v17, %v4845_v6 }
 0x21f   : > { %14292 = vmatpush3.msk.msra.mxu1 %vm245_vm2, %v9774_v53  ;;  %9848 = vmatprep.mubr.f32.mxu0 %v14457_v0  ;;  %v9943_v59 = vsel %vm9771_vm14, %v9937_v42, %v9939_v11  ;;  %v4992_v21 = vadd.f32 %v4917_v20, %v4843_v61  ;;  %v14150_v24 = vpop.f32.mrf.mxu1 }
 0x220   : > { %13775 = vmatprep.subr.msk.mxu0 %vm245_vm2, %v9943_v59  ;;  %14293 = vmatprep.mubr.msk.f32.mxu1 %vm14459_vm0, %v14457_v0  ;;  %v4919_v27 = vpop.f32.mrf.mxu0 }
 0x221   : > { %13771 = vmatmul.mubr.msk.f32.vlgmr.msra.gmra.mxu0 %vm241_vm3, %v13768_v56  ;;  %v9935_v39 = vpop.permute.xlu0 %9934  ;;  %14296 = vmatprep.subr.mxu1 %v14457_v0  ;;  %v4993_v8 = vadd.f32 %v4919_v27, %v4844_v15 }
 0x222   : > { %v9942_v32 = vsel %vm9771_vm14, %v9935_v39, %v9937_v42  ;;  %v9941_v54 = vpop.permute.xlu1 %9940  ;;  %14294 = vmatmul.mubr.msk.f32.vlgmr.msra.gmra.mxu1 %vm241_vm3, %v13768_v56  ;;  %10018 = vmatprep.mubr.f32.mxu0 %v14457_v0  ;;  %v5163_v29 = vpop.f32.mrf.mxu1 }
 0x223   : > { %v9944_v2 = vsel %vm9771_vm14, %v9939_v11, %v9941_v54  ;;  %13776 = vmatpush1.msk.msra.mxu0 %vm245_vm2, %v9942_v32  ;;  %14298 = vmatprep.mubr.msk.f32.mxu1 %vm14459_vm0, %v14457_v0  ;;  %v5169_v34 = vadd.f32 %v5163_v29, %v4994_v5 }
 0x224   : > { %14297 = vmatpush3.msk.msra.mxu1 %vm245_vm2, %v9944_v2  ;;  %v5092_v37 = vpop.f32.mrf.mxu0  ;;  %v14155_v36 = vpop.f32.mrf.mxu1 }
 0x225   : > { %13777 = vmatmul.mubr.msk.f32.vlgmr.msra.gmra.mxu0 %vm241_vm3, %v13774_v18  ;;  %v10111_v13 = vpop.permute.xlu0 %10110  ;;  %14301 = vmatprep.subr.mxu1 %v14457_v0  ;;  %v5167_v16 = vadd.f32 %v5092_v37, %v4992_v21  ;;  %v13792_v21 = vld [vmem:[%s16999_s2 + $0x1e0] sm:$0xff] }
 0x226   : > { %v10113_v38 = vpop.permute.xlu1 %10112  ;;  %14299 = vmatmul.mubr.msk.f32.vlgmr.msra.gmra.mxu1 %vm241_vm3, %v13774_v18  ;;  %10193 = vmatprep.mubr.f32.mxu0 %v14457_v0  ;;  %v5094_v10 = vpop.f32.mrf.mxu0 }
 0x227   : > { %v10118_v41 = vsel %vm10116_vm15, %v10111_v13, %v10113_v38  ;;  %14303 = vmatprep.mubr.msk.f32.mxu1 %vm14459_vm0, %v14457_v0  ;;  %v5168_v43 = vadd.f32 %v5094_v10, %v4993_v8  ;;  %v5333_v28 = vpop.f32.mrf.mxu1 }
 0x228   : > { %13781 = vmatprep.subr.msk.mxu0 %vm245_vm2, %v10118_v41  ;;  %v5339_v47 = vadd.f32 %v5333_v28, %v5169_v34 }
 0x229   : > { %v10109_v58 = vpop.permute.xlu0 %10108  ;;  %v5262_v9 = vpop.f32.mrf.mxu0 }
 0x22a   : > { %v10117_v45 = vsel %vm10116_vm15, %v10109_v58, %v10111_v13  ;;  %v10115_v40 = vpop.permute.xlu1 %10114  ;;  %v5337_v14 = vadd.f32 %v5262_v9, %v5167_v16  ;;  %v14160_v46 = vpop.f32.mrf.mxu1 }
 0x22b   : > { %v10119_v48 = vsel %vm10116_vm15, %v10113_v38, %v10115_v40  ;;  %13782 = vmatpush1.msk.msra.mxu0 %vm245_vm2, %v10117_v45  ;;  %v5264_v50 = vpop.f32.mrf.mxu0  ;;  %v13798_v38 = vld [vmem:[%s16999_s2 + $0x1e8] sm:$0xff]  ;;  %v13804_v46 = vld [vmem:[%s16999_s2 + $0x1f0] sm:$0xff] }
 0x22c   : > { %14302 = vmatpush3.msk.msra.mxu1 %vm245_vm2, %v10119_v48  ;;  %13783 = vmatmul.mubr.msk.f32.vlgmr.msra.gmra.mxu0 %vm241_vm3, %v13780_v7  ;;  %v5338_v49 = vadd.f32 %v5264_v50, %v5168_v43 }
 0x22d   : > { %v10282_v51 = vpop.permute.xlu0 %10281  ;;  %14306 = vmatprep.subr.mxu1 %v14457_v0  ;;  %14304 = vmatmul.mubr.msk.f32.vlgmr.msra.gmra.mxu1 %vm241_vm3, %v13780_v7  ;;  %v5437_v63 = vpop.f32.mrf.mxu0 }
 0x22e   : > { %v10284_v4 = vpop.permute.xlu1 %10283  ;;  %10363 = vmatprep.mubr.f32.mxu0 %v14457_v0  ;;  %14308 = vmatprep.mubr.msk.f32.mxu1 %vm14459_vm0, %v14457_v0  ;;  %v5512_v57 = vadd.f32 %v5437_v63, %v5337_v14  ;;  %v5508_v52 = vpop.f32.mrf.mxu1 }
 0x22f   : > { %v10288_v19 = vsel %vm10116_vm15, %v10282_v51, %v10284_v4  ;;  %v5439_v35 = vpop.f32.mrf.mxu0  ;;  %v5514_v55 = vadd.f32 %v5508_v52, %v5339_v47  ;;  %v13816_v52 = vld [vmem:[%s16999_s2 + $0x200] sm:$0xff] }
 0x230   : > { %13787 = vmatprep.subr.msk.mxu0 %vm245_vm2, %v10288_v19  ;;  %v5513_v44 = vadd.f32 %v5439_v35, %v5338_v49  ;;  %v14165_v6 = vpop.f32.mrf.mxu1 }
 0x231   : > { %v10280_v1 = vpop.permute.xlu0 %10279  ;;  %v14491_v6 = vmov 0  }
 0x232   : > { %v10287_v60 = vsel %vm10116_vm15, %v10280_v1, %v10282_v51  ;;  %v10286_v61 = vpop.permute.xlu1 %10285  ;;  %v5678_v62 = vpop.f32.mrf.mxu1  ;;  %14426 = vset.pattern.permute.xlu0 %v14491_v6  ;;  %v12466_v1 = vld [vmem:[%s17000_s3] sm:$0xff] }
 0x233   : > { %v10289_v12 = vsel %vm10116_vm15, %v10284_v4, %v10286_v61  ;;  %13788 = vmatpush1.msk.msra.mxu0 %vm245_vm2, %v10287_v60  ;;  %v5607_v3 = vpop.f32.mrf.mxu0  ;;  %v5684_v53 = vadd.f32 %v5678_v62, %v5514_v55  ;;  %12469 = vperm.xlu0 %14426, %v12466_v1  }
 0x234   : > { %14307 = vmatpush3.msk.msra.mxu1 %vm245_vm2, %v10289_v12  ;;  %13789 = vmatmul.mubr.msk.f32.vlgmr.msra.gmra.mxu0 %vm241_vm3, %v13786_v26  ;;  %v5682_v15 = vadd.f32 %v5607_v3, %v5512_v57  ;;  %v14170_v42 = vpop.f32.mrf.mxu1  ;;  %v13822_v12 = vld [vmem:[%s16999_s2 + $0x208] sm:$0xff] }
 0x235   : > { %v10456_v17 = vpop.permute.xlu0 %10455  ;;  %14311 = vmatprep.subr.mxu1 %v14457_v0  ;;  %14309 = vmatmul.mubr.msk.f32.vlgmr.msra.gmra.mxu1 %vm241_vm3, %v13786_v26  ;;  %v5609_v11 = vpop.f32.mrf.mxu0 }
 0x236   : > { %v10458_v56 = vpop.permute.xlu1 %10457  ;;  %10538 = vmatprep.mubr.f32.mxu0 %v14457_v0  ;;  %14313 = vmatprep.mubr.msk.f32.mxu1 %vm14459_vm0, %v14457_v0  ;;  %v5683_v20 = vadd.f32 %v5609_v11, %v5513_v44 }
 0x237   : > { %v10463_v5 = vsel %vm10461_vm1, %v10456_v17, %v10458_v56 }
 0x238   : > { %13793 = vmatprep.subr.msk.mxu0 %vm245_vm2, %v10463_v5 }
 0x239   : > { %v10454_v59 = vpop.permute.xlu0 %10453 }
 0x23a   : > { %v10462_v24 = vsel %vm10461_vm1, %v10454_v59, %v10456_v17  ;;  %v10460_v27 = vpop.permute.xlu1 %10459  ;;  %v5853_v39 = vpop.f32.mrf.mxu1 }
 0x23b   : > { %v10464_v8 = vsel %vm10461_vm1, %v10458_v56, %v10460_v27  ;;  %13794 = vmatpush1.msk.msra.mxu0 %vm245_vm2, %v10462_v24  ;;  %v5782_v32 = vpop.f32.mrf.mxu0  ;;  %v5859_v54 = vadd.f32 %v5853_v39, %v5684_v53 }
 0x23c   : > { %14312 = vmatpush3.msk.msra.mxu1 %vm245_vm2, %v10464_v8  ;;  %13795 = vmatmul.mubr.msk.f32.vlgmr.msra.gmra.mxu0 %vm241_vm3, %v13792_v21  ;;  %v5857_v18 = vadd.f32 %v5782_v32, %v5682_v15  ;;  %v14175_v29 = vpop.f32.mrf.mxu1  ;;  %v13828_v8 = vld [vmem:[%s16999_s2 + $0x210] sm:$0xff] }
 0x23d   : > { %v10627_v2 = vpop.permute.xlu0 %10626  ;;  %14314 = vmatmul.mubr.msk.f32.vlgmr.msra.gmra.mxu1 %vm241_vm3, %v13792_v21  ;;  %14316 = vmatprep.subr.mxu1 %v14457_v0  ;;  %v5784_v34 = vpop.f32.mrf.mxu0 }
 0x23e   : > { %v10629_v37 = vpop.permute.xlu1 %10628  ;;  %10708 = vmatprep.mubr.f32.mxu0 %v14457_v0  ;;  %14318 = vmatprep.mubr.msk.f32.mxu1 %vm14459_vm0, %v14457_v0  ;;  %v5858_v36 = vadd.f32 %v5784_v34, %v5683_v20 }
 0x23f   : > { %v10633_v13 = vsel %vm10461_vm1, %v10627_v2, %v10629_v37 }
 0x240   : > { %13799 = vmatprep.subr.msk.mxu0 %vm245_vm2, %v10633_v13 }
 0x241   : > { %v10625_v16 = vpop.permute.xlu0 %10624 }
 0x242   : > { %v10632_v10 = vsel %vm10461_vm1, %v10625_v16, %v10627_v2  ;;  %v10631_v41 = vpop.permute.xlu1 %10630  ;;  %v6023_v43 = vpop.f32.mrf.mxu1 }
 0x243   : > { %v10634_v28 = vsel %vm10461_vm1, %v10629_v37, %v10631_v41  ;;  %13800 = vmatpush1.msk.msra.mxu0 %vm245_vm2, %v10632_v10  ;;  %v5952_v47 = vpop.f32.mrf.mxu0  ;;  %v6029_v58 = vadd.f32 %v6023_v43, %v5859_v54 }
 0x244   : > { %14317 = vmatpush3.msk.msra.mxu1 %vm245_vm2, %v10634_v28  ;;  %13801 = vmatmul.mubr.msk.f32.vlgmr.msra.gmra.mxu0 %vm241_vm3, %v13798_v38  ;;  %v6027_v7 = vadd.f32 %v5952_v47, %v5857_v18  ;;  %v14180_v9 = vpop.f32.mrf.mxu1  ;;  %v13834_v28 = vld [vmem:[%s16999_s2 + $0x218] sm:$0xff] }
 0x245   : > { %14319 = vmatmul.mubr.msk.f32.vlgmr.msra.gmra.mxu1 %vm241_vm3, %v13798_v38  ;;  %13805 = vmatprep.subr.msk.mxu0 %vm245_vm2, %v14825_v23  ;;  %v11099_v45 = vpop.permute.xlu0 %11098  ;;  %v5954_v40 = vpop.f32.mrf.mxu0 }
 0x246   : > { %14321 = vmatprep.subr.mxu1 %v14457_v0  ;;  %13806 = vmatpush1.msk.msra.mxu0 %vm245_vm2, %v14835_v25  ;;  %v11101_v14 = vpop.permute.xlu1 %11100  ;;  %v6028_v48 = vadd.f32 %v5954_v40, %v5858_v36  ;;  %v13810_v25 = vld [vmem:[%s16999_s2 + $0x1f8] sm:$0xff] }
 0x247   : > { %14322 = vmatpush3.msk.msra.mxu1 %vm245_vm2, %v14822_v22  ;;  %13811 = vmatprep.subr.msk.mxu0 %vm245_vm2, %v14857_v31  ;;  %v11106_v22 = vsel %vm11104_vm4, %v11099_v45, %v11101_v14 }
 0x248   : > { %10857 = vmatprep.mubr.f32.mxu0 %v14457_v0  ;;  %14323 = vmatprep.mubr.msk.f32.mxu1 %vm14459_vm0, %v14457_v0 }
 0x249   : > { %14326 = vmatprep.subr.mxu1 %v14457_v0  ;;  %13807 = vmatmul.mubr.msk.f32.vlgmr.msra.gmra.mxu0 %vm241_vm3, %v13804_v46 }
 0x24a   : > { %14324 = vmatmul.mubr.msk.f32.vlgmr.msra.gmra.mxu1 %vm241_vm3, %v13804_v46  ;;  %13812 = vmatpush1.msk.msra.mxu0 %vm245_vm2, %v14867_v33  ;;  %v11097_v23 = vpop.permute.xlu0 %11096  ;;  %v6198_v31 = vpop.f32.mrf.mxu1 }
 0x24b   : > { %14327 = vmatpush3.msk.msra.mxu1 %vm245_vm2, %v14854_v30  ;;  %v11105_v50 = vsel %vm11104_vm4, %v11097_v23, %v11099_v45  ;;  %13817 = vmatprep.subr.msk.mxu0 %vm245_vm2, %v11106_v22  ;;  %v11103_v49 = vpop.permute.xlu1 %11102  ;;  %v6127_v51 = vpop.f32.mrf.mxu0  ;;  %v6204_v63 = vadd.f32 %v6198_v31, %v6029_v58 }
 0x24c   : > { %v11107_v33 = vsel %vm11104_vm4, %v11101_v14, %v11103_v49  ;;  %11006 = vmatprep.mubr.f32.mxu0 %v14457_v0  ;;  %14328 = vmatprep.mubr.msk.f32.mxu1 %vm14459_vm0, %v14457_v0  ;;  %v6202_v4 = vadd.f32 %v6127_v51, %v6027_v7  ;;  %v14185_v57 = vpop.f32.mrf.mxu1  ;;  %v13840_v49 = vld [vmem:[%s16999_s2 + $0x220] sm:$0xff] }
 0x24d   : > { %14331 = vmatprep.subr.mxu1 %v14457_v0  ;;  %13813 = vmatmul.mubr.msk.f32.vlgmr.msra.gmra.mxu0 %vm241_vm3, %v13810_v25  ;;  %v6129_v30 = vpop.f32.mrf.mxu0 }
 0x24e   : > { %14329 = vmatmul.mubr.msk.f32.vlgmr.msra.gmra.mxu1 %vm241_vm3, %v13810_v25  ;;  %13818 = vmatpush1.msk.msra.mxu0 %vm245_vm2, %v11105_v50  ;;  %v6203_v19 = vadd.f32 %v6129_v30, %v6028_v48 }
 0x24f   : > { %14332 = vmatpush3.msk.msra.mxu1 %vm245_vm2, %v11107_v33  ;;  %v11270_v35 = vpop.permute.xlu0 %11269  ;;  %11181 = vmatprep.mubr.f32.mxu0 %v14457_v0 }
 0x250   : > { %v11272_v55 = vpop.permute.xlu1 %11271  ;;  %14333 = vmatprep.mubr.msk.f32.mxu1 %vm14459_vm0, %v14457_v0  ;;  %14336 = vmatprep.subr.mxu1 %v14457_v0 }
 0x251   : > { %v11276_v44 = vsel %vm11104_vm4, %v11270_v35, %v11272_v55  ;;  %13819 = vmatmul.mubr.msk.f32.vlgmr.msra.gmra.mxu0 %vm241_vm3, %v13816_v52 }
 0x252   : > { %13823 = vmatprep.subr.msk.mxu0 %vm245_vm2, %v11276_v44  ;;  %14334 = vmatmul.mubr.msk.f32.vlgmr.msra.gmra.mxu1 %vm241_vm3, %v13816_v52  ;;  %v6368_v26 = vpop.f32.mrf.mxu1 }
 0x253   : > { %11351 = vmatprep.mubr.f32.mxu0 %v14457_v0  ;;  %14338 = vmatprep.mubr.msk.f32.mxu1 %vm14459_vm0, %v14457_v0  ;;  %v6297_v60 = vpop.f32.mrf.mxu0  ;;  %v6374_v61 = vadd.f32 %v6368_v26, %v6204_v63 }
 0x254   : > { %v11268_v62 = vpop.permute.xlu0 %11267  ;;  %v6372_v3 = vadd.f32 %v6297_v60, %v6202_v4  ;;  %v14190_v53 = vpop.f32.mrf.mxu1  ;;  %v13846_v60 = vld [vmem:[%s16999_s2 + $0x228] sm:$0xff] }
 0x255   : > { %v11275_v15 = vsel %vm11104_vm4, %v11268_v62, %v11270_v35  ;;  %v11274_v42 = vpop.permute.xlu1 %11273  ;;  %v6299_v17 = vpop.f32.mrf.mxu0 }
 0x256   : > { %v11277_v11 = vsel %vm11104_vm4, %v11272_v55, %v11274_v42  ;;  %13824 = vmatpush1.msk.msra.mxu0 %vm245_vm2, %v11275_v15  ;;  %v6373_v56 = vadd.f32 %v6299_v17, %v6203_v19 }
 0x257   : > { %14337 = vmatpush3.msk.msra.mxu1 %vm245_vm2, %v11277_v11  ;;  %13825 = vmatmul.mubr.msk.f32.vlgmr.msra.gmra.mxu0 %vm241_vm3, %v13822_v12 }
 0x258   : > { %v11444_v20 = vpop.permute.xlu0 %11443  ;;  %14341 = vmatprep.subr.mxu1 %v14457_v0  ;;  %14339 = vmatmul.mubr.msk.f32.vlgmr.msra.gmra.mxu1 %vm241_vm3, %v13822_v12 }
 0x259   : > { %v11446_v5 = vpop.permute.xlu1 %11445  ;;  %11526 = vmatprep.mubr.f32.mxu0 %v14457_v0  ;;  %14343 = vmatprep.mubr.msk.f32.mxu1 %vm14459_vm0, %v14457_v0 }
 0x25a   : > { %v11451_v59 = vsel %vm11449_vm5, %v11444_v20, %v11446_v5  ;;  %v6543_v21 = vpop.f32.mrf.mxu1 }
 0x25b   : > { %13829 = vmatprep.subr.msk.mxu0 %vm245_vm2, %v11451_v59  ;;  %v6472_v24 = vpop.f32.mrf.mxu0  ;;  %v6549_v27 = vadd.f32 %v6543_v21, %v6374_v61  ;;  %v13852_v21 = vld [vmem:[%s16999_s2 + $0x230] sm:$0xff] }
 0x25c   : > { %v11442_v39 = vpop.permute.xlu0 %11441  ;;  %v6547_v32 = vadd.f32 %v6472_v24, %v6372_v3  ;;  %v14195_v54 = vpop.f32.mrf.mxu1 }
 0x25d   : > { %v11450_v18 = vsel %vm11449_vm5, %v11442_v39, %v11444_v20  ;;  %v11448_v29 = vpop.permute.xlu1 %11447  ;;  %v6474_v2 = vpop.f32.mrf.mxu0 }
 0x25e   : > { %v11452_v34 = vsel %vm11449_vm5, %v11446_v5, %v11448_v29  ;;  %13830 = vmatpush1.msk.msra.mxu0 %vm245_vm2, %v11450_v18  ;;  %v6548_v37 = vadd.f32 %v6474_v2, %v6373_v56 }
 0x25f   : > { %14342 = vmatpush3.msk.msra.mxu1 %vm245_vm2, %v11452_v34  ;;  %13831 = vmatmul.mubr.msk.f32.vlgmr.msra.gmra.mxu0 %vm241_vm3, %v13828_v8 }
 0x260   : > { %v11615_v36 = vpop.permute.xlu0 %11614  ;;  %14346 = vmatprep.subr.mxu1 %v14457_v0  ;;  %14344 = vmatmul.mubr.msk.f32.vlgmr.msra.gmra.mxu1 %vm241_vm3, %v13828_v8 }
 0x261   : > { %v11617_v13 = vpop.permute.xlu1 %11616  ;;  %11696 = vmatprep.mubr.f32.mxu0 %v14457_v0  ;;  %14348 = vmatprep.mubr.msk.f32.mxu1 %vm14459_vm0, %v14457_v0 }
 0x262   : > { %v11621_v16 = vsel %vm11449_vm5, %v11615_v36, %v11617_v13  ;;  %v6713_v38 = vpop.f32.mrf.mxu1 }
 0x263   : > { %13835 = vmatprep.subr.msk.mxu0 %vm245_vm2, %v11621_v16  ;;  %v6642_v10 = vpop.f32.mrf.mxu0  ;;  %v6719_v41 = vadd.f32 %v6713_v38, %v6549_v27  ;;  %v13858_v16 = vld [vmem:[%s16999_s2 + $0x238] sm:$0xff] }
 0x264   : > { %v11613_v43 = vpop.permute.xlu0 %11612  ;;  %v6717_v47 = vadd.f32 %v6642_v10, %v6547_v32  ;;  %v14200_v58 = vpop.f32.mrf.mxu1 }
 0x265   : > { %v11620_v7 = vsel %vm11449_vm5, %v11613_v43, %v11615_v36  ;;  %v11619_v9 = vpop.permute.xlu1 %11618  ;;  %v6644_v45 = vpop.f32.mrf.mxu0 }
 0x266   : > { %v11622_v40 = vsel %vm11449_vm5, %v11617_v13, %v11619_v9  ;;  %13836 = vmatpush1.msk.msra.mxu0 %vm245_vm2, %v11620_v7  ;;  %v6718_v14 = vadd.f32 %v6644_v45, %v6548_v37 }
 0x267   : > { %14347 = vmatpush3.msk.msra.mxu1 %vm245_vm2, %v11622_v40  ;;  %13837 = vmatmul.mubr.msk.f32.vlgmr.msra.gmra.mxu0 %vm241_vm3, %v13834_v28 }
 0x268   : > { %v11789_v46 = vpop.permute.xlu0 %11788  ;;  %14351 = vmatprep.subr.mxu1 %v14457_v0  ;;  %14349 = vmatmul.mubr.msk.f32.vlgmr.msra.gmra.mxu1 %vm241_vm3, %v13834_v28 }
 0x269   : > { %v11791_v48 = vpop.permute.xlu1 %11790  ;;  %11871 = vmatprep.mubr.f32.mxu0 %v14457_v0  ;;  %14353 = vmatprep.mubr.msk.f32.mxu1 %vm14459_vm0, %v14457_v0 }
 0x26a   : > { %v11796_v23 = vsel %vm11794_vm6, %v11789_v46, %v11791_v48  ;;  %v6817_v22 = vpop.f32.mrf.mxu0 }
 0x26b   : > { %13841 = vmatprep.subr.msk.mxu0 %vm245_vm2, %v11796_v23  ;;  %v6892_v25 = vadd.f32 %v6817_v22, %v6717_v47  ;;  %v6888_v31 = vpop.f32.mrf.mxu1 }
 0x26c   : > { %v11787_v50 = vpop.permute.xlu0 %11786  ;;  %v6819_v51 = vpop.f32.mrf.mxu0  ;;  %v6894_v63 = vadd.f32 %v6888_v31, %v6719_v41 }
 0x26d   : > { %v11795_v33 = vsel %vm11794_vm6, %v11787_v50, %v11789_v46  ;;  %v11793_v4 = vpop.permute.xlu1 %11792  ;;  %v6893_v57 = vadd.f32 %v6819_v51, %v6718_v14  ;;  %v14205_v30 = vpop.f32.mrf.mxu1 }
 0x26e   : > { %v11797_v52 = vsel %vm11794_vm6, %v11791_v48, %v11793_v4  ;;  %13842 = vmatpush1.msk.msra.mxu0 %vm245_vm2, %v11795_v33 }
 0x26f   : > { %14352 = vmatpush3.msk.msra.mxu1 %vm245_vm2, %v11797_v52  ;;  %13843 = vmatmul.mubr.msk.f32.vlgmr.msra.gmra.mxu0 %vm241_vm3, %v13840_v49 }
 0x270   : > { %v11960_v19 = vpop.permute.xlu0 %11959  ;;  %14356 = vmatprep.subr.mxu1 %v14457_v0  ;;  %14354 = vmatmul.mubr.msk.f32.vlgmr.msra.gmra.mxu1 %vm241_vm3, %v13840_v49 }
 0x271   : > { %v11962_v35 = vpop.permute.xlu1 %11961  ;;  %12041 = vmatprep.mubr.f32.mxu0 %v14457_v0  ;;  %14358 = vmatprep.mubr.msk.f32.mxu1 %vm14459_vm0, %v14457_v0 }
 0x272   : > { %v11966_v55 = vsel %vm11794_vm6, %v11960_v19, %v11962_v35  ;;  %v6987_v44 = vpop.f32.mrf.mxu0 }
 0x273   : > { %13847 = vmatprep.subr.msk.mxu0 %vm245_vm2, %v11966_v55  ;;  %v16222_v6 = vadd.f32 %v6987_v44, %v6892_v25  ;;  %v7058_v1 = vpop.f32.mrf.mxu1 }
 0x274   : > { %v11958_v26 = vpop.permute.xlu0 %11957  ;;  %v6989_v61 = vpop.f32.mrf.mxu0  ;;  %v7064_v62 = vadd.f32 %v7058_v1, %v6894_v63 }
 0x275   : > { %v11965_v12 = vsel %vm11794_vm6, %v11958_v26, %v11960_v19  ;;  %v11964_v3 = vpop.permute.xlu1 %11963  ;;  %v7063_v53 = vadd.f32 %v6989_v61, %v6893_v57  ;;  %v14210_v15 = vpop.f32.mrf.mxu1 }
 0x276   : > { %v11967_v42 = vsel %vm11794_vm6, %v11962_v35, %v11964_v3  ;;  %13848 = vmatpush1.msk.msra.mxu0 %vm245_vm2, %v11965_v12 }
 0x277   : > { %14357 = vmatpush3.msk.msra.mxu1 %vm245_vm2, %v11967_v42  ;;  %13849 = vmatmul.mubr.msk.f32.vlgmr.msra.gmra.mxu0 %vm241_vm3, %v13846_v60 }
 0x278   : > { %v12134_v17 = vpop.permute.xlu0 %12133  ;;  %14361 = vmatprep.subr.mxu1 %v14457_v0  ;;  %14359 = vmatmul.mubr.msk.f32.vlgmr.msra.gmra.mxu1 %vm241_vm3, %v13846_v60 }
 0x279   : > { %v12136_v11 = vpop.permute.xlu1 %12135  ;;  %12216 = vmatprep.mubr.f32.mxu0 %v14457_v0  ;;  %14363 = vmatprep.mubr.msk.f32.mxu1 %vm14459_vm0, %v14457_v0 }
 0x27a   : > { %v12141_v56 = vsel %vm12139_vm7, %v12134_v17, %v12136_v11  ;;  %v16238_v20 = vpop.f32.mrf.mxu0 }
 0x27b   : > { %13853 = vmatprep.subr.msk.mxu0 %vm245_vm2, %v12141_v56  ;;  %v7233_v5 = vpop.f32.mrf.mxu1 }
 0x27c   : > { %v12132_v59 = vpop.permute.xlu0 %12131  ;;  %v7164_v24 = vpop.f32.mrf.mxu0  ;;  %v7239_v27 = vadd.f32 %v7233_v5, %v7064_v62 }
 0x27d   : > { %v12140_v39 = vsel %vm12139_vm7, %v12132_v59, %v12134_v17  ;;  %v12138_v8 = vpop.permute.xlu1 %12137  ;;  %v7238_v32 = vadd.f32 %v7164_v24, %v7063_v53  ;;  %v14215_v54 = vpop.f32.mrf.mxu1 }
 0x27e   : > { %v12142_v18 = vsel %vm12139_vm7, %v12136_v11, %v12138_v8  ;;  %13854 = vmatpush1.msk.msra.mxu0 %vm245_vm2, %v12140_v39 }
 0x27f   : > { %14362 = vmatpush3.msk.msra.mxu1 %vm245_vm2, %v12142_v18  ;;  %13855 = vmatmul.mubr.msk.f32.vlgmr.msra.gmra.mxu0 %vm241_vm3, %v13852_v21 }
 0x280   : > { %v12305_v29 = vpop.permute.xlu0 %12304  ;;  %14366 = vmatprep.subr.mxu1 %v14457_v0  ;;  %14364 = vmatmul.mubr.msk.f32.vlgmr.msra.gmra.mxu1 %vm241_vm3, %v13852_v21 }
 0x281   : > { %v12307_v2 = vpop.permute.xlu1 %12306  ;;  %12386 = vmatprep.mubr.f32.mxu0 %v14457_v0  ;;  %14368 = vmatprep.mubr.msk.f32.mxu1 %vm14459_vm0, %v14457_v0  ;;  %vm12533_vm0 = vcmask 122880  }
 0x282   : > { %v12311_v34 = vsel %vm12139_vm7, %v12305_v29, %v12307_v2  ;;  %v16255_v37 = vpop.f32.mrf.mxu0 }
 0x283   : > { %13859 = vmatprep.subr.msk.mxu0 %vm245_vm2, %v12311_v34  ;;  %v7403_v36 = vpop.f32.mrf.mxu1 }
 0x284   : > { %v12303_v13 = vpop.permute.xlu0 %12302  ;;  %v7334_v38 = vpop.f32.mrf.mxu0  ;;  %v7409_v10 = vadd.f32 %v7403_v36, %v7239_v27 }
 0x285   : > { %v12310_v41 = vsel %vm12139_vm7, %v12303_v13, %v12305_v29  ;;  %v12309_v43 = vpop.permute.xlu1 %12308  ;;  %v7408_v28 = vadd.f32 %v7334_v38, %v7238_v32  ;;  %v14220_v47 = vpop.f32.mrf.mxu1 }
 0x286   : > { %v12312_v0 = vsel %vm12139_vm7, %v12307_v2, %v12309_v43  ;;  %13860 = vmatpush1.msk.msra.mxu0 %vm245_vm2, %v12310_v41 }
 0x287   : > { %14367 = vmatpush3.msk.msra.mxu1 %vm245_vm2, %v12312_v0  ;;  %13861 = vmatmul.mubr.msk.f32.vlgmr.msra.gmra.mxu0 %vm241_vm3, %v13858_v16  ;;  %vm12849_vm2 = vcmask 64512  }
 0x288   : > { %14369 = vmatmul.mubr.msk.f32.vlgmr.msra.gmra.mxu1 %vm241_vm3, %v13858_v16 }
 0x28b   : > { %v16267_v58 = vpop.f32.mrf.mxu0 }
 0x28c   : > { %v7578_v7 = vpop.f32.mrf.mxu1 }
 0x28d   : > { %v7509_v9 = vpop.f32.mrf.mxu0  ;;  %v7584_v45 = vadd.f32 %v7578_v7, %v7409_v10 }
 0x28e   : > { %v7583_v40 = vadd.f32 %v7509_v9, %v7408_v28  ;;  %v14225_v14 = vpop.f32.mrf.mxu1 }
 0x295   : > { %v7748_v46 = vpop.f32.mrf.mxu1 }
 0x296   : > { %v16269_v48 = vpop.f32.mrf.mxu0  ;;  %v7754_v23 = vadd.f32 %v7748_v46, %v7584_v45 }
 0x297   : > { %v14230_v22 = vpop.f32.mrf.mxu1 }
 0x298   : > { %v7679_v25 = vpop.f32.mrf.mxu0 }
 0x299   : > { %v7753_v31 = vadd.f32 %v7679_v25, %v7583_v40 }
 0x29b   : > { %v7897_v50 = vpop.f32.mrf.mxu1 }
 0x29c   : > { %v16271_v49 = vpop.f32.mrf.mxu0  ;;  %v7903_v51 = vadd.f32 %v7897_v50, %v7754_v23 }
 0x29d   : > { %v14235_v63 = vpop.f32.mrf.mxu1 }
 0x29e   : > { %v7828_v33 = vpop.f32.mrf.mxu0 }
 0x29f   : > { %v7902_v4 = vadd.f32 %v7828_v33, %v7753_v31 }
 0x2a0   : > { %v8046_v57 = vpop.f32.mrf.mxu1 }
 0x2a1   : > { %v16273_v30 = vpop.f32.mrf.mxu0  ;;  %v8052_v52 = vadd.f32 %v8046_v57, %v7903_v51 }
 0x2a2   : > { %v14240_v19 = vpop.f32.mrf.mxu1 }
 0x2a3   : > { %v7977_v35 = vpop.f32.mrf.mxu0 }
 0x2a4   : > { %v8051_v55 = vadd.f32 %v7977_v35, %v7902_v4 }
 0x2a5   : > { %v16275_v44 = vpop.f32.mrf.mxu0  ;;  %v8221_v1 = vpop.f32.mrf.mxu1 }
 0x2a6   : > { %v8227_v26 = vadd.f32 %v8221_v1, %v8052_v52 }
 0x2a7   : > { %v8152_v60 = vpop.f32.mrf.mxu0  ;;  %v14245_v61 = vpop.f32.mrf.mxu1 }
 0x2a8   : > { %v8226_v62 = vadd.f32 %v8152_v60, %v8051_v55 }
 0x2a9   : > { %v16277_v12 = vpop.f32.mrf.mxu0 }
 0x2ab   : > { %v8322_v3 = vpop.f32.mrf.mxu0 }
 0x2ac   : > { %v8396_v53 = vadd.f32 %v8322_v3, %v8226_v62  ;;  %v8391_v15 = vpop.f32.mrf.mxu1 }
 0x2ad   : > { %v8397_v42 = vadd.f32 %v8391_v15, %v8227_v26 }
 0x2ae   : > { %v16279_v17 = vpop.f32.mrf.mxu0  ;;  %v14250_v11 = vpop.f32.mrf.mxu1 }
 0x2b0   : > { %v8497_v56 = vpop.f32.mrf.mxu0 }
 0x2b1   : > { %v8571_v5 = vadd.f32 %v8497_v56, %v8396_v53  ;;  %v8566_v59 = vpop.f32.mrf.mxu1 }
 0x2b2   : > { %v8572_v21 = vadd.f32 %v8566_v59, %v8397_v42 }
 0x2b3   : > { %v14255_v24 = vpop.f32.mrf.mxu1 }
 0x2b4   : > { %v16281_v27 = vpop.f32.mrf.mxu0 }
 0x2b5   : > { %v8736_v39 = vpop.f32.mrf.mxu1 }
 0x2b6   : > { %v8667_v8 = vpop.f32.mrf.mxu0  ;;  %v8742_v32 = vadd.f32 %v8736_v39, %v8572_v21 }
 0x2b7   : > { %v8741_v54 = vadd.f32 %v8667_v8, %v8571_v5  ;;  %v14260_v18 = vpop.f32.mrf.mxu1 }
 0x2bc   : > { %v16283_v29 = vpop.f32.mrf.mxu0 }
 0x2bd   : > { %v8911_v2 = vpop.f32.mrf.mxu1 }
 0x2be   : > { %v8842_v34 = vpop.f32.mrf.mxu0  ;;  %v8917_v36 = vadd.f32 %v8911_v2, %v8742_v32 }
 0x2bf   : > { %v8916_v13 = vadd.f32 %v8842_v34, %v8741_v54  ;;  %v14265_v16 = vpop.f32.mrf.mxu1 }
 0x2c4   : > { %v16285_v38 = vpop.f32.mrf.mxu0 }
 0x2c5   : > { %v9081_v10 = vpop.f32.mrf.mxu1 }
 0x2c6   : > { %v9012_v41 = vpop.f32.mrf.mxu0  ;;  %v9087_v43 = vadd.f32 %v9081_v10, %v8917_v36 }
 0x2c7   : > { %v9086_v28 = vadd.f32 %v9012_v41, %v8916_v13  ;;  %v14270_v47 = vpop.f32.mrf.mxu1 }
 0x2cc   : > { %v16287_v0 = vpop.f32.mrf.mxu0 }
 0x2cd   : > { %v9256_v7 = vpop.f32.mrf.mxu1 }
 0x2ce   : > { %v9187_v9 = vpop.f32.mrf.mxu0  ;;  %v9262_v45 = vadd.f32 %v9256_v7, %v9087_v43 }
 0x2cf   : > { %v9261_v40 = vadd.f32 %v9187_v9, %v9086_v28  ;;  %v14275_v14 = vpop.f32.mrf.mxu1 }
 0x2d4   : > { %v16289_v46 = vpop.f32.mrf.mxu0 }
 0x2d5   : > { %v9426_v23 = vpop.f32.mrf.mxu1 }
 0x2d6   : > { %v9357_v22 = vpop.f32.mrf.mxu0  ;;  %v9432_v25 = vadd.f32 %v9426_v23, %v9262_v45 }
 0x2d7   : > { %v9431_v31 = vadd.f32 %v9357_v22, %v9261_v40  ;;  %v14280_v50 = vpop.f32.mrf.mxu1 }
 0x2d9   : > { %v16291_v51 = vpop.f32.mrf.mxu0  ;;  %v9588_v63 = vpop.f32.mrf.mxu1 }
 0x2da   : > { %v9594_v33 = vadd.f32 %v9588_v63, %v9432_v25 }
 0x2db   : > { %v9519_v4 = vpop.f32.mrf.mxu0  ;;  %v14285_v57 = vpop.f32.mrf.mxu1 }
 0x2dc   : > { %v9593_v52 = vadd.f32 %v9519_v4, %v9431_v31  ;;  %v7237_v31 = vadd.f32 %v16238_v20, %v16222_v6 }
 0x2dd   : > { %v16293_v19 = vpop.f32.mrf.mxu0 }
 0x2de   : > { %v9746_v35 = vpop.f32.mrf.mxu1  ;;  %v7407_v4 = vadd.f32 %v16255_v37, %v7237_v31 }
 0x2df   : > { %v9677_v55 = vpop.f32.mrf.mxu0  ;;  %v9752_v1 = vadd.f32 %v9746_v35, %v9594_v33 }
 0x2e0   : > { %v9751_v26 = vadd.f32 %v9677_v55, %v9593_v52  ;;  %v14290_v60 = vpop.f32.mrf.mxu1  ;;  %v7582_v52 = vadd.f32 %v16267_v58, %v7407_v4 }
 0x2e1   : > { %v16295_v61 = vpop.f32.mrf.mxu0 }
 0x2e2   : > { %v9921_v62 = vpop.f32.mrf.mxu1 }
 0x2e3   : > { %v9852_v3 = vpop.f32.mrf.mxu0  ;;  %v9927_v53 = vadd.f32 %v9921_v62, %v9752_v1 }
 0x2e4   : > { %v9926_v15 = vadd.f32 %v9852_v3, %v9751_v26  ;;  %v14295_v42 = vpop.f32.mrf.mxu1  ;;  %v7752_v26 = vadd.f32 %v16269_v48, %v7582_v52 }
 0x2e5   : > { %v16297_v11 = vpop.f32.mrf.mxu0 }
 0x2e6   : > { %v10091_v56 = vpop.f32.mrf.mxu1  ;;  %v7901_v62 = vadd.f32 %v16271_v49, %v7752_v26 }
 0x2e7   : > { %v10022_v5 = vpop.f32.mrf.mxu0  ;;  %v10097_v59 = vadd.f32 %v10091_v56, %v9927_v53 }
 0x2e8   : > { %v10096_v21 = vadd.f32 %v10022_v5, %v9926_v15  ;;  %v14300_v24 = vpop.f32.mrf.mxu1  ;;  %v8050_v6 = vadd.f32 %v16273_v30, %v7901_v62 }
 0x2ea   : > { %v8225_v42 = vadd.f32 %v16275_v44, %v8050_v6  ;;  %v14492_v6 = vmov 1966171168  }
 0x2ec   : > { %v16299_v39 = vpop.f32.mrf.mxu0  ;;  %v8395_v56 = vadd.f32 %v16277_v12, %v8225_v42 }
 0x2ed   : > { %v10266_v8 = vpop.f32.mrf.mxu1 }
 0x2ee   : > { %v10197_v32 = vpop.f32.mrf.mxu0  ;;  %v10272_v54 = vadd.f32 %v10266_v8, %v10097_v59  ;;  %v8570_v59 = vadd.f32 %v16279_v17, %v8395_v56 }
 0x2ef   : > { %v10271_v18 = vadd.f32 %v10197_v32, %v10096_v21  ;;  %v14305_v2 = vpop.f32.mrf.mxu1 }
 0x2f0   : > { %v8740_v24 = vadd.f32 %v16281_v27, %v8570_v59 }
 0x2f2   : > { %v8915_v49 = vadd.f32 %v16283_v29, %v8740_v24 }
 0x2f4   : > { %v16301_v34 = vpop.f32.mrf.mxu0  ;;  %v9085_v32 = vadd.f32 %v16285_v38, %v8915_v49  ;;  %v12470_v49 = vpop.permute.xlu0 %12469 }
 0x2f5   : > { %v10436_v36 = vpop.f32.mrf.mxu1 }
 0x2f6   : > { %v10367_v13 = vpop.f32.mrf.mxu0  ;;  %v10442_v16 = vadd.f32 %v10436_v36, %v10272_v54  ;;  %v9260_v44 = vadd.f32 %v16287_v0, %v9085_v32 }
 0x2f7   : > { %v10441_v10 = vadd.f32 %v10367_v13, %v10271_v18  ;;  %v14310_v41 = vpop.f32.mrf.mxu1 }
 0x2f8   : > { %v9430_v12 = vadd.f32 %v16289_v46, %v9260_v44 }
 0x2fa   : > { %v9592_v36 = vadd.f32 %v16291_v51, %v9430_v12 }
 0x2fc   : > { %v10540_v43 = vpop.f32.mrf.mxu0  ;;  %v9750_v13 = vadd.f32 %v16293_v19, %v9592_v36 }
 0x2fd   : > { %v10611_v28 = vpop.f32.mrf.mxu1 }
 0x2fe   : > { %v10542_v47 = vpop.f32.mrf.mxu0  ;;  %v10617_v7 = vadd.f32 %v10611_v28, %v10442_v16  ;;  %v9925_v29 = vadd.f32 %v16295_v61, %v9750_v13 }
 0x2ff   : > { %v16303_v9 = vadd.f32 %v10542_v47, %v10441_v10  ;;  %v14315_v45 = vpop.f32.mrf.mxu1 }
 0x300   : > { %v10095_v38 = vadd.f32 %v16297_v11, %v9925_v29 }
 0x302   : > { %v10270_v0 = vadd.f32 %v16299_v39, %v10095_v38 }
 0x304   : > { %v10710_v40 = vpop.f32.mrf.mxu0 }
 0x305   : > { %v10781_v14 = vpop.f32.mrf.mxu1 }
 0x306   : > { %v10787_v23 = vadd.f32 %v10781_v14, %v10617_v7  ;;  %v10712_v22 = vpop.f32.mrf.mxu0  ;;  %v10440_v7 = vadd.f32 %v16301_v34, %v10270_v0 }
 0x307   : > { %v14320_v25 = vpop.f32.mrf.mxu1  ;;  %v10786_v31 = vadd.f32 %v10712_v22, %v16303_v9  ;;  %v12478_v9 = vunpack.c.l.s4 %v14492_v6  ;;  %v12480_v22 = vlaneseq }
 0x308   : > { %v10615_v51 = vadd.f32 %v10540_v43, %v10440_v7 }
 0x309   : > { %v10859_v63 = vpop.f32.mrf.mxu0 }
 0x30a   : > { %v10930_v50 = vpop.f32.mrf.mxu1  ;;  %v10785_v19 = vadd.f32 %v10710_v40, %v10615_v51 }
 0x30b   : > { %v10936_v33 = vadd.f32 %v10930_v50, %v10787_v23  ;;  %v10861_v55 = vpop.f32.mrf.mxu0 }
 0x30c   : > { %v14325_v57 = vpop.f32.mrf.mxu1  ;;  %v10934_v50 = vadd.f32 %v10859_v63, %v10785_v19  ;;  %v10935_v61 = vadd.f32 %v10861_v55, %v10786_v31 }
 0x30d   : > { %v11008_v53 = vpop.f32.mrf.mxu0 }
 0x30e   : > { %v11079_v35 = vpop.f32.mrf.mxu1 }
 0x30f   : > { %v11085_v1 = vadd.f32 %v11079_v35, %v10936_v33  ;;  %v11010_v37 = vpop.f32.mrf.mxu0  ;;  %v11083_v33 = vadd.f32 %v11008_v53, %v10934_v50 }
 0x310   : > { %v14330_v60 = vpop.f32.mrf.mxu1  ;;  %v11084_v52 = vadd.f32 %v11010_v37, %v10935_v61 }
 0x311   : > { %v11183_v48 = vpop.f32.mrf.mxu0 }
 0x312   : > { %v11254_v3 = vpop.f32.mrf.mxu1  ;;  %v11258_v39 = vadd.f32 %v11183_v48, %v11083_v33 }
 0x313   : > { %v11260_v15 = vadd.f32 %v11254_v3, %v11085_v1  ;;  %v11185_v8 = vpop.f32.mrf.mxu0 }
 0x314   : > { %v14335_v20 = vpop.f32.mrf.mxu1  ;;  %v11259_v34 = vadd.f32 %v11185_v8, %v11084_v52 }
 0x317   : > { %v11353_v2 = vpop.f32.mrf.mxu0 }
 0x318   : > { %v11424_v58 = vpop.f32.mrf.mxu1  ;;  %v11428_v26 = vadd.f32 %v11353_v2, %v11258_v39 }
 0x319   : > { %v11430_v5 = vadd.f32 %v11424_v58, %v11260_v15  ;;  %v11355_v17 = vpop.f32.mrf.mxu0  ;;  %v12479_v58 = vunpack.c.0.s8 %v12478_v9 }
 0x31a   : > { %v14340_v21 = vpop.f32.mrf.mxu1  ;;  %v11429_v60 = vadd.f32 %v11355_v17, %v11259_v34 }
 0x31f   : > { %v11528_v27 = vpop.f32.mrf.mxu0 }
 0x320   : > { %v11599_v30 = vpop.f32.mrf.mxu1  ;;  %v11603_v43 = vadd.f32 %v11528_v27, %v11428_v26 }
 0x321   : > { %v11605_v54 = vadd.f32 %v11599_v30, %v11430_v5  ;;  %v11530_v28 = vpop.f32.mrf.mxu0  ;;  %v16327_v5 = vshrl.u32 %v12480_v22, 7 }
 0x322   : > { %v14345_v18 = vpop.f32.mrf.mxu1  ;;  %v11604_v3 = vadd.f32 %v11530_v28, %v11429_v60 }
 0x323   : > { %v16330_v30 = vsub.s32 %v12479_v58, %v16327_v5  ;;  %v16335_v27 = vsub.s32 0, %v16327_v5 }
 0x327   : > { %v11698_v47 = vpop.f32.mrf.mxu0 }
 0x328   : > { %v11769_v16 = vpop.f32.mrf.mxu1  ;;  %v11773_v40 = vadd.f32 %v11698_v47, %v11603_v43 }
 0x329   : > { %v11775_v10 = vadd.f32 %v11769_v16, %v11605_v54  ;;  %v11700_v23 = vpop.f32.mrf.mxu0 }
 0x32a   : > { %v14350_v41 = vpop.f32.mrf.mxu1  ;;  %v11774_v53 = vadd.f32 %v11700_v23, %v11604_v3 }
 0x32f   : > { %v11873_v25 = vpop.f32.mrf.mxu0 }
 0x330   : > { %v11944_v46 = vpop.f32.mrf.mxu1  ;;  %v11948_v20 = vadd.f32 %v11873_v25, %v11773_v40 }
 0x331   : > { %v11950_v45 = vadd.f32 %v11944_v46, %v11775_v10  ;;  %v11875_v11 = vpop.f32.mrf.mxu0 }
 0x332   : > { %v14355_v14 = vpop.f32.mrf.mxu1  ;;  %v11949_v37 = vadd.f32 %v11875_v11, %v11774_v53 }
 0x337   : > { %v12043_v1 = vpop.f32.mrf.mxu0 }
 0x338   : > { %v12114_v4 = vpop.f32.mrf.mxu1  ;;  %v12118_v56 = vadd.f32 %v12043_v1, %v11948_v20 }
 0x339   : > { %v12120_v57 = vadd.f32 %v12114_v4, %v11950_v45  ;;  %v12045_v62 = vpop.f32.mrf.mxu0 }
 0x33a   : > { %v14360_v35 = vpop.f32.mrf.mxu1  ;;  %v12119_v21 = vadd.f32 %v12045_v62, %v11949_v37 }
 0x33f   : > { %v12218_v63 = vpop.f32.mrf.mxu0 }
 0x340   : > { %v12289_v15 = vpop.f32.mrf.mxu1  ;;  %v12293_v48 = vadd.f32 %v12218_v63, %v12118_v56 }
 0x341   : > { %v12295_v55 = vadd.f32 %v12289_v15, %v12120_v57  ;;  %v12220_v59 = vpop.f32.mrf.mxu0 }
 0x342   : > { %v14365_v42 = vpop.f32.mrf.mxu1  ;;  %v12294_v8 = vadd.f32 %v12220_v59, %v12119_v21 }
 0x347   : > { %v12388_v24 = vpop.f32.mrf.mxu0 }
 0x348   : > { %v12463_v32 = vadd.f32 %v12388_v24, %v12293_v48  ;;  %v12459_v54 = vpop.f32.mrf.mxu1 }
 0x349   : > { %v12390_v44 = vpop.f32.mrf.mxu0  ;;  %v12465_v18 = vadd.f32 %v12459_v54, %v12295_v55 }
 0x34a   : > { %v12472_v2 = vadd.f32 %v12470_v49, %v12463_v32  ;;  %v12464_v12 = vadd.f32 %v12390_v44, %v12294_v8  ;;  %v14370_v36 = vpop.f32.mrf.mxu1 }
 0x34b   : > { %v12474_v17 = vadd.f32 %v12470_v49, %v12465_v18 }
 0x34c   : > { %v12483_v13 = vrot.slane %v12472_v2, %v16330_v30  ;;  %v12473_v16 = vadd.f32 %v12470_v49, %v12464_v12  ;;  %v12476_v51 = vcombine.high %v12472_v2, %v12472_v2 }
 0x34d   : > { %v13116_v10 = vcombine.high %v12474_v17, %v12474_v17  ;;  %v13123_v29 = vrot.slane %v12474_v17, %v16330_v30 }
 0x34e   : > { %v12703_v41 = vcombine.low %v12472_v2, %v12473_v16  ;;  %v12704_v38 = vcombine.high %v12472_v2, %v12473_v16  ;;  %v12874_v28 = vcombine.high %v12473_v16, %v12473_v16  ;;  %v12881_v0 = vrot.slane %v12473_v16, %v16330_v30 }
 0x34f   : > { %v13130_v47 = vrot.slane %v13116_v10, %v16330_v30  ;;  %v13131_v7 = vcombine.high %v13123_v29, %v13123_v29  ;;  %v13139_v46 = vrot.slane %v13123_v29, %v16330_v30  ;;  %v12499_v45 = vrot.slane %v12483_v13, %v16330_v30 }
 0x350   : > { %v16348_v14 = vrot.slane %v12703_v41, %v16330_v30  ;;  %v12888_v23 = vrot.slane %v12874_v28, %v16330_v30  ;;  %v16352_v19 = vrot.slane %v12704_v38, %v16330_v30  ;;  %v12889_v61 = vcombine.high %v12881_v0, %v12881_v0 }
 0x351   : > { %v13132_v25 = vcombine.high %v13130_v47, %v13130_v47  ;;  %v16355_v31 = vrot.slane %v13130_v47, %v16330_v30  ;;  %v16358_v50 = vrot.slane %v13131_v7, %v16330_v30  ;;  %12534 = vst.msk [vmem:[%s16341_s12] sm:$0x1] %vm12533_vm0, %v12499_v45  ;;  %v13161_v33 = vcombine.high %v13139_v46, %v13139_v46 }
 0x352   : > { %v16363_v4 = vrot.slane %v13139_v46, %v16335_v27  ;;  %v12545_v11 = vrot.slane %v12499_v45, %v16335_v27  ;;  %v16367_v57 = vrot.slane %v12881_v0, %v16330_v30  ;;  %v12491_v34 = vcombine.high %v12483_v13, %v12483_v13 }
 0x353   : > { %v16370_v52 = vrot.slane %v13132_v25, %v16330_v30  ;;  %v16374_v39 = vrot.slane %v16358_v50, %v16335_v27  ;;  %v16377_v35 = vrot.slane %v13161_v33, %v16335_v27  ;;  %v16381_v1 = vrot.slane %v16355_v31, %v16335_v27 }
 0x354   : > { %12606 = vrot.lane.b32.xlu0 %v12545_v11, %s14493_s16  ;;  %12574 = vrot.lane.b32.xlu1 %v12545_v11, %s14494_s20  ;;  %v12521_v26 = vcombine.high %v12499_v45, %v12499_v45  ;;  %v12490_v60 = vrot.slane %v12476_v51, %v16330_v30  ;;  %v12513_v43 = vrot.slane %v12491_v34, %v16330_v30  ;;  %v12759_v34 = vsub.s32 1, %v16327_v5 }
 0x355   : > { %v16389_v62 = vrot.slane %v16348_v14, %v16330_v30  ;;  %v16393_v3 = vrot.slane %v16352_v19, %v16330_v30  ;;  %v16396_v40 = vrot.slane %v12889_v61, %v16330_v30  ;;  %v12919_v9 = vcombine.high %v16367_v57, %v16367_v57 }
 0x356   : > { %12536 = vst.msk [vmem:[%s16341_s12 + $0x20] sm:$0x1] %vm12533_vm0, %v12521_v26  ;;  %v12506_v15 = vrot.slane %v12490_v60, %v16330_v30  ;;  %v12492_v6 = vcombine.high %v12490_v60, %v12490_v60  ;;  %v12549_v22 = vrot.slane %v12513_v43, %v16335_v27  ;;  %12535 = vst.msk [vmem:[%s16341_s12 + $0x10] sm:$0x1] %vm12533_vm0, %v12513_v43 }
 0x357   : > { %v12523_v63 = vcombine.high %v12513_v43, %v12513_v43  ;;  %v12890_v55 = vcombine.high %v12888_v23, %v12888_v23  ;;  %v13162_v42 = vcombine.high %v16355_v31, %v16355_v31  ;;  %v12756_v37 = vrot.slane %v16389_v62, %v16335_v27 }
 0x358   : > { %12638 = vrot.lane.b32.xlu0 %v12545_v11, %s14490_s29  ;;  %12538 = vst.msk [vmem:[%s16341_s12 + $0x40] sm:$0x1] %vm12533_vm0, %v12506_v15  ;;  %v12520_v53 = vrot.slane %v12492_v6, %v16330_v30  ;;  %v16410_v20 = vcombine.high %v12506_v15, %v12506_v15  ;;  %12576 = vrot.lane.b32.xlu1 %v12549_v22, %s14494_s20 }
 0x359   : > { %12537 = vst.msk [vmem:[%s16341_s12 + $0x30] sm:$0x1] %vm12533_vm0, %v12523_v63  ;;  %v12788_v56 = vrot.slane %v16393_v3, %v16335_v27  ;;  %v16422_v58 = vrot.slane %v12919_v9, %v16335_v27  ;;  %v13163_v59 = vcombine.high %v16358_v50, %v16358_v50  ;;  %v13164_v21 = vcombine.high %v16370_v52, %v16370_v52 }
 0x35a   : > { %12539 = vst.msk [vmem:[%s16341_s12 + $0x50] sm:$0x1] %vm12533_vm0, %v12520_v53  ;;  %12540 = vst.msk [vmem:[%s16341_s12 + $0x60] sm:$0x1] %vm12533_vm0, %v16410_v20  ;;  %v12524_v48 = vcombine.high %v12520_v53, %v12520_v53  ;;  %v12904_v24 = vrot.slane %v12888_v23, %v16330_v30  ;;  %v12719_v49 = vcombine.high %v16348_v14, %v16348_v14 }
 0x35b   : > { %v16439_v8 = vcombine.high %v16389_v62, %v16389_v62  ;;  %v12720_v32 = vcombine.high %v16352_v19, %v16352_v19  ;;  %v16445_v54 = vcombine.high %v16393_v3, %v16393_v3  ;;  %v12921_v2 = vcombine.high %v16396_v40, %v16396_v40 }
 0x35c   : > { %12670 = vrot.lane.b32.xlu0 %v12545_v11, %s14486_s25  ;;  %12541 = vst.msk [vmem:[%s16341_s12 + $0x70] sm:$0x1] %vm12533_vm0, %v12524_v48  ;;  %v16450_v44 = vrot.slane %v12524_v48, %v16335_v27  ;;  %v16453_v18 = vrot.slane %v12904_v24, %v16335_v27  ;;  %v12918_v12 = vrot.slane %v12890_v55, %v16330_v30 }
 0x35d   : > { %12608 = vrot.lane.b32.xlu1 %v12549_v22, %s14493_s16  ;;  %v12553_v36 = vrot.slane %v12521_v26, %v16335_v27  ;;  %v16461_v17 = vrot.slane %v12719_v49, %v16330_v30  ;;  %v12772_v13 = vrot.slane %v16439_v8, %v16335_v27  ;;  %v16466_v16 = vrot.slane %v12720_v32, %v16330_v30 }
 0x35e   : > { %v12804_v10 = vrot.slane %v16445_v54, %v16335_v27  ;;  %v16471_v29 = vrot.slane %v12921_v2, %v16335_v27  ;;  %v16474_v41 = vrot.slane %v12918_v12, %v16335_v27  ;;  %v12561_v38 = vrot.slane %v12506_v15, %v16335_v27 }
 0x35f   : > { %v12764_v28 = vrot.slane %v16461_v17, %v16335_v27  ;;  %v12796_v30 = vrot.slane %v16466_v16, %v16335_v27  ;;  %v16484_v0 = vcombine.high %v16461_v17, %v16461_v17  ;;  %v16488_v47 = vcombine.high %v16466_v16, %v16466_v16 }
 0x360   : > { %12578 = vrot.lane.b32.xlu0 %v12553_v36, %s14494_s20  ;;  %v12920_v7 = vcombine.high %v12904_v24, %v12904_v24  ;;  %v12922_v46 = vcombine.high %v12918_v12, %v12918_v12  ;;  %v16492_v45 = vrot.slane %v13163_v59, %v16335_v27  ;;  %v16495_v51 = vrot.slane %v13162_v42, %v16335_v27 }
 0x361   : > { %12640 = vrot.lane.b32.xlu1 %v12549_v22, %s14490_s29  ;;  %v16499_v14 = vrot.slane %v16370_v52, %v16335_v27  ;;  %v16502_v23 = vrot.slane %v13164_v21, %v16335_v27  ;;  %v12780_v19 = vrot.slane %v16484_v0, %v16335_v27  ;;  %v12812_v25 = vrot.slane %v16488_v47, %v16335_v27 }
 0x362   : > { %v16509_v31 = vrot.slane %v12920_v7, %v16335_v27  ;;  %v16513_v50 = vrot.slane %v12922_v46, %v16335_v27  ;;  %v12557_v61 = vrot.slane %v12523_v63, %v16335_v27  ;;  %v12565_v33 = vrot.slane %v12520_v53, %v16335_v27 }
 0x363   : > { %v16532_v11 = vrot.slane %v16367_v57, %v16335_v27  ;;  %v12569_v52 = vrot.slane %v16410_v20, %v16335_v27  ;;  %v12760_v57 = vrot.slane %v16389_v62, %v12759_v34  ;;  %v12792_v26 = vrot.slane %v16393_v3, %v12759_v34 }
 0x364   : > { %12582 = vrot.lane.b32.xlu0 %v12561_v38, %s14494_s20  ;;  %v16551_v5 = vrot.slane %v16396_v40, %v16335_v27  ;;  %v12768_v60 = vrot.slane %v16461_v17, %v12759_v34  ;;  %v12776_v43 = vrot.slane %v16439_v8, %v12759_v34  ;;  %v12800_v62 = vrot.slane %v16466_v16, %v12759_v34 }
 0x365   : > { %12672 = vrot.lane.b32.xlu1 %v12549_v22, %s14486_s25  ;;  %v12808_v3 = vrot.slane %v16445_v54, %v12759_v34  ;;  %v12784_v40 = vrot.slane %v16484_v0, %v12759_v34  ;;  %v12816_v27 = vrot.slane %v16488_v47, %v12759_v34 }
 0x368   : > { %12610 = vrot.lane.b32.xlu0 %v12553_v36, %s14493_s16 }
 0x369   : > { %12580 = vrot.lane.b32.xlu1 %v12557_v61, %s14494_s20 }
 0x36c   : > { %12614 = vrot.lane.b32.xlu0 %v12561_v38, %s14493_s16 }
 0x36d   : > { %12584 = vrot.lane.b32.xlu1 %v12565_v33, %s14494_s20 }
 0x370   : > { %12642 = vrot.lane.b32.xlu0 %v12553_v36, %s14490_s29 }
 0x371   : > { %12612 = vrot.lane.b32.xlu1 %v12557_v61, %s14493_s16 }
 0x374   : > { %12646 = vrot.lane.b32.xlu0 %v12561_v38, %s14490_s29 }
 0x375   : > { %12616 = vrot.lane.b32.xlu1 %v12565_v33, %s14493_s16 }
 0x378   : > { %12674 = vrot.lane.b32.xlu0 %v12553_v36, %s14486_s25 }
 0x379   : > { %12644 = vrot.lane.b32.xlu1 %v12557_v61, %s14490_s29 }
 0x37c   : > { %12678 = vrot.lane.b32.xlu0 %v12561_v38, %s14486_s25 }
 0x37d   : > { %12648 = vrot.lane.b32.xlu1 %v12565_v33, %s14490_s29 }
 0x380   : > { %12955 = vrot.lane.b32.xlu0 %v16532_v11, %s14495_s13 }
 0x381   : > { %12676 = vrot.lane.b32.xlu1 %v12557_v61, %s14486_s25 }
 0x384   : > { %12586 = vrot.lane.b32.xlu0 %v12569_v52, %s14494_s20 }
 0x385   : > { %12680 = vrot.lane.b32.xlu1 %v12565_v33, %s14486_s25 }
 0x388   : > { %12618 = vrot.lane.b32.xlu0 %v12569_v52, %s14493_s16 }
 0x389   : > { %12819 = vrot.lane.b32.xlu1 %v12760_v57, %s14496_s14 }
 0x38c   : > { %12650 = vrot.lane.b32.xlu0 %v12569_v52, %s14490_s29 }
 0x38d   : > { %12835 = vrot.lane.b32.xlu1 %v12792_v26, %s14496_s14 }
 0x390   : > { %12682 = vrot.lane.b32.xlu0 %v12569_v52, %s14486_s25 }
 0x391   : > { %12957 = vrot.lane.b32.xlu1 %v16551_v5, %s14495_s13 }
 0x394   : > { %12817 = vrot.lane.b32.xlu0 %v12756_v37, %s14496_s14 }
 0x395   : > { %12588 = vrot.lane.b32.xlu1 %v16450_v44, %s14494_s20 }
 0x398   : > { %12833 = vrot.lane.b32.xlu0 %v12788_v56, %s14496_s14 }
 0x399   : > { %12620 = vrot.lane.b32.xlu1 %v16450_v44, %s14493_s16 }
 0x39c   : > { %12959 = vrot.lane.b32.xlu0 %v16422_v58, %s14495_s13 }
 0x39d   : > { %12652 = vrot.lane.b32.xlu1 %v16450_v44, %s14490_s29  ;;  %s14498_s29 = smov 40  }
 0x3a0   : > { %12963 = vrot.lane.b32.xlu0 %v16453_v18, %s14495_s13 }
 0x3a1   : > { %12684 = vrot.lane.b32.xlu1 %v16450_v44, %s14486_s25  ;;  %s14497_s25 = smov 88  }
 0x3a4   : > { %12821 = vrot.lane.b32.xlu0 %v12764_v28, %s14496_s14 }
 0x3a5   : > { %12823 = vrot.lane.b32.xlu1 %v12768_v60, %s14496_s14 }
 0x3a8   : > { %12825 = vrot.lane.b32.xlu0 %v12772_v13, %s14496_s14 }
 0x3a9   : > { %12827 = vrot.lane.b32.xlu1 %v12776_v43, %s14496_s14 }
 0x3ac   : > { %12837 = vrot.lane.b32.xlu0 %v12796_v30, %s14496_s14 }
 0x3ad   : > { %12839 = vrot.lane.b32.xlu1 %v12800_v62, %s14496_s14 }
 0x3b0   : > { %12841 = vrot.lane.b32.xlu0 %v12804_v10, %s14496_s14 }
 0x3b1   : > { %12843 = vrot.lane.b32.xlu1 %v12808_v3, %s14496_s14 }
 0x3b4   : > { %12829 = vrot.lane.b32.xlu0 %v12780_v19, %s14496_s14 }
 0x3b5   : > { %12961 = vrot.lane.b32.xlu1 %v16471_v29, %s14495_s13 }
 0x3b8   : > { %12845 = vrot.lane.b32.xlu0 %v12812_v25, %s14496_s14 }
 0x3b9   : > { %12965 = vrot.lane.b32.xlu1 %v16474_v41, %s14495_s13 }
 0x3bc   : > { %12967 = vrot.lane.b32.xlu0 %v16509_v31, %s14495_s13 }
 0x3bd   : > { %12831 = vrot.lane.b32.xlu1 %v12784_v40, %s14496_s14 }
 0x3c0   : > { %12987 = vrot.lane.b32.xlu0 %v16532_v11, %s14497_s25 }
 0x3c1   : > { %12847 = vrot.lane.b32.xlu1 %v12816_v27, %s14496_s14 }
 0x3c4   : > { %12991 = vrot.lane.b32.xlu0 %v16422_v58, %s14497_s25 }
 0x3c5   : > { %12969 = vrot.lane.b32.xlu1 %v16513_v50, %s14495_s13 }
 0x3c6   : > { %v12607_v15 = vpop.permute.xlu0 %12606  ;;  %v12575_v6 = vpop.permute.xlu1 %12574 }
 0x3c7   : > { %12630 = vst.msk [vmem:[%s16341_s12 + $0x2] sm:$0x1] %vm12533_vm0, %v12607_v15  ;;  %12598 = vst.msk [vmem:[%s16341_s12 + $0x1] sm:$0x1] %vm12533_vm0, %v12575_v6 }
 0x3c8   : > { %12995 = vrot.lane.b32.xlu0 %v16453_v18, %s14497_s25 }
 0x3c9   : > { %12989 = vrot.lane.b32.xlu1 %v16551_v5, %s14497_s25 }
 0x3ca   : > { %v12639_v9 = vpop.permute.xlu0 %12638  ;;  %v12577_v22 = vpop.permute.xlu1 %12576 }
 0x3cb   : > { %12662 = vst.msk [vmem:[%s16341_s12 + $0x3] sm:$0x1] %vm12533_vm0, %v12639_v9  ;;  %12599 = vst.msk [vmem:[%s16341_s12 + $0x11] sm:$0x1] %vm12533_vm0, %v12577_v22 }
 0x3cc   : > { %12999 = vrot.lane.b32.xlu0 %v16509_v31, %s14497_s25 }
 0x3cd   : > { %12993 = vrot.lane.b32.xlu1 %v16471_v29, %s14497_s25 }
 0x3ce   : > { %v12671_v63 = vpop.permute.xlu0 %12670 }
 0x3cf   : > { %12694 = vst.msk [vmem:[%s16341_s12 + $0x4] sm:$0x1] %vm12533_vm0, %v12671_v63  ;;  %v12609_v55 = vpop.permute.xlu1 %12608 }
 0x3d0   : > { %13019 = vrot.lane.b32.xlu0 %v16532_v11, %s14488_s11  ;;  %12631 = vst.msk [vmem:[%s16341_s12 + $0x12] sm:$0x1] %vm12533_vm0, %v12609_v55 }
 0x3d1   : > { %12997 = vrot.lane.b32.xlu1 %v16474_v41, %s14497_s25 }
 0x3d2   : > { %v12579_v53 = vpop.permute.xlu0 %12578 }
 0x3d3   : > { %12600 = vst.msk [vmem:[%s16341_s12 + $0x21] sm:$0x1] %vm12533_vm0, %v12579_v53  ;;  %v12641_v20 = vpop.permute.xlu1 %12640 }
 0x3d4   : > { %13023 = vrot.lane.b32.xlu0 %v16422_v58, %s14488_s11  ;;  %12663 = vst.msk [vmem:[%s16341_s12 + $0x13] sm:$0x1] %vm12533_vm0, %v12641_v20 }
 0x3d5   : > { %13001 = vrot.lane.b32.xlu1 %v16513_v50, %s14497_s25 }
 0x3d6   : > { %v12583_v42 = vpop.permute.xlu0 %12582 }
 0x3d7   : > { %12602 = vst.msk [vmem:[%s16341_s12 + $0x41] sm:$0x1] %vm12533_vm0, %v12583_v42  ;;  %v12673_v37 = vpop.permute.xlu1 %12672 }
 0x3d8   : > { %13027 = vrot.lane.b32.xlu0 %v16453_v18, %s14488_s11  ;;  %12695 = vst.msk [vmem:[%s16341_s12 + $0x14] sm:$0x1] %vm12533_vm0, %v12673_v37 }
 0x3d9   : > { %13021 = vrot.lane.b32.xlu1 %v16551_v5, %s14488_s11 }
 0x3da   : > { %v12611_v56 = vpop.permute.xlu0 %12610 }
 0x3db   : > { %12632 = vst.msk [vmem:[%s16341_s12 + $0x22] sm:$0x1] %vm12533_vm0, %v12611_v56  ;;  %v12581_v59 = vpop.permute.xlu1 %12580 }
 0x3dc   : > { %13031 = vrot.lane.b32.xlu0 %v16509_v31, %s14488_s11  ;;  %12601 = vst.msk [vmem:[%s16341_s12 + $0x31] sm:$0x1] %vm12533_vm0, %v12581_v59 }
 0x3dd   : > { %13025 = vrot.lane.b32.xlu1 %v16471_v29, %s14488_s11 }
 0x3de   : > { %v12615_v21 = vpop.permute.xlu0 %12614 }
 0x3df   : > { %12634 = vst.msk [vmem:[%s16341_s12 + $0x42] sm:$0x1] %vm12533_vm0, %v12615_v21  ;;  %v12585_v48 = vpop.permute.xlu1 %12584 }
 0x3e0   : > { %13051 = vrot.lane.b32.xlu0 %v16532_v11, %s14498_s29  ;;  %12603 = vst.msk [vmem:[%s16341_s12 + $0x51] sm:$0x1] %vm12533_vm0, %v12585_v48 }
 0x3e1   : > { %13029 = vrot.lane.b32.xlu1 %v16474_v41, %s14488_s11 }
 0x3e2   : > { %v12643_v24 = vpop.permute.xlu0 %12642 }
 0x3e3   : > { %12664 = vst.msk [vmem:[%s16341_s12 + $0x23] sm:$0x1] %vm12533_vm0, %v12643_v24  ;;  %v12613_v49 = vpop.permute.xlu1 %12612 }
 0x3e4   : > { %13055 = vrot.lane.b32.xlu0 %v16422_v58, %s14498_s29  ;;  %12633 = vst.msk [vmem:[%s16341_s12 + $0x32] sm:$0x1] %vm12533_vm0, %v12613_v49 }
 0x3e5   : > { %13033 = vrot.lane.b32.xlu1 %v16513_v50, %s14488_s11  ;;  %s14499_s11 = smov 16  }
 0x3e6   : > { %v12647_v8 = vpop.permute.xlu0 %12646 }
 0x3e7   : > { %12666 = vst.msk [vmem:[%s16341_s12 + $0x43] sm:$0x1] %vm12533_vm0, %v12647_v8  ;;  %v12617_v32 = vpop.permute.xlu1 %12616 }
 0x3e8   : > { %13059 = vrot.lane.b32.xlu0 %v16453_v18, %s14498_s29  ;;  %12635 = vst.msk [vmem:[%s16341_s12 + $0x52] sm:$0x1] %vm12533_vm0, %v12617_v32 }
 0x3e9   : > { %13053 = vrot.lane.b32.xlu1 %v16551_v5, %s14498_s29 }
 0x3ea   : > { %v12675_v54 = vpop.permute.xlu0 %12674 }
 0x3eb   : > { %12696 = vst.msk [vmem:[%s16341_s12 + $0x24] sm:$0x1] %vm12533_vm0, %v12675_v54  ;;  %v12645_v44 = vpop.permute.xlu1 %12644 }
 0x3ec   : > { %13063 = vrot.lane.b32.xlu0 %v16509_v31, %s14498_s29  ;;  %12665 = vst.msk [vmem:[%s16341_s12 + $0x33] sm:$0x1] %vm12533_vm0, %v12645_v44 }
 0x3ed   : > { %13057 = vrot.lane.b32.xlu1 %v16471_v29, %s14498_s29 }
 0x3ee   : > { %v12679_v2 = vpop.permute.xlu0 %12678 }
 0x3ef   : > { %12698 = vst.msk [vmem:[%s16341_s12 + $0x44] sm:$0x1] %vm12533_vm0, %v12679_v2  ;;  %v12649_v12 = vpop.permute.xlu1 %12648 }
 0x3f0   : > { %13083 = vrot.lane.b32.xlu0 %v16532_v11, %s14499_s11  ;;  %12667 = vst.msk [vmem:[%s16341_s12 + $0x53] sm:$0x1] %vm12533_vm0, %v12649_v12 }
 0x3f1   : > { %13061 = vrot.lane.b32.xlu1 %v16474_v41, %s14498_s29 }
 0x3f2   : > { %v12956_v36 = vpop.permute.xlu0 %12955 }
 0x3f3   : > { %12979 = vst.msk [vmem:[%s16341_s12 + $0x6] sm:$0x1] %vm12533_vm0, %v12956_v36  ;;  %v12677_v17 = vpop.permute.xlu1 %12676 }
 0x3f4   : > { %13087 = vrot.lane.b32.xlu0 %v16422_v58, %s14499_s11  ;;  %12697 = vst.msk [vmem:[%s16341_s12 + $0x34] sm:$0x1] %vm12533_vm0, %v12677_v17 }
 0x3f5   : > { %13065 = vrot.lane.b32.xlu1 %v16513_v50, %s14498_s29 }
 0x3f6   : > { %v12587_v13 = vpop.permute.xlu0 %12586 }
 0x3f7   : > { %12604 = vst.msk [vmem:[%s16341_s12 + $0x61] sm:$0x1] %vm12533_vm0, %v12587_v13  ;;  %v12681_v16 = vpop.permute.xlu1 %12680 }
 0x3f8   : > { %13091 = vrot.lane.b32.xlu0 %v16453_v18, %s14499_s11  ;;  %12699 = vst.msk [vmem:[%s16341_s12 + $0x54] sm:$0x1] %vm12533_vm0, %v12681_v16 }
 0x3f9   : > { %13085 = vrot.lane.b32.xlu1 %v16551_v5, %s14499_s11 }
 0x3fa   : > { %v12619_v58 = vpop.permute.xlu0 %12618 }
 0x3fb   : > { %12636 = vst.msk [vmem:[%s16341_s12 + $0x62] sm:$0x1] %vm12533_vm0, %v12619_v58  ;;  %v12820_v10 = vpop.permute.xlu1 %12819 }
 0x3fc   : > { %13095 = vrot.lane.b32.xlu0 %v16509_v31, %s14499_s11 }
 0x3fd   : > { %13089 = vrot.lane.b32.xlu1 %v16471_v29, %s14499_s11 }
 0x3fe   : > { %v12651_v38 = vpop.permute.xlu0 %12650 }
 0x3ff   : > { %12668 = vst.msk [vmem:[%s16341_s12 + $0x63] sm:$0x1] %vm12533_vm0, %v12651_v38  ;;  %v12836_v18 = vpop.permute.xlu1 %12835 }
 0x400   : > { %13197 = vrot.lane.b32.xlu0 %v16363_v4, %s14485_s18 }
 0x401   : > { %13093 = vrot.lane.b32.xlu1 %v16474_v41, %s14499_s11 }
 0x402   : > { %v12683_v28 = vpop.permute.xlu0 %12682 }
 0x403   : > { %12700 = vst.msk [vmem:[%s16341_s12 + $0x64] sm:$0x1] %vm12533_vm0, %v12683_v28  ;;  %v12958_v30 = vpop.permute.xlu1 %12957 }
 0x404   : > { %13201 = vrot.lane.b32.xlu0 %v16377_v35, %s14485_s18  ;;  %12980 = vst.msk [vmem:[%s16341_s12 + $0x16] sm:$0x1] %vm12533_vm0, %v12958_v30 }
 0x405   : > { %13097 = vrot.lane.b32.xlu1 %v16513_v50, %s14499_s11 }
 0x406   : > { %v12818_v29 = vpop.permute.xlu0 %12817 }
 0x407   : > { %v12850_v0 = vsel %vm12849_vm2, %v12818_v29, %v12820_v10  ;;  %v12589_v41 = vpop.permute.xlu1 %12588 }
 0x408   : > { %12866 = vst.msk [vmem:[%s16341_s12 + $0x5] sm:$0x1] %vm12533_vm0, %v12850_v0  ;;  %13205 = vrot.lane.b32.xlu0 %v16381_v1, %s14485_s18  ;;  %12605 = vst.msk [vmem:[%s16341_s12 + $0x71] sm:$0x1] %vm12533_vm0, %v12589_v41 }
 0x409   : > { %13199 = vrot.lane.b32.xlu1 %v16374_v39, %s14485_s18 }
 0x40a   : > { %v12834_v47 = vpop.permute.xlu0 %12833 }
 0x40b   : > { %v12854_v7 = vsel %vm12849_vm2, %v12834_v47, %v12836_v18  ;;  %v12621_v46 = vpop.permute.xlu1 %12620 }
 0x40c   : > { %12870 = vst.msk [vmem:[%s16341_s12 + $0x45] sm:$0x1] %vm12533_vm0, %v12854_v7  ;;  %13209 = vrot.lane.b32.xlu0 %v16495_v51, %s14485_s18  ;;  %12637 = vst.msk [vmem:[%s16341_s12 + $0x72] sm:$0x1] %vm12533_vm0, %v12621_v46 }
 0x40d   : > { %13203 = vrot.lane.b32.xlu1 %v16492_v45, %s14485_s18 }
 0x40e   : > { %v12960_v19 = vpop.permute.xlu0 %12959 }
 0x40f   : > { %12981 = vst.msk [vmem:[%s16341_s12 + $0x26] sm:$0x1] %vm12533_vm0, %v12960_v19  ;;  %v12653_v25 = vpop.permute.xlu1 %12652 }
 0x410   : > { %13229 = vrot.lane.b32.xlu0 %v16363_v4, %s14500_s17  ;;  %12669 = vst.msk [vmem:[%s16341_s12 + $0x73] sm:$0x1] %vm12533_vm0, %v12653_v25 }
 0x411   : > { %13207 = vrot.lane.b32.xlu1 %v16499_v14, %s14485_s18 }
 0x412   : > { %v12964_v31 = vpop.permute.xlu0 %12963 }
 0x413   : > { %12983 = vst.msk [vmem:[%s16341_s12 + $0x46] sm:$0x1] %vm12533_vm0, %v12964_v31  ;;  %v12685_v50 = vpop.permute.xlu1 %12684 }
 0x414   : > { %13233 = vrot.lane.b32.xlu0 %v16377_v35, %s14500_s17  ;;  %12701 = vst.msk [vmem:[%s16341_s12 + $0x74] sm:$0x1] %vm12533_vm0, %v12685_v50 }
 0x415   : > { %13211 = vrot.lane.b32.xlu1 %v16502_v23, %s14485_s18  ;;  %s14501_s18 = smov 72  }
 0x416   : > { %v12822_v61 = vpop.permute.xlu0 %12821 }
 0x417   : > { %v12824_v33 = vpop.permute.xlu1 %12823 }
 0x418   : > { %13237 = vrot.lane.b32.xlu0 %v16381_v1, %s14500_s17  ;;  %v12851_v11 = vsel %vm12849_vm2, %v12822_v61, %v12824_v33 }
 0x419   : > { %12867 = vst.msk [vmem:[%s16341_s12 + $0x15] sm:$0x1] %vm12533_vm0, %v12851_v11  ;;  %13231 = vrot.lane.b32.xlu1 %v16374_v39, %s14500_s17 }
 0x41a   : > { %v12826_v52 = vpop.permute.xlu0 %12825 }
 0x41b   : > { %v12828_v34 = vpop.permute.xlu1 %12827 }
 0x41c   : > { %13241 = vrot.lane.b32.xlu0 %v16495_v51, %s14500_s17  ;;  %v12852_v57 = vsel %vm12849_vm2, %v12826_v52, %v12828_v34 }
 0x41d   : > { %12868 = vst.msk [vmem:[%s16341_s12 + $0x25] sm:$0x1] %vm12533_vm0, %v12852_v57  ;;  %13235 = vrot.lane.b32.xlu1 %v16492_v45, %s14500_s17 }
 0x41e   : > { %v12838_v26 = vpop.permute.xlu0 %12837 }
 0x41f   : > { %v12840_v5 = vpop.permute.xlu1 %12839 }
 0x420   : > { %13261 = vrot.lane.b32.xlu0 %v16363_v4, %s14501_s18  ;;  %v12855_v60 = vsel %vm12849_vm2, %v12838_v26, %v12840_v5 }
 0x421   : > { %12871 = vst.msk [vmem:[%s16341_s12 + $0x55] sm:$0x1] %vm12533_vm0, %v12855_v60  ;;  %13239 = vrot.lane.b32.xlu1 %v16499_v14, %s14500_s17 }
 0x422   : > { %v12842_v43 = vpop.permute.xlu0 %12841 }
 0x423   : > { %v12844_v62 = vpop.permute.xlu1 %12843 }
 0x424   : > { %13265 = vrot.lane.b32.xlu0 %v16377_v35, %s14501_s18  ;;  %v12856_v3 = vsel %vm12849_vm2, %v12842_v43, %v12844_v62 }
 0x425   : > { %12872 = vst.msk [vmem:[%s16341_s12 + $0x65] sm:$0x1] %vm12533_vm0, %v12856_v3  ;;  %13243 = vrot.lane.b32.xlu1 %v16502_v23, %s14500_s17 }
 0x426   : > { %v12830_v40 = vpop.permute.xlu0 %12829 }
 0x427   : > { %v12962_v27 = vpop.permute.xlu1 %12961 }
 0x428   : > { %13269 = vrot.lane.b32.xlu0 %v16381_v1, %s14501_s18  ;;  %12982 = vst.msk [vmem:[%s16341_s12 + $0x36] sm:$0x1] %vm12533_vm0, %v12962_v27 }
 0x429   : > { %13263 = vrot.lane.b32.xlu1 %v16374_v39, %s14501_s18 }
 0x42a   : > { %v12846_v15 = vpop.permute.xlu0 %12845 }
 0x42b   : > { %v12966_v6 = vpop.permute.xlu1 %12965 }
 0x42c   : > { %13273 = vrot.lane.b32.xlu0 %v16495_v51, %s14501_s18  ;;  %12984 = vst.msk [vmem:[%s16341_s12 + $0x56] sm:$0x1] %vm12533_vm0, %v12966_v6 }
 0x42d   : > { %13267 = vrot.lane.b32.xlu1 %v16492_v45, %s14501_s18 }
 0x42e   : > { %v12968_v9 = vpop.permute.xlu0 %12967 }
 0x42f   : > { %12985 = vst.msk [vmem:[%s16341_s12 + $0x66] sm:$0x1] %vm12533_vm0, %v12968_v9  ;;  %v12832_v22 = vpop.permute.xlu1 %12831 }
 0x430   : > { %13293 = vrot.lane.b32.xlu0 %v16363_v4, %s14502_s19  ;;  %v12853_v63 = vsel %vm12849_vm2, %v12830_v40, %v12832_v22 }
 0x431   : > { %12869 = vst.msk [vmem:[%s16341_s12 + $0x35] sm:$0x1] %vm12533_vm0, %v12853_v63  ;;  %13271 = vrot.lane.b32.xlu1 %v16499_v14, %s14501_s18 }
 0x432   : > { %v12988_v55 = vpop.permute.xlu0 %12987 }
 0x433   : > { %13011 = vst.msk [vmem:[%s16341_s12 + $0x7] sm:$0x1] %vm12533_vm0, %v12988_v55  ;;  %v12848_v53 = vpop.permute.xlu1 %12847 }
 0x434   : > { %13297 = vrot.lane.b32.xlu0 %v16377_v35, %s14502_s19  ;;  %v12857_v20 = vsel %vm12849_vm2, %v12846_v15, %v12848_v53 }
 0x435   : > { %12873 = vst.msk [vmem:[%s16341_s12 + $0x75] sm:$0x1] %vm12533_vm0, %v12857_v20  ;;  %13275 = vrot.lane.b32.xlu1 %v16502_v23, %s14501_s18 }
 0x436   : > { %v12992_v42 = vpop.permute.xlu0 %12991 }
 0x437   : > { %13013 = vst.msk [vmem:[%s16341_s12 + $0x27] sm:$0x1] %vm12533_vm0, %v12992_v42  ;;  %v12970_v37 = vpop.permute.xlu1 %12969 }
 0x438   : > { %13301 = vrot.lane.b32.xlu0 %v16381_v1, %s14502_s19  ;;  %12986 = vst.msk [vmem:[%s16341_s12 + $0x76] sm:$0x1] %vm12533_vm0, %v12970_v37 }
 0x439   : > { %13295 = vrot.lane.b32.xlu1 %v16374_v39, %s14502_s19 }
 0x43a   : > { %v12996_v56 = vpop.permute.xlu0 %12995 }
 0x43b   : > { %13015 = vst.msk [vmem:[%s16341_s12 + $0x47] sm:$0x1] %vm12533_vm0, %v12996_v56  ;;  %v12990_v59 = vpop.permute.xlu1 %12989 }
 0x43c   : > { %13305 = vrot.lane.b32.xlu0 %v16495_v51, %s14502_s19  ;;  %13012 = vst.msk [vmem:[%s16341_s12 + $0x17] sm:$0x1] %vm12533_vm0, %v12990_v59 }
 0x43d   : > { %13299 = vrot.lane.b32.xlu1 %v16492_v45, %s14502_s19 }
 0x43e   : > { %v13000_v21 = vpop.permute.xlu0 %12999 }
 0x43f   : > { %13017 = vst.msk [vmem:[%s16341_s12 + $0x67] sm:$0x1] %vm12533_vm0, %v13000_v21  ;;  %v12994_v48 = vpop.permute.xlu1 %12993 }
 0x440   : > { %13325 = vrot.lane.b32.xlu0 %v16363_v4, %s14487_s30  ;;  %13014 = vst.msk [vmem:[%s16341_s12 + $0x37] sm:$0x1] %vm12533_vm0, %v12994_v48 }
 0x441   : > { %13303 = vrot.lane.b32.xlu1 %v16499_v14, %s14502_s19 }
 0x442   : > { %v13020_v24 = vpop.permute.xlu0 %13019 }
 0x443   : > { %13043 = vst.msk [vmem:[%s16341_s12 + $0x8] sm:$0x1] %vm12533_vm0, %v13020_v24  ;;  %v12998_v49 = vpop.permute.xlu1 %12997 }
 0x444   : > { %13329 = vrot.lane.b32.xlu0 %v16377_v35, %s14487_s30  ;;  %13016 = vst.msk [vmem:[%s16341_s12 + $0x57] sm:$0x1] %vm12533_vm0, %v12998_v49 }
 0x445   : > { %13307 = vrot.lane.b32.xlu1 %v16502_v23, %s14502_s19 }
 0x446   : > { %v13024_v4 = vpop.permute.xlu0 %13023 }
 0x447   : > { %13045 = vst.msk [vmem:[%s16341_s12 + $0x28] sm:$0x1] %vm12533_vm0, %v13024_v4  ;;  %v13002_v8 = vpop.permute.xlu1 %13001 }
 0x448   : > { %13333 = vrot.lane.b32.xlu0 %v16381_v1, %s14487_s30  ;;  %13018 = vst.msk [vmem:[%s16341_s12 + $0x77] sm:$0x1] %vm12533_vm0, %v13002_v8 }
 0x449   : > { %13327 = vrot.lane.b32.xlu1 %v16374_v39, %s14487_s30 }
 0x44a   : > { %v13028_v35 = vpop.permute.xlu0 %13027 }
 0x44b   : > { %13047 = vst.msk [vmem:[%s16341_s12 + $0x48] sm:$0x1] %vm12533_vm0, %v13028_v35  ;;  %v13022_v32 = vpop.permute.xlu1 %13021 }
 0x44c   : > { %13337 = vrot.lane.b32.xlu0 %v16495_v51, %s14487_s30  ;;  %13044 = vst.msk [vmem:[%s16341_s12 + $0x18] sm:$0x1] %vm12533_vm0, %v13022_v32 }
 0x44d   : > { %13331 = vrot.lane.b32.xlu1 %v16492_v45, %s14487_s30 }
 0x44e   : > { %v13032_v1 = vpop.permute.xlu0 %13031 }
 0x44f   : > { %13049 = vst.msk [vmem:[%s16341_s12 + $0x68] sm:$0x1] %vm12533_vm0, %v13032_v1  ;;  %v13026_v39 = vpop.permute.xlu1 %13025 }
 0x450   : > { %13046 = vst.msk [vmem:[%s16341_s12 + $0x38] sm:$0x1] %vm12533_vm0, %v13026_v39 }
 0x451   : > { %13335 = vrot.lane.b32.xlu1 %v16499_v14, %s14487_s30 }
 0x452   : > { %v13052_v54 = vpop.permute.xlu0 %13051 }
 0x453   : > { %13075 = vst.msk [vmem:[%s16341_s12 + $0x9] sm:$0x1] %vm12533_vm0, %v13052_v54  ;;  %v13030_v51 = vpop.permute.xlu1 %13029 }
 0x454   : > { %13048 = vst.msk [vmem:[%s16341_s12 + $0x58] sm:$0x1] %vm12533_vm0, %v13030_v51 }
 0x455   : > { %13339 = vrot.lane.b32.xlu1 %v16502_v23, %s14487_s30 }
 0x456   : > { %v13056_v45 = vpop.permute.xlu0 %13055 }
 0x457   : > { %13077 = vst.msk [vmem:[%s16341_s12 + $0x29] sm:$0x1] %vm12533_vm0, %v13056_v45  ;;  %v13034_v44 = vpop.permute.xlu1 %13033 }
 0x458   : > { %13050 = vst.msk [vmem:[%s16341_s12 + $0x78] sm:$0x1] %vm12533_vm0, %v13034_v44 }
 0x45a   : > { %v13060_v14 = vpop.permute.xlu0 %13059 }
 0x45b   : > { %13079 = vst.msk [vmem:[%s16341_s12 + $0x49] sm:$0x1] %vm12533_vm0, %v13060_v14  ;;  %v13054_v2 = vpop.permute.xlu1 %13053 }
 0x45c   : > { %13076 = vst.msk [vmem:[%s16341_s12 + $0x19] sm:$0x1] %vm12533_vm0, %v13054_v2 }
 0x45e   : > { %v13064_v12 = vpop.permute.xlu0 %13063 }
 0x45f   : > { %13081 = vst.msk [vmem:[%s16341_s12 + $0x69] sm:$0x1] %vm12533_vm0, %v13064_v12  ;;  %v13058_v23 = vpop.permute.xlu1 %13057 }
 0x460   : > { %13078 = vst.msk [vmem:[%s16341_s12 + $0x39] sm:$0x1] %vm12533_vm0, %v13058_v23 }
 0x462   : > { %v13084_v36 = vpop.permute.xlu0 %13083 }
 0x463   : > { %13107 = vst.msk [vmem:[%s16341_s12 + $0xa] sm:$0x1] %vm12533_vm0, %v13084_v36  ;;  %v13062_v17 = vpop.permute.xlu1 %13061 }
 0x464   : > { %13080 = vst.msk [vmem:[%s16341_s12 + $0x59] sm:$0x1] %vm12533_vm0, %v13062_v17 }
 0x466   : > { %v13088_v13 = vpop.permute.xlu0 %13087 }
 0x467   : > { %13109 = vst.msk [vmem:[%s16341_s12 + $0x2a] sm:$0x1] %vm12533_vm0, %v13088_v13  ;;  %v13066_v16 = vpop.permute.xlu1 %13065 }
 0x468   : > { %13082 = vst.msk [vmem:[%s16341_s12 + $0x79] sm:$0x1] %vm12533_vm0, %v13066_v16 }
 0x46a   : > { %v13092_v58 = vpop.permute.xlu0 %13091 }
 0x46b   : > { %13111 = vst.msk [vmem:[%s16341_s12 + $0x4a] sm:$0x1] %vm12533_vm0, %v13092_v58  ;;  %v13086_v10 = vpop.permute.xlu1 %13085 }
 0x46c   : > { %13108 = vst.msk [vmem:[%s16341_s12 + $0x1a] sm:$0x1] %vm12533_vm0, %v13086_v10 }
 0x46e   : > { %v13096_v38 = vpop.permute.xlu0 %13095 }
 0x46f   : > { %13113 = vst.msk [vmem:[%s16341_s12 + $0x6a] sm:$0x1] %vm12533_vm0, %v13096_v38  ;;  %v13090_v18 = vpop.permute.xlu1 %13089 }
 0x470   : > { %13110 = vst.msk [vmem:[%s16341_s12 + $0x3a] sm:$0x1] %vm12533_vm0, %v13090_v18 }
 0x472   : > { %v13198_v28 = vpop.permute.xlu0 %13197 }
 0x473   : > { %13221 = vst.msk [vmem:[%s16341_s12 + $0xb] sm:$0x1] %vm12533_vm0, %v13198_v28  ;;  %v13094_v30 = vpop.permute.xlu1 %13093 }
 0x474   : > { %13112 = vst.msk [vmem:[%s16341_s12 + $0x5a] sm:$0x1] %vm12533_vm0, %v13094_v30 }
 0x476   : > { %v13202_v29 = vpop.permute.xlu0 %13201 }
 0x477   : > { %13223 = vst.msk [vmem:[%s16341_s12 + $0x2b] sm:$0x1] %vm12533_vm0, %v13202_v29  ;;  %v13098_v0 = vpop.permute.xlu1 %13097 }
 0x478   : > { %13114 = vst.msk [vmem:[%s16341_s12 + $0x7a] sm:$0x1] %vm12533_vm0, %v13098_v0 }
 0x47a   : > { %v13206_v41 = vpop.permute.xlu0 %13205 }
 0x47b   : > { %13225 = vst.msk [vmem:[%s16341_s12 + $0x4b] sm:$0x1] %vm12533_vm0, %v13206_v41  ;;  %v13200_v47 = vpop.permute.xlu1 %13199 }
 0x47c   : > { %13222 = vst.msk [vmem:[%s16341_s12 + $0x1b] sm:$0x1] %vm12533_vm0, %v13200_v47 }
 0x47e   : > { %v13210_v7 = vpop.permute.xlu0 %13209 }
 0x47f   : > { %13227 = vst.msk [vmem:[%s16341_s12 + $0x6b] sm:$0x1] %vm12533_vm0, %v13210_v7  ;;  %v13204_v46 = vpop.permute.xlu1 %13203 }
 0x480   : > { %13224 = vst.msk [vmem:[%s16341_s12 + $0x3b] sm:$0x1] %vm12533_vm0, %v13204_v46 }
 0x482   : > { %v13230_v19 = vpop.permute.xlu0 %13229 }
 0x483   : > { %13253 = vst.msk [vmem:[%s16341_s12 + $0xc] sm:$0x1] %vm12533_vm0, %v13230_v19  ;;  %v13208_v25 = vpop.permute.xlu1 %13207 }
 0x484   : > { %13226 = vst.msk [vmem:[%s16341_s12 + $0x5b] sm:$0x1] %vm12533_vm0, %v13208_v25 }
 0x486   : > { %v13234_v31 = vpop.permute.xlu0 %13233 }
 0x487   : > { %13255 = vst.msk [vmem:[%s16341_s12 + $0x2c] sm:$0x1] %vm12533_vm0, %v13234_v31  ;;  %v13212_v50 = vpop.permute.xlu1 %13211 }
 0x488   : > { %13228 = vst.msk [vmem:[%s16341_s12 + $0x7b] sm:$0x1] %vm12533_vm0, %v13212_v50 }
 0x48a   : > { %v13238_v61 = vpop.permute.xlu0 %13237 }
 0x48b   : > { %13257 = vst.msk [vmem:[%s16341_s12 + $0x4c] sm:$0x1] %vm12533_vm0, %v13238_v61  ;;  %v13232_v33 = vpop.permute.xlu1 %13231 }
 0x48c   : > { %13254 = vst.msk [vmem:[%s16341_s12 + $0x1c] sm:$0x1] %vm12533_vm0, %v13232_v33 }
 0x48e   : > { %v13242_v11 = vpop.permute.xlu0 %13241 }
 0x48f   : > { %13259 = vst.msk [vmem:[%s16341_s12 + $0x6c] sm:$0x1] %vm12533_vm0, %v13242_v11  ;;  %v13236_v52 = vpop.permute.xlu1 %13235 }
 0x490   : > { %13256 = vst.msk [vmem:[%s16341_s12 + $0x3c] sm:$0x1] %vm12533_vm0, %v13236_v52 }
 0x492   : > { %v13262_v34 = vpop.permute.xlu0 %13261 }
 0x493   : > { %13285 = vst.msk [vmem:[%s16341_s12 + $0xd] sm:$0x1] %vm12533_vm0, %v13262_v34  ;;  %v13240_v57 = vpop.permute.xlu1 %13239 }
 0x494   : > { %13258 = vst.msk [vmem:[%s16341_s12 + $0x5c] sm:$0x1] %vm12533_vm0, %v13240_v57 }
 0x496   : > { %v13266_v26 = vpop.permute.xlu0 %13265 }
 0x497   : > { %13287 = vst.msk [vmem:[%s16341_s12 + $0x2d] sm:$0x1] %vm12533_vm0, %v13266_v26  ;;  %v13244_v5 = vpop.permute.xlu1 %13243 }
 0x498   : > { %13260 = vst.msk [vmem:[%s16341_s12 + $0x7c] sm:$0x1] %vm12533_vm0, %v13244_v5 }
 0x49a   : > { %v13270_v60 = vpop.permute.xlu0 %13269 }
 0x49b   : > { %13289 = vst.msk [vmem:[%s16341_s12 + $0x4d] sm:$0x1] %vm12533_vm0, %v13270_v60  ;;  %v13264_v43 = vpop.permute.xlu1 %13263 }
 0x49c   : > { %13286 = vst.msk [vmem:[%s16341_s12 + $0x1d] sm:$0x1] %vm12533_vm0, %v13264_v43 }
 0x49e   : > { %v13274_v62 = vpop.permute.xlu0 %13273 }
 0x49f   : > { %13291 = vst.msk [vmem:[%s16341_s12 + $0x6d] sm:$0x1] %vm12533_vm0, %v13274_v62  ;;  %v13268_v3 = vpop.permute.xlu1 %13267 }
 0x4a0   : > { %13288 = vst.msk [vmem:[%s16341_s12 + $0x3d] sm:$0x1] %vm12533_vm0, %v13268_v3 }
 0x4a2   : > { %v13294_v40 = vpop.permute.xlu0 %13293 }
 0x4a3   : > { %13317 = vst.msk [vmem:[%s16341_s12 + $0xe] sm:$0x1] %vm12533_vm0, %v13294_v40  ;;  %v13272_v27 = vpop.permute.xlu1 %13271 }
 0x4a4   : > { %13290 = vst.msk [vmem:[%s16341_s12 + $0x5d] sm:$0x1] %vm12533_vm0, %v13272_v27 }
 0x4a6   : > { %v13298_v15 = vpop.permute.xlu0 %13297 }
 0x4a7   : > { %13319 = vst.msk [vmem:[%s16341_s12 + $0x2e] sm:$0x1] %vm12533_vm0, %v13298_v15  ;;  %v13276_v6 = vpop.permute.xlu1 %13275 }
 0x4a8   : > { %13292 = vst.msk [vmem:[%s16341_s12 + $0x7d] sm:$0x1] %vm12533_vm0, %v13276_v6 }
 0x4aa   : > { %v13302_v9 = vpop.permute.xlu0 %13301 }
 0x4ab   : > { %13321 = vst.msk [vmem:[%s16341_s12 + $0x4e] sm:$0x1] %vm12533_vm0, %v13302_v9  ;;  %v13296_v22 = vpop.permute.xlu1 %13295 }
 0x4ac   : > { %13318 = vst.msk [vmem:[%s16341_s12 + $0x1e] sm:$0x1] %vm12533_vm0, %v13296_v22 }
 0x4ae   : > { %v13306_v63 = vpop.permute.xlu0 %13305 }
 0x4af   : > { %13323 = vst.msk [vmem:[%s16341_s12 + $0x6e] sm:$0x1] %vm12533_vm0, %v13306_v63  ;;  %v13300_v55 = vpop.permute.xlu1 %13299 }
 0x4b0   : > { %13320 = vst.msk [vmem:[%s16341_s12 + $0x3e] sm:$0x1] %vm12533_vm0, %v13300_v55 }
 0x4b2   : > { %v13326_v53 = vpop.permute.xlu0 %13325 }
 0x4b3   : > { %13349 = vst.msk [vmem:[%s16341_s12 + $0xf] sm:$0x1] %vm12533_vm0, %v13326_v53  ;;  %v13304_v20 = vpop.permute.xlu1 %13303 }
 0x4b4   : > { %13322 = vst.msk [vmem:[%s16341_s12 + $0x5e] sm:$0x1] %vm12533_vm0, %v13304_v20 }
 0x4b6   : > { %v13330_v42 = vpop.permute.xlu0 %13329 }
 0x4b7   : > { %13351 = vst.msk [vmem:[%s16341_s12 + $0x2f] sm:$0x1] %vm12533_vm0, %v13330_v42  ;;  %v13308_v37 = vpop.permute.xlu1 %13307 }
 0x4b8   : > { %13324 = vst.msk [vmem:[%s16341_s12 + $0x7e] sm:$0x1] %vm12533_vm0, %v13308_v37 }
 0x4ba   : > { %v13334_v56 = vpop.permute.xlu0 %13333 }
 0x4bb   : > { %13353 = vst.msk [vmem:[%s16341_s12 + $0x4f] sm:$0x1] %vm12533_vm0, %v13334_v56  ;;  %v13328_v59 = vpop.permute.xlu1 %13327 }
 0x4bc   : > { %13350 = vst.msk [vmem:[%s16341_s12 + $0x1f] sm:$0x1] %vm12533_vm0, %v13328_v59 }
 0x4be   : > { %v13338_v21 = vpop.permute.xlu0 %13337 }
 0x4bf   : > { %13355 = vst.msk [vmem:[%s16341_s12 + $0x6f] sm:$0x1] %vm12533_vm0, %v13338_v21  ;;  %v13332_v48 = vpop.permute.xlu1 %13331 }
 0x4c0   : > { %13352 = vst.msk [vmem:[%s16341_s12 + $0x3f] sm:$0x1] %vm12533_vm0, %v13332_v48 }
 0x4c3   : > { %v13336_v24 = vpop.permute.xlu1 %13335 }
 0x4c4   : > { %13354 = vst.msk [vmem:[%s16341_s12 + $0x5f] sm:$0x1] %vm12533_vm0, %v13336_v24 }
 0x4c7   : > { %v13340_v49 = vpop.permute.xlu1 %13339 }
 0x4c8   : > { %13356 = vst.msk [vmem:[%s16341_s12 + $0x7f] sm:$0x1] %vm12533_vm0, %v13340_v49 }
 0x4c9 PF: > { %s14_s15 = sadd.s32 1, %s14455_s15  }
 0x4ca   : > { %p11_p4 = scmp.ge.s32.totalorder %s14_s15, 4  }
 0x4cc   :  { %13 = sbr.rel (!%p11_p4) target bundleno = 1 (0x1), region = 140 }

</bundles_post_ra>
